<compile_context>
chip_gen: v7x
topology: tpu7x:2x2x1
jax: 0.10.0
libtpu: 0.0.40
codegen_flags: <defaults>
</compile_context>

<pallas_src>
import math

import jax
import jax.numpy as jnp
from jax.experimental import pallas as pl
from jax.experimental.pallas import tpu as pltpu

# ---------------- model hyper-parameters (small, consistent with the module) --
DIM = 32                        # d_model
HEADS = 4                       # nhead
HEAD_DIM = DIM // HEADS         # 8
DEPTH = 2                       # encoder layers
NUM_FEATURES = 8                # numerical features -> tokens
FF_MULT = 4
FF_DIM = DIM * FF_MULT          # 128 (dim_feedforward)
MLP_MULTS = (4, 2)
MLP_H1 = DIM * MLP_MULTS[0]     # 128
MLP_H2 = DIM * MLP_MULTS[1]     # 64
OUTPUT_DIM = 1
BATCH = 2
TOKENS = NUM_FEATURES + 1       # 9 real tokens (CLS + features)
T_PAD = 16                      # padded, sublane-aligned token count
LN_EPS = 1e-5

# constant-slab row layout (width 128, f32)
ROW_VEC = 16                            # per-layer bias / LN rows (4 * DEPTH rows)
ROW_MW1 = ROW_VEC + 4 * DEPTH           # 24: mlp_head W1 (DIM rows)
ROW_MW2 = ROW_MW1 + DIM                 # 56: mlp_head W2 (MLP_H1 rows, lanes 0:MLP_H2)
ROW_HEAD = ROW_MW2 + MLP_H1             # 184: mlp_head biases / W3 (4 rows)
CONST_ROWS = 192                        # padded to a sublane multiple


# ------------------------------ kernel ----------------------------------------
def _layer_norm(x, gamma, beta):
    mean = jnp.mean(x, axis=-1, keepdims=True)
    var = jnp.mean((x - mean) ** 2, axis=-1, keepdims=True)
    return (x - mean) * jax.lax.rsqrt(var + LN_EPS) * gamma + beta


def ft_fused_kernel(x_ref, wl_ref, wff2_ref, const_ref, out_ref):
    """Fused: feature tokenizer + CLS + pos-enc + DEPTH encoder layers + MLP head."""
    B, F = x_ref.shape
    T, D, H, HD = T_PAD, DIM, HEADS, HEAD_DIM
    BT = B * T
    scale = 1.0 / math.sqrt(HD)

    # ---- precomputed constants (single packed slab, no in-kernel iota) ----
    blk0 = const_ref[0:T, :]                               # (16, 128)
    w_tok = blk0[:, 0:D]                                   # tokenizer weight table
    bpe = blk0[:, D:2 * D]                                 # tokenizer bias + CLS + pos-enc
    neg_mask = blk0[:, 2 * D:2 * D + T]                    # (T, T) additive key-pad mask
    sel = blk0[0:F, 2 * D + T:2 * D + 2 * T]               # (F, T) feature->token scatter
    sel_cls = blk0[0:B, 2 * D + 2 * T:2 * D + 2 * T + BT]  # (B, BT) CLS-row selector
    vec_all = const_ref[ROW_VEC:ROW_VEC + 4 * DEPTH, :]    # per-layer bias/LN rows

    # ---- feature tokenizer + CLS + positional encoding ----
    x = x_ref[...]                                                         # (B, F)
    x_tok = jnp.dot(x, sel, preferred_element_type=jnp.float32)            # (B, T)
    xf = (x_tok[:, :, None] * w_tok[None, :, :] + bpe[None, :, :]).reshape(BT, D)

    def split_heads(t):
        # (BT, D) -> (H*B, T, HD); head-major batch index, pure slice+stack+reshape
        parts = [t[:, h * HD:(h + 1) * HD] for h in range(H)]
        return jnp.stack(parts, axis=0).reshape(H * B, T, HD)

    # ---- transformer encoder layers (post-norm, batch_first) ----
    for l in range(DEPTH):                                 # static unroll, DEPTH=2
        wl = wl_ref[l]                                     # (D, 4D + FF) bf16
        wqkvo = wl[:, 0:4 * D]                             # (D, 4D)
        wff1 = wl[:, 4 * D:4 * D + FF_DIM]                 # (D, FF)
        vec = vec_all[4 * l:4 * l + 4, :]                  # (4, 128) f32
        b_qkvo = vec[0:1, :]
        bo = vec[0:1, 3 * D:4 * D]
        b1f = vec[1:2, :]
        g1 = vec[2:3, 0:D]
        be1 = vec[2:3, D:2 * D]
        g2 = vec[2:3, 2 * D:3 * D]
        be2 = vec[2:3, 3 * D:4 * D]
        b2f = vec[3:4, 0:D]

        # single lane-dense (BT, 4D) bf16 projection; q/k/v sliced out (4th slab unused)
        qkv = jnp.dot(xf.astype(jnp.bfloat16), wqkvo,
                      preferred_element_type=jnp.float32) + b_qkvo
        qh = split_heads(qkv[:, 0:D])
        kh = split_heads(qkv[:, D:2 * D])
        vh = split_heads(qkv[:, 2 * D:3 * D])

        # batched attention over all (head, batch) pairs at once
        s = jnp.einsum('bqd,bkd->bqk', qh, kh,
                       preferred_element_type=jnp.float32) * scale
        s = s + neg_mask[None, :, :]
        s = s - jnp.max(s, axis=-1, keepdims=True)
        p = jnp.exp(s)
        p = p * pl.reciprocal(jnp.sum(p, axis=-1, keepdims=True), approx=True)
        oh = jnp.einsum('bqk,bkd->bqd', p, vh,
                        preferred_element_type=jnp.float32)                # (H*B, T, HD)

        # repack heads lane-dense and apply wo with ONE matmul
        oh = oh.reshape(H, BT, HD)
        heads_cat = jnp.concatenate([oh[h] for h in range(H)], axis=1)     # (BT, D)
        wo = wqkvo[:, 3 * D:4 * D]                                         # (D, D) bf16
        attn = jnp.dot(heads_cat.astype(jnp.bfloat16), wo,
                       preferred_element_type=jnp.float32) + bo

        h1 = _layer_norm(xf + attn, g1, be1)
        ff = jnp.maximum(
            jnp.dot(h1.astype(jnp.bfloat16), wff1,
                    preferred_element_type=jnp.float32) + b1f, 0.0)
        ff = jnp.dot(ff.astype(jnp.bfloat16), wff2_ref[l],
                     preferred_element_type=jnp.float32) + b2f
        xf = _layer_norm(h1 + ff, g2, be2)

    # ---- CLS extraction (precomputed selector) + MLP head ----
    cls = jnp.dot(sel_cls, xf, preferred_element_type=jnp.float32)         # (B, D)
    mlp_w1 = const_ref[ROW_MW1:ROW_MW1 + DIM, :]                           # (D, 128)
    mlp_w2 = const_ref[ROW_MW2:ROW_MW2 + MLP_H1, 0:MLP_H2]                 # (128, 64)
    headp = const_ref[ROW_HEAD:ROW_HEAD + 4, :]                            # (4, 128)

    hh = jnp.maximum(
        jnp.dot(cls, mlp_w1, preferred_element_type=jnp.float32)
        + headp[0:1, :], 0.0)                                              # (B, 128)
    hh = jnp.maximum(
        jnp.dot(hh, mlp_w2, preferred_element_type=jnp.float32)
        + headp[1:2, 0:MLP_H2], 0.0)                                       # (B, 64)
    w3 = headp[2:3, 0:MLP_H2]                                              # (1, 64)
    b3 = headp[3:4, 0:1]                                                   # (1, 1)
    out_ref[...] = jnp.sum(hh * w3, axis=-1, keepdims=True) + b3           # (B, 1)


# --------------------------- pallas_call wrapper ------------------------------
_NUM_INPUTS = 4
_ft_forward_call = pl.pallas_call(
    ft_fused_kernel,
    out_shape=jax.ShapeDtypeStruct((BATCH, OUTPUT_DIM), jnp.float32),
    in_specs=[pl.BlockSpec(memory_space=pltpu.MemorySpace.VMEM)
              for _ in range(_NUM_INPUTS)],
    out_specs=pl.BlockSpec(memory_space=pltpu.MemorySpace.VMEM),
)


@jax.jit
def ft_transformer_forward(params, x_numerical):
    return _ft_forward_call(
        x_numerical.astype(jnp.float32),
        params['w_layers'], params['wff2'], params['const'])


# ------------------------------ parameters ------------------------------------
def make_positional_encoding(max_len, d_model):
    position = jnp.arange(max_len, dtype=jnp.float32)[:, None]
    div_term = jnp.exp(jnp.arange(0, d_model, 2, dtype=jnp.float32)
                       * (-math.log(10000.0) / d_model))
    pe = jnp.zeros((max_len, d_model), dtype=jnp.float32)
    pe = pe.at[:, 0::2].set(jnp.sin(position * div_term))
    pe = pe.at[:, 1::2].set(jnp.cos(position * div_term))
    return pe


def init_params(key):
    keys = iter(jax.random.split(key, 64))

    def nrm(shape, scale_=0.02):
        return scale_ * jax.random.normal(next(keys), shape, dtype=jnp.float32)

    # Feature tokenizer (per-feature Linear(1, D)) folded, with the CLS token and
    # positional encoding, into two (T_PAD, D) tables (padded rows = 0).
    w_num = nrm((NUM_FEATURES, DIM))
    b_num = nrm((NUM_FEATURES, DIM))
    cls_tok = jax.random.normal(next(keys), (DIM,), dtype=jnp.float32)  # torch.randn(1,1,dim)
    pe = make_positional_encoding(TOKENS, DIM)
    w_tok = jnp.zeros((T_PAD, DIM), jnp.float32).at[1:TOKENS].set(w_num)
    bpe_tok = jnp.zeros((T_PAD, DIM), jnp.float32)
    bpe_tok = bpe_tok.at[0].set(cls_tok + pe[0]).at[1:TOKENS].set(b_num + pe[1:TOKENS])

    # constant matrices hoisted out of the kernel
    sel = (jnp.arange(T_PAD)[None, :] == jnp.arange(NUM_FEATURES)[:, None] + 1
           ).astype(jnp.float32)                                          # (F, T)
    neg_mask = jnp.broadcast_to(
        jnp.where(jnp.arange(T_PAD) < TOKENS, 0.0, -1e9)[None, :],
        (T_PAD, T_PAD)).astype(jnp.float32)                               # (T, T)
    sel_cls = (jnp.arange(BATCH * T_PAD)[None, :] ==
               jnp.arange(BATCH)[:, None] * T_PAD).astype(jnp.float32)    # (B, B*T)

    # encoder layers
    wl_list, wff2_list, vec_list = [], [], []
    for _ in range(DEPTH):
        wq, wk, wv, wo = (nrm((DIM, DIM)) for _ in range(4))
        bq, bk, bv, bo = (nrm((DIM,)) for _ in range(4))
        w1, b1 = nrm((DIM, FF_DIM)), nrm((FF_DIM,))
        w2, b2 = nrm((FF_DIM, DIM)), nrm((DIM,))
        g1 = jnp.ones((DIM,), jnp.float32)
        be1 = jnp.zeros((DIM,), jnp.float32)
        g2 = jnp.ones((DIM,), jnp.float32)
        be2 = jnp.zeros((DIM,), jnp.float32)
        wl_list.append(jnp.concatenate([wq, wk, wv, wo, w1], axis=1))     # (D, 4D+FF)
        wff2_list.append(w2)                                              # (FF, D)
        vec_list.append(jnp.stack([
            jnp.concatenate([bq, bk, bv, bo]),                            # row 0: qkv/o bias
            b1,                                                           # row 1: ffn bias 1
            jnp.concatenate([g1, be1, g2, be2]),                          # row 2: LN params
            jnp.concatenate([b2, jnp.zeros((FF_DIM - DIM,), jnp.float32)]),  # row 3
        ], axis=0))                                                       # (4, 128)

    # mlp_head: Linear(D,128)+ReLU -> Linear(128,64)+ReLU -> Linear(64,1)
    mlp_w1 = nrm((DIM, MLP_H1))
    mlp_w2 = nrm((MLP_H1, MLP_H2))
    w3 = nrm((MLP_H2,))
    b1h, b2h, b3h = nrm((MLP_H1,)), nrm((MLP_H2,)), nrm((OUTPUT_DIM,))
    head_pack = jnp.stack([
        b1h,
        jnp.concatenate([b2h, jnp.zeros((MLP_H1 - MLP_H2,), jnp.float32)]),
        jnp.concatenate([w3, jnp.zeros((MLP_H1 - MLP_H2,), jnp.float32)]),
        jnp.concatenate([b3h, jnp.zeros((MLP_H1 - OUTPUT_DIM,), jnp.float32)]),
    ], axis=0)                                                            # (4, 128)

    # single f32 constant slab (tokenizer tables, masks, LN/bias rows, MLP head)
    const = jnp.zeros((CONST_ROWS, 128), jnp.float32)
    const = const.at[0:T_PAD, 0:DIM].set(w_tok)
    const = const.at[0:T_PAD, DIM:2 * DIM].set(bpe_tok)
    const = const.at[0:T_PAD, 2 * DIM:2 * DIM + T_PAD].set(neg_mask)
    const = const.at[0:NUM_FEATURES, 2 * DIM + T_PAD:2 * DIM + 2 * T_PAD].set(sel)
    const = const.at[0:BATCH,
                     2 * DIM + 2 * T_PAD:2 * DIM + 2 * T_PAD + BATCH * T_PAD].set(sel_cls)
    const = const.at[ROW_VEC:ROW_VEC + 4 * DEPTH, :].set(jnp.concatenate(vec_list, axis=0))
    const = const.at[ROW_MW1:ROW_MW1 + DIM, :].set(mlp_w1)
    const = const.at[ROW_MW2:ROW_MW2 + MLP_H1, 0:MLP_H2].set(mlp_w2)
    const = const.at[ROW_HEAD:ROW_HEAD + 4, :].set(head_pack)

    return {
        'w_layers': jnp.stack(wl_list).astype(jnp.bfloat16),   # (DEPTH, D, 4D+FF) bf16
        'wff2': jnp.stack(wff2_list).astype(jnp.bfloat16),     # (DEPTH, FF, D) bf16
        'const': const,                                         # (192, 128) f32
    }


# ------------------------------- main ------------------------------------------
if __name__ == "__main__":
    key = jax.random.PRNGKey(0)
    pkey, xkey = jax.random.split(key)
    params = init_params(pkey)
    x_numerical = jax.random.normal(xkey, (BATCH, NUM_FEATURES), dtype=jnp.float32)

    out = ft_transformer_forward(params, x_numerical)
    jax.block_until_ready(out)
    assert out.shape == (BATCH, OUTPUT_DIM)
    assert bool(jnp.all(jnp.isfinite(out)))
    print("KERNEL_OK")
</pallas_src>

<mosaic_0001>
module attributes {stable_mosaic.version = 11 : i64} {
  func.func @ft_fused_kernel(%arg0: memref<2x8xf32, #tpu.memory_space<vmem>>, %arg1: memref<2x32x256xbf16, #tpu.memory_space<vmem>>, %arg2: memref<2x128x32xbf16, #tpu.memory_space<vmem>>, %arg3: memref<192x128xf32, #tpu.memory_space<vmem>>, %arg4: memref<2x1xf32, #tpu.memory_space<vmem>>) attributes {dimension_semantics = [], scalar_prefetch = 0 : i64, scratch_operands = 0 : i64, tpu.core_type = #tpu.core_type<tc>} {
    %c0 = arith.constant 0 : index
    %c0_0 = arith.constant 0 : index
    %0 = vector.load %arg3[%c0, %c0_0] : memref<192x128xf32, #tpu.memory_space<vmem>>, vector<16x128xf32>
    %1 = vector.extract_strided_slice %0 {offsets = [0, 0], sizes = [16, 32], strides = [1, 1]} : vector<16x128xf32> to vector<16x32xf32>
    %2 = vector.extract_strided_slice %0 {offsets = [0, 32], sizes = [16, 32], strides = [1, 1]} : vector<16x128xf32> to vector<16x32xf32>
    %3 = vector.extract_strided_slice %0 {offsets = [0, 64], sizes = [16, 16], strides = [1, 1]} : vector<16x128xf32> to vector<16x16xf32>
    %4 = vector.extract_strided_slice %0 {offsets = [0, 80], sizes = [8, 16], strides = [1, 1]} : vector<16x128xf32> to vector<8x16xf32>
    %5 = vector.extract_strided_slice %0 {offsets = [0, 96], sizes = [2, 32], strides = [1, 1]} : vector<16x128xf32> to vector<2x32xf32>
    %c16 = arith.constant 16 : index
    %c0_1 = arith.constant 0 : index
    %6 = vector.load %arg3[%c16, %c0_1] : memref<192x128xf32, #tpu.memory_space<vmem>>, vector<8x128xf32>
    %c0_2 = arith.constant 0 : index
    %c0_3 = arith.constant 0 : index
    %7 = vector.load %arg0[%c0_2, %c0_3] : memref<2x8xf32, #tpu.memory_space<vmem>>, vector<2x8xf32>
    %cst = arith.constant dense<0.000000e+00> : vector<2x16xf32>
    %8 = tpu.matmul %7, %4, %cst {dimension_numbers = #tpu.dot_dimension_numbers<[1], [0], [0], [1], [0, 0, 1, 1], [], []>} : vector<2x8xf32>, vector<8x16xf32>, vector<2x16xf32> -> vector<2x16xf32>
    %9 = vector.shape_cast %8 : vector<2x16xf32> to vector<2x16x1xf32>
    %10 = vector.shape_cast %1 : vector<16x32xf32> to vector<1x16x32xf32>
    %11 = vector.broadcast %9 : vector<2x16x1xf32> to vector<2x16x32xf32>
    %12 = vector.broadcast %10 : vector<1x16x32xf32> to vector<2x16x32xf32>
    %13 = arith.mulf %11, %12 : vector<2x16x32xf32>
    %14 = vector.shape_cast %2 : vector<16x32xf32> to vector<1x16x32xf32>
    %15 = vector.broadcast %14 : vector<1x16x32xf32> to vector<2x16x32xf32>
    %16 = arith.addf %13, %15 : vector<2x16x32xf32>
    %17 = vector.shape_cast %16 : vector<2x16x32xf32> to vector<32x32xf32>
    %c0_4 = arith.constant 0 : index
    %c0_5 = arith.constant 0 : index
    %c0_6 = arith.constant 0 : index
    %18 = vector.load %arg1[%c0_4, %c0_5, %c0_6] : memref<2x32x256xbf16, #tpu.memory_space<vmem>>, vector<1x32x256xbf16>
    %19 = vector.shape_cast %18 : vector<1x32x256xbf16> to vector<32x256xbf16>
    %20 = vector.extract_strided_slice %19 {offsets = [0, 0], sizes = [32, 128], strides = [1, 1]} : vector<32x256xbf16> to vector<32x128xbf16>
    %21 = vector.extract_strided_slice %19 {offsets = [0, 128], sizes = [32, 128], strides = [1, 1]} : vector<32x256xbf16> to vector<32x128xbf16>
    %22 = vector.extract_strided_slice %6 {offsets = [0, 0], sizes = [4, 128], strides = [1, 1]} : vector<8x128xf32> to vector<4x128xf32>
    %23 = vector.extract_strided_slice %22 {offsets = [0, 0], sizes = [1, 128], strides = [1, 1]} : vector<4x128xf32> to vector<1x128xf32>
    %24 = vector.extract_strided_slice %22 {offsets = [0, 96], sizes = [1, 32], strides = [1, 1]} : vector<4x128xf32> to vector<1x32xf32>
    %25 = vector.extract_strided_slice %22 {offsets = [1, 0], sizes = [1, 128], strides = [1, 1]} : vector<4x128xf32> to vector<1x128xf32>
    %26 = vector.extract_strided_slice %22 {offsets = [2, 0], sizes = [1, 32], strides = [1, 1]} : vector<4x128xf32> to vector<1x32xf32>
    %27 = vector.extract_strided_slice %22 {offsets = [2, 32], sizes = [1, 32], strides = [1, 1]} : vector<4x128xf32> to vector<1x32xf32>
    %28 = vector.extract_strided_slice %22 {offsets = [2, 64], sizes = [1, 32], strides = [1, 1]} : vector<4x128xf32> to vector<1x32xf32>
    %29 = vector.extract_strided_slice %22 {offsets = [2, 96], sizes = [1, 32], strides = [1, 1]} : vector<4x128xf32> to vector<1x32xf32>
    %30 = vector.extract_strided_slice %22 {offsets = [3, 0], sizes = [1, 32], strides = [1, 1]} : vector<4x128xf32> to vector<1x32xf32>
    %31 = arith.truncf %17 : vector<32x32xf32> to vector<32x32xbf16>
    %cst_7 = arith.constant dense<0.000000e+00> : vector<32x128xf32>
    %32 = tpu.matmul %31, %20, %cst_7 {dimension_numbers = #tpu.dot_dimension_numbers<[1], [0], [0], [1], [0, 0, 1, 1], [], []>} : vector<32x32xbf16>, vector<32x128xbf16>, vector<32x128xf32> -> vector<32x128xf32>
    %33 = vector.broadcast %23 : vector<1x128xf32> to vector<32x128xf32>
    %34 = arith.addf %32, %33 : vector<32x128xf32>
    %35 = vector.extract_strided_slice %34 {offsets = [0, 0], sizes = [32, 32], strides = [1, 1]} : vector<32x128xf32> to vector<32x32xf32>
    %36 = vector.extract_strided_slice %35 {offsets = [0, 0], sizes = [32, 8], strides = [1, 1]} : vector<32x32xf32> to vector<32x8xf32>
    %37 = vector.extract_strided_slice %35 {offsets = [0, 8], sizes = [32, 8], strides = [1, 1]} : vector<32x32xf32> to vector<32x8xf32>
    %38 = vector.extract_strided_slice %35 {offsets = [0, 16], sizes = [32, 8], strides = [1, 1]} : vector<32x32xf32> to vector<32x8xf32>
    %39 = vector.extract_strided_slice %35 {offsets = [0, 24], sizes = [32, 8], strides = [1, 1]} : vector<32x32xf32> to vector<32x8xf32>
    %40 = vector.shape_cast %36 : vector<32x8xf32> to vector<1x32x8xf32>
    %41 = vector.shape_cast %37 : vector<32x8xf32> to vector<1x32x8xf32>
    %42 = vector.shape_cast %38 : vector<32x8xf32> to vector<1x32x8xf32>
    %43 = vector.shape_cast %39 : vector<32x8xf32> to vector<1x32x8xf32>
    %44 = tpu.concatenate %40, %41, %42, %43 in 0 : vector<1x32x8xf32>, vector<1x32x8xf32>, vector<1x32x8xf32>, vector<1x32x8xf32> -> vector<4x32x8xf32>
    %45 = vector.shape_cast %44 : vector<4x32x8xf32> to vector<8x16x8xf32>
    %46 = vector.extract_strided_slice %34 {offsets = [0, 32], sizes = [32, 32], strides = [1, 1]} : vector<32x128xf32> to vector<32x32xf32>
    %47 = vector.extract_strided_slice %46 {offsets = [0, 0], sizes = [32, 8], strides = [1, 1]} : vector<32x32xf32> to vector<32x8xf32>
    %48 = vector.extract_strided_slice %46 {offsets = [0, 8], sizes = [32, 8], strides = [1, 1]} : vector<32x32xf32> to vector<32x8xf32>
    %49 = vector.extract_strided_slice %46 {offsets = [0, 16], sizes = [32, 8], strides = [1, 1]} : vector<32x32xf32> to vector<32x8xf32>
    %50 = vector.extract_strided_slice %46 {offsets = [0, 24], sizes = [32, 8], strides = [1, 1]} : vector<32x32xf32> to vector<32x8xf32>
    %51 = vector.shape_cast %47 : vector<32x8xf32> to vector<1x32x8xf32>
    %52 = vector.shape_cast %48 : vector<32x8xf32> to vector<1x32x8xf32>
    %53 = vector.shape_cast %49 : vector<32x8xf32> to vector<1x32x8xf32>
    %54 = vector.shape_cast %50 : vector<32x8xf32> to vector<1x32x8xf32>
    %55 = tpu.concatenate %51, %52, %53, %54 in 0 : vector<1x32x8xf32>, vector<1x32x8xf32>, vector<1x32x8xf32>, vector<1x32x8xf32> -> vector<4x32x8xf32>
    %56 = vector.shape_cast %55 : vector<4x32x8xf32> to vector<8x16x8xf32>
    %57 = vector.extract_strided_slice %34 {offsets = [0, 64], sizes = [32, 32], strides = [1, 1]} : vector<32x128xf32> to vector<32x32xf32>
    %58 = vector.extract_strided_slice %57 {offsets = [0, 0], sizes = [32, 8], strides = [1, 1]} : vector<32x32xf32> to vector<32x8xf32>
    %59 = vector.extract_strided_slice %57 {offsets = [0, 8], sizes = [32, 8], strides = [1, 1]} : vector<32x32xf32> to vector<32x8xf32>
    %60 = vector.extract_strided_slice %57 {offsets = [0, 16], sizes = [32, 8], strides = [1, 1]} : vector<32x32xf32> to vector<32x8xf32>
    %61 = vector.extract_strided_slice %57 {offsets = [0, 24], sizes = [32, 8], strides = [1, 1]} : vector<32x32xf32> to vector<32x8xf32>
    %62 = vector.shape_cast %58 : vector<32x8xf32> to vector<1x32x8xf32>
    %63 = vector.shape_cast %59 : vector<32x8xf32> to vector<1x32x8xf32>
    %64 = vector.shape_cast %60 : vector<32x8xf32> to vector<1x32x8xf32>
    %65 = vector.shape_cast %61 : vector<32x8xf32> to vector<1x32x8xf32>
    %66 = tpu.concatenate %62, %63, %64, %65 in 0 : vector<1x32x8xf32>, vector<1x32x8xf32>, vector<1x32x8xf32>, vector<1x32x8xf32> -> vector<4x32x8xf32>
    %67 = vector.shape_cast %66 : vector<4x32x8xf32> to vector<8x16x8xf32>
    "tpu.trace_start"() <{level = 10 : i32, message = "bqd,bkd->bqk"}> : () -> ()
    %cst_8 = arith.constant dense<0.000000e+00> : vector<8x16x16xf32>
    %68 = tpu.matmul %45, %56, %cst_8 {dimension_numbers = #tpu.dot_dimension_numbers<[2], [2], [1], [1], [0, 0, 0, 1, 1, 1], [0], [0]>} : vector<8x16x8xf32>, vector<8x16x8xf32>, vector<8x16x16xf32> -> vector<8x16x16xf32>
    "tpu.trace_stop"() : () -> ()
    %cst_9 = arith.constant 0.353553385 : f32
    %69 = vector.broadcast %cst_9 : f32 to vector<8x16x16xf32>
    %70 = arith.mulf %68, %69 : vector<8x16x16xf32>
    %71 = vector.shape_cast %3 : vector<16x16xf32> to vector<1x16x16xf32>
    %72 = vector.broadcast %71 : vector<1x16x16xf32> to vector<8x16x16xf32>
    %73 = arith.addf %70, %72 : vector<8x16x16xf32>
    %cst_10 = arith.constant dense<0xFF800000> : vector<8x16xf32>
    %74 = vector.multi_reduction <maximumf>, %73, %cst_10 [2] : vector<8x16x16xf32> to vector<8x16xf32>
    %75 = vector.shape_cast %74 : vector<8x16xf32> to vector<8x16x1xf32>
    %76 = vector.broadcast %75 : vector<8x16x1xf32> to vector<8x16x16xf32>
    %77 = arith.subf %73, %76 : vector<8x16x16xf32>
    %78 = math.exp %77 : vector<8x16x16xf32>
    %cst_11 = arith.constant dense<0.000000e+00> : vector<8x16xf32>
    %79 = vector.multi_reduction <add>, %78, %cst_11 [2] : vector<8x16x16xf32> to vector<8x16xf32>
    %80 = vector.shape_cast %79 : vector<8x16xf32> to vector<8x16x1xf32>
    %81 = tpu.reciprocal %80 {approx = true} : vector<8x16x1xf32> -> vector<8x16x1xf32>
    %82 = vector.broadcast %81 : vector<8x16x1xf32> to vector<8x16x16xf32>
    %83 = arith.mulf %78, %82 : vector<8x16x16xf32>
    "tpu.trace_start"() <{level = 10 : i32, message = "bqk,bkd->bqd"}> : () -> ()
    %cst_12 = arith.constant dense<0.000000e+00> : vector<8x16x8xf32>
    %84 = tpu.matmul %83, %67, %cst_12 {dimension_numbers = #tpu.dot_dimension_numbers<[2], [1], [1], [2], [0, 0, 0, 1, 1, 2], [0], [0]>} : vector<8x16x16xf32>, vector<8x16x8xf32>, vector<8x16x8xf32> -> vector<8x16x8xf32>
    "tpu.trace_stop"() : () -> ()
    %85 = vector.shape_cast %84 : vector<8x16x8xf32> to vector<4x32x8xf32>
    %86 = vector.extract_strided_slice %85 {offsets = [0, 0, 0], sizes = [1, 32, 8], strides = [1, 1, 1]} : vector<4x32x8xf32> to vector<1x32x8xf32>
    %87 = vector.shape_cast %86 : vector<1x32x8xf32> to vector<32x8xf32>
    %88 = vector.extract_strided_slice %85 {offsets = [1, 0, 0], sizes = [1, 32, 8], strides = [1, 1, 1]} : vector<4x32x8xf32> to vector<1x32x8xf32>
    %89 = vector.shape_cast %88 : vector<1x32x8xf32> to vector<32x8xf32>
    %90 = vector.extract_strided_slice %85 {offsets = [2, 0, 0], sizes = [1, 32, 8], strides = [1, 1, 1]} : vector<4x32x8xf32> to vector<1x32x8xf32>
    %91 = vector.shape_cast %90 : vector<1x32x8xf32> to vector<32x8xf32>
    %92 = vector.extract_strided_slice %85 {offsets = [3, 0, 0], sizes = [1, 32, 8], strides = [1, 1, 1]} : vector<4x32x8xf32> to vector<1x32x8xf32>
    %93 = vector.shape_cast %92 : vector<1x32x8xf32> to vector<32x8xf32>
    %94 = tpu.concatenate %87, %89, %91, %93 in 1 : vector<32x8xf32>, vector<32x8xf32>, vector<32x8xf32>, vector<32x8xf32> -> vector<32x32xf32>
    %95 = vector.extract_strided_slice %20 {offsets = [0, 96], sizes = [32, 32], strides = [1, 1]} : vector<32x128xbf16> to vector<32x32xbf16>
    %96 = arith.truncf %94 : vector<32x32xf32> to vector<32x32xbf16>
    %cst_13 = arith.constant dense<0.000000e+00> : vector<32x32xf32>
    %97 = tpu.matmul %96, %95, %cst_13 {dimension_numbers = #tpu.dot_dimension_numbers<[1], [0], [0], [1], [0, 0, 1, 1], [], []>} : vector<32x32xbf16>, vector<32x32xbf16>, vector<32x32xf32> -> vector<32x32xf32>
    %98 = vector.broadcast %24 : vector<1x32xf32> to vector<32x32xf32>
    %99 = arith.addf %97, %98 : vector<32x32xf32>
    %100 = arith.addf %17, %99 : vector<32x32xf32>
    %cst_14 = arith.constant dense<0.000000e+00> : vector<32xf32>
    %101 = vector.multi_reduction <add>, %100, %cst_14 [1] : vector<32x32xf32> to vector<32xf32>
    %102 = vector.shape_cast %101 : vector<32xf32> to vector<32x1xf32>
    %cst_15 = arith.constant 3.200000e+01 : f32
    %103 = vector.broadcast %cst_15 : f32 to vector<32x1xf32>
    %104 = arith.divf %102, %103 : vector<32x1xf32>
    %105 = vector.broadcast %104 : vector<32x1xf32> to vector<32x32xf32>
    %106 = arith.subf %100, %105 : vector<32x32xf32>
    %107 = arith.mulf %106, %106 : vector<32x32xf32>
    %cst_16 = arith.constant dense<0.000000e+00> : vector<32xf32>
    %108 = vector.multi_reduction <add>, %107, %cst_16 [1] : vector<32x32xf32> to vector<32xf32>
    %109 = vector.shape_cast %108 : vector<32xf32> to vector<32x1xf32>
    %cst_17 = arith.constant 3.200000e+01 : f32
    %110 = vector.broadcast %cst_17 : f32 to vector<32x1xf32>
    %111 = arith.divf %109, %110 : vector<32x1xf32>
    %112 = vector.broadcast %104 : vector<32x1xf32> to vector<32x32xf32>
    %113 = arith.subf %100, %112 : vector<32x32xf32>
    %cst_18 = arith.constant 9.99999974E-6 : f32
    %114 = vector.broadcast %cst_18 : f32 to vector<32x1xf32>
    %115 = arith.addf %111, %114 : vector<32x1xf32>
    %116 = math.rsqrt %115 : vector<32x1xf32>
    %117 = vector.broadcast %116 : vector<32x1xf32> to vector<32x32xf32>
    %118 = arith.mulf %113, %117 : vector<32x32xf32>
    %119 = vector.broadcast %26 : vector<1x32xf32> to vector<32x32xf32>
    %120 = arith.mulf %118, %119 : vector<32x32xf32>
    %121 = vector.broadcast %27 : vector<1x32xf32> to vector<32x32xf32>
    %122 = arith.addf %120, %121 : vector<32x32xf32>
    %123 = arith.truncf %122 : vector<32x32xf32> to vector<32x32xbf16>
    %cst_19 = arith.constant dense<0.000000e+00> : vector<32x128xf32>
    %124 = tpu.matmul %123, %21, %cst_19 {dimension_numbers = #tpu.dot_dimension_numbers<[1], [0], [0], [1], [0, 0, 1, 1], [], []>} : vector<32x32xbf16>, vector<32x128xbf16>, vector<32x128xf32> -> vector<32x128xf32>
    %125 = vector.broadcast %25 : vector<1x128xf32> to vector<32x128xf32>
    %126 = arith.addf %124, %125 : vector<32x128xf32>
    %cst_20 = arith.constant 0.000000e+00 : f32
    %127 = vector.broadcast %cst_20 : f32 to vector<32x128xf32>
    %128 = arith.maximumf %126, %127 : vector<32x128xf32>
    %129 = arith.truncf %128 : vector<32x128xf32> to vector<32x128xbf16>
    %c0_21 = arith.constant 0 : index
    %c0_22 = arith.constant 0 : index
    %c0_23 = arith.constant 0 : index
    %130 = vector.load %arg2[%c0_21, %c0_22, %c0_23] : memref<2x128x32xbf16, #tpu.memory_space<vmem>>, vector<1x128x32xbf16>
    %131 = vector.shape_cast %130 : vector<1x128x32xbf16> to vector<128x32xbf16>
    %cst_24 = arith.constant dense<0.000000e+00> : vector<32x32xf32>
    %132 = tpu.matmul %129, %131, %cst_24 {dimension_numbers = #tpu.dot_dimension_numbers<[1], [0], [0], [1], [0, 0, 1, 1], [], []>} : vector<32x128xbf16>, vector<128x32xbf16>, vector<32x32xf32> -> vector<32x32xf32>
    %133 = vector.broadcast %30 : vector<1x32xf32> to vector<32x32xf32>
    %134 = arith.addf %132, %133 : vector<32x32xf32>
    %135 = arith.addf %122, %134 : vector<32x32xf32>
    %cst_25 = arith.constant dense<0.000000e+00> : vector<32xf32>
    %136 = vector.multi_reduction <add>, %135, %cst_25 [1] : vector<32x32xf32> to vector<32xf32>
    %137 = vector.shape_cast %136 : vector<32xf32> to vector<32x1xf32>
    %cst_26 = arith.constant 3.200000e+01 : f32
    %138 = vector.broadcast %cst_26 : f32 to vector<32x1xf32>
    %139 = arith.divf %137, %138 : vector<32x1xf32>
    %140 = vector.broadcast %139 : vector<32x1xf32> to vector<32x32xf32>
    %141 = arith.subf %135, %140 : vector<32x32xf32>
    %142 = arith.mulf %141, %141 : vector<32x32xf32>
    %cst_27 = arith.constant dense<0.000000e+00> : vector<32xf32>
    %143 = vector.multi_reduction <add>, %142, %cst_27 [1] : vector<32x32xf32> to vector<32xf32>
    %144 = vector.shape_cast %143 : vector<32xf32> to vector<32x1xf32>
    %cst_28 = arith.constant 3.200000e+01 : f32
    %145 = vector.broadcast %cst_28 : f32 to vector<32x1xf32>
    %146 = arith.divf %144, %145 : vector<32x1xf32>
    %147 = vector.broadcast %139 : vector<32x1xf32> to vector<32x32xf32>
    %148 = arith.subf %135, %147 : vector<32x32xf32>
    %cst_29 = arith.constant 9.99999974E-6 : f32
    %149 = vector.broadcast %cst_29 : f32 to vector<32x1xf32>
    %150 = arith.addf %146, %149 : vector<32x1xf32>
    %151 = math.rsqrt %150 : vector<32x1xf32>
    %152 = vector.broadcast %151 : vector<32x1xf32> to vector<32x32xf32>
    %153 = arith.mulf %148, %152 : vector<32x32xf32>
    %154 = vector.broadcast %28 : vector<1x32xf32> to vector<32x32xf32>
    %155 = arith.mulf %153, %154 : vector<32x32xf32>
    %156 = vector.broadcast %29 : vector<1x32xf32> to vector<32x32xf32>
    %157 = arith.addf %155, %156 : vector<32x32xf32>
    %c1 = arith.constant 1 : index
    %c0_30 = arith.constant 0 : index
    %c0_31 = arith.constant 0 : index
    %158 = vector.load %arg1[%c1, %c0_30, %c0_31] : memref<2x32x256xbf16, #tpu.memory_space<vmem>>, vector<1x32x256xbf16>
    %159 = vector.shape_cast %158 : vector<1x32x256xbf16> to vector<32x256xbf16>
    %160 = vector.extract_strided_slice %159 {offsets = [0, 0], sizes = [32, 128], strides = [1, 1]} : vector<32x256xbf16> to vector<32x128xbf16>
    %161 = vector.extract_strided_slice %159 {offsets = [0, 128], sizes = [32, 128], strides = [1, 1]} : vector<32x256xbf16> to vector<32x128xbf16>
    %162 = vector.extract_strided_slice %6 {offsets = [4, 0], sizes = [4, 128], strides = [1, 1]} : vector<8x128xf32> to vector<4x128xf32>
    %163 = vector.extract_strided_slice %162 {offsets = [0, 0], sizes = [1, 128], strides = [1, 1]} : vector<4x128xf32> to vector<1x128xf32>
    %164 = vector.extract_strided_slice %162 {offsets = [0, 96], sizes = [1, 32], strides = [1, 1]} : vector<4x128xf32> to vector<1x32xf32>
    %165 = vector.extract_strided_slice %162 {offsets = [1, 0], sizes = [1, 128], strides = [1, 1]} : vector<4x128xf32> to vector<1x128xf32>
    %166 = vector.extract_strided_slice %162 {offsets = [2, 0], sizes = [1, 32], strides = [1, 1]} : vector<4x128xf32> to vector<1x32xf32>
    %167 = vector.extract_strided_slice %162 {offsets = [2, 32], sizes = [1, 32], strides = [1, 1]} : vector<4x128xf32> to vector<1x32xf32>
    %168 = vector.extract_strided_slice %162 {offsets = [2, 64], sizes = [1, 32], strides = [1, 1]} : vector<4x128xf32> to vector<1x32xf32>
    %169 = vector.extract_strided_slice %162 {offsets = [2, 96], sizes = [1, 32], strides = [1, 1]} : vector<4x128xf32> to vector<1x32xf32>
    %170 = vector.extract_strided_slice %162 {offsets = [3, 0], sizes = [1, 32], strides = [1, 1]} : vector<4x128xf32> to vector<1x32xf32>
    %171 = arith.truncf %157 : vector<32x32xf32> to vector<32x32xbf16>
    %cst_32 = arith.constant dense<0.000000e+00> : vector<32x128xf32>
    %172 = tpu.matmul %171, %160, %cst_32 {dimension_numbers = #tpu.dot_dimension_numbers<[1], [0], [0], [1], [0, 0, 1, 1], [], []>} : vector<32x32xbf16>, vector<32x128xbf16>, vector<32x128xf32> -> vector<32x128xf32>
    %173 = vector.broadcast %163 : vector<1x128xf32> to vector<32x128xf32>
    %174 = arith.addf %172, %173 : vector<32x128xf32>
    %175 = vector.extract_strided_slice %174 {offsets = [0, 0], sizes = [32, 32], strides = [1, 1]} : vector<32x128xf32> to vector<32x32xf32>
    %176 = vector.extract_strided_slice %175 {offsets = [0, 0], sizes = [32, 8], strides = [1, 1]} : vector<32x32xf32> to vector<32x8xf32>
    %177 = vector.extract_strided_slice %175 {offsets = [0, 8], sizes = [32, 8], strides = [1, 1]} : vector<32x32xf32> to vector<32x8xf32>
    %178 = vector.extract_strided_slice %175 {offsets = [0, 16], sizes = [32, 8], strides = [1, 1]} : vector<32x32xf32> to vector<32x8xf32>
    %179 = vector.extract_strided_slice %175 {offsets = [0, 24], sizes = [32, 8], strides = [1, 1]} : vector<32x32xf32> to vector<32x8xf32>
    %180 = vector.shape_cast %176 : vector<32x8xf32> to vector<1x32x8xf32>
    %181 = vector.shape_cast %177 : vector<32x8xf32> to vector<1x32x8xf32>
    %182 = vector.shape_cast %178 : vector<32x8xf32> to vector<1x32x8xf32>
    %183 = vector.shape_cast %179 : vector<32x8xf32> to vector<1x32x8xf32>
    %184 = tpu.concatenate %180, %181, %182, %183 in 0 : vector<1x32x8xf32>, vector<1x32x8xf32>, vector<1x32x8xf32>, vector<1x32x8xf32> -> vector<4x32x8xf32>
    %185 = vector.shape_cast %184 : vector<4x32x8xf32> to vector<8x16x8xf32>
    %186 = vector.extract_strided_slice %174 {offsets = [0, 32], sizes = [32, 32], strides = [1, 1]} : vector<32x128xf32> to vector<32x32xf32>
    %187 = vector.extract_strided_slice %186 {offsets = [0, 0], sizes = [32, 8], strides = [1, 1]} : vector<32x32xf32> to vector<32x8xf32>
    %188 = vector.extract_strided_slice %186 {offsets = [0, 8], sizes = [32, 8], strides = [1, 1]} : vector<32x32xf32> to vector<32x8xf32>
    %189 = vector.extract_strided_slice %186 {offsets = [0, 16], sizes = [32, 8], strides = [1, 1]} : vector<32x32xf32> to vector<32x8xf32>
    %190 = vector.extract_strided_slice %186 {offsets = [0, 24], sizes = [32, 8], strides = [1, 1]} : vector<32x32xf32> to vector<32x8xf32>
    %191 = vector.shape_cast %187 : vector<32x8xf32> to vector<1x32x8xf32>
    %192 = vector.shape_cast %188 : vector<32x8xf32> to vector<1x32x8xf32>
    %193 = vector.shape_cast %189 : vector<32x8xf32> to vector<1x32x8xf32>
    %194 = vector.shape_cast %190 : vector<32x8xf32> to vector<1x32x8xf32>
    %195 = tpu.concatenate %191, %192, %193, %194 in 0 : vector<1x32x8xf32>, vector<1x32x8xf32>, vector<1x32x8xf32>, vector<1x32x8xf32> -> vector<4x32x8xf32>
    %196 = vector.shape_cast %195 : vector<4x32x8xf32> to vector<8x16x8xf32>
    %197 = vector.extract_strided_slice %174 {offsets = [0, 64], sizes = [32, 32], strides = [1, 1]} : vector<32x128xf32> to vector<32x32xf32>
    %198 = vector.extract_strided_slice %197 {offsets = [0, 0], sizes = [32, 8], strides = [1, 1]} : vector<32x32xf32> to vector<32x8xf32>
    %199 = vector.extract_strided_slice %197 {offsets = [0, 8], sizes = [32, 8], strides = [1, 1]} : vector<32x32xf32> to vector<32x8xf32>
    %200 = vector.extract_strided_slice %197 {offsets = [0, 16], sizes = [32, 8], strides = [1, 1]} : vector<32x32xf32> to vector<32x8xf32>
    %201 = vector.extract_strided_slice %197 {offsets = [0, 24], sizes = [32, 8], strides = [1, 1]} : vector<32x32xf32> to vector<32x8xf32>
    %202 = vector.shape_cast %198 : vector<32x8xf32> to vector<1x32x8xf32>
    %203 = vector.shape_cast %199 : vector<32x8xf32> to vector<1x32x8xf32>
    %204 = vector.shape_cast %200 : vector<32x8xf32> to vector<1x32x8xf32>
    %205 = vector.shape_cast %201 : vector<32x8xf32> to vector<1x32x8xf32>
    %206 = tpu.concatenate %202, %203, %204, %205 in 0 : vector<1x32x8xf32>, vector<1x32x8xf32>, vector<1x32x8xf32>, vector<1x32x8xf32> -> vector<4x32x8xf32>
    %207 = vector.shape_cast %206 : vector<4x32x8xf32> to vector<8x16x8xf32>
    "tpu.trace_start"() <{level = 10 : i32, message = "bqd,bkd->bqk"}> : () -> ()
    %cst_33 = arith.constant dense<0.000000e+00> : vector<8x16x16xf32>
    %208 = tpu.matmul %185, %196, %cst_33 {dimension_numbers = #tpu.dot_dimension_numbers<[2], [2], [1], [1], [0, 0, 0, 1, 1, 1], [0], [0]>} : vector<8x16x8xf32>, vector<8x16x8xf32>, vector<8x16x16xf32> -> vector<8x16x16xf32>
    "tpu.trace_stop"() : () -> ()
    %cst_34 = arith.constant 0.353553385 : f32
    %209 = vector.broadcast %cst_34 : f32 to vector<8x16x16xf32>
    %210 = arith.mulf %208, %209 : vector<8x16x16xf32>
    %211 = vector.shape_cast %3 : vector<16x16xf32> to vector<1x16x16xf32>
    %212 = vector.broadcast %211 : vector<1x16x16xf32> to vector<8x16x16xf32>
    %213 = arith.addf %210, %212 : vector<8x16x16xf32>
    %cst_35 = arith.constant dense<0xFF800000> : vector<8x16xf32>
    %214 = vector.multi_reduction <maximumf>, %213, %cst_35 [2] : vector<8x16x16xf32> to vector<8x16xf32>
    %215 = vector.shape_cast %214 : vector<8x16xf32> to vector<8x16x1xf32>
    %216 = vector.broadcast %215 : vector<8x16x1xf32> to vector<8x16x16xf32>
    %217 = arith.subf %213, %216 : vector<8x16x16xf32>
    %218 = math.exp %217 : vector<8x16x16xf32>
    %cst_36 = arith.constant dense<0.000000e+00> : vector<8x16xf32>
    %219 = vector.multi_reduction <add>, %218, %cst_36 [2] : vector<8x16x16xf32> to vector<8x16xf32>
    %220 = vector.shape_cast %219 : vector<8x16xf32> to vector<8x16x1xf32>
    %221 = tpu.reciprocal %220 {approx = true} : vector<8x16x1xf32> -> vector<8x16x1xf32>
    %222 = vector.broadcast %221 : vector<8x16x1xf32> to vector<8x16x16xf32>
    %223 = arith.mulf %218, %222 : vector<8x16x16xf32>
    "tpu.trace_start"() <{level = 10 : i32, message = "bqk,bkd->bqd"}> : () -> ()
    %cst_37 = arith.constant dense<0.000000e+00> : vector<8x16x8xf32>
    %224 = tpu.matmul %223, %207, %cst_37 {dimension_numbers = #tpu.dot_dimension_numbers<[2], [1], [1], [2], [0, 0, 0, 1, 1, 2], [0], [0]>} : vector<8x16x16xf32>, vector<8x16x8xf32>, vector<8x16x8xf32> -> vector<8x16x8xf32>
    "tpu.trace_stop"() : () -> ()
    %225 = vector.shape_cast %224 : vector<8x16x8xf32> to vector<4x32x8xf32>
    %226 = vector.extract_strided_slice %225 {offsets = [0, 0, 0], sizes = [1, 32, 8], strides = [1, 1, 1]} : vector<4x32x8xf32> to vector<1x32x8xf32>
    %227 = vector.shape_cast %226 : vector<1x32x8xf32> to vector<32x8xf32>
    %228 = vector.extract_strided_slice %225 {offsets = [1, 0, 0], sizes = [1, 32, 8], strides = [1, 1, 1]} : vector<4x32x8xf32> to vector<1x32x8xf32>
    %229 = vector.shape_cast %228 : vector<1x32x8xf32> to vector<32x8xf32>
    %230 = vector.extract_strided_slice %225 {offsets = [2, 0, 0], sizes = [1, 32, 8], strides = [1, 1, 1]} : vector<4x32x8xf32> to vector<1x32x8xf32>
    %231 = vector.shape_cast %230 : vector<1x32x8xf32> to vector<32x8xf32>
    %232 = vector.extract_strided_slice %225 {offsets = [3, 0, 0], sizes = [1, 32, 8], strides = [1, 1, 1]} : vector<4x32x8xf32> to vector<1x32x8xf32>
    %233 = vector.shape_cast %232 : vector<1x32x8xf32> to vector<32x8xf32>
    %234 = tpu.concatenate %227, %229, %231, %233 in 1 : vector<32x8xf32>, vector<32x8xf32>, vector<32x8xf32>, vector<32x8xf32> -> vector<32x32xf32>
    %235 = vector.extract_strided_slice %160 {offsets = [0, 96], sizes = [32, 32], strides = [1, 1]} : vector<32x128xbf16> to vector<32x32xbf16>
    %236 = arith.truncf %234 : vector<32x32xf32> to vector<32x32xbf16>
    %cst_38 = arith.constant dense<0.000000e+00> : vector<32x32xf32>
    %237 = tpu.matmul %236, %235, %cst_38 {dimension_numbers = #tpu.dot_dimension_numbers<[1], [0], [0], [1], [0, 0, 1, 1], [], []>} : vector<32x32xbf16>, vector<32x32xbf16>, vector<32x32xf32> -> vector<32x32xf32>
    %238 = vector.broadcast %164 : vector<1x32xf32> to vector<32x32xf32>
    %239 = arith.addf %237, %238 : vector<32x32xf32>
    %240 = arith.addf %157, %239 : vector<32x32xf32>
    %cst_39 = arith.constant dense<0.000000e+00> : vector<32xf32>
    %241 = vector.multi_reduction <add>, %240, %cst_39 [1] : vector<32x32xf32> to vector<32xf32>
    %242 = vector.shape_cast %241 : vector<32xf32> to vector<32x1xf32>
    %cst_40 = arith.constant 3.200000e+01 : f32
    %243 = vector.broadcast %cst_40 : f32 to vector<32x1xf32>
    %244 = arith.divf %242, %243 : vector<32x1xf32>
    %245 = vector.broadcast %244 : vector<32x1xf32> to vector<32x32xf32>
    %246 = arith.subf %240, %245 : vector<32x32xf32>
    %247 = arith.mulf %246, %246 : vector<32x32xf32>
    %cst_41 = arith.constant dense<0.000000e+00> : vector<32xf32>
    %248 = vector.multi_reduction <add>, %247, %cst_41 [1] : vector<32x32xf32> to vector<32xf32>
    %249 = vector.shape_cast %248 : vector<32xf32> to vector<32x1xf32>
    %cst_42 = arith.constant 3.200000e+01 : f32
    %250 = vector.broadcast %cst_42 : f32 to vector<32x1xf32>
    %251 = arith.divf %249, %250 : vector<32x1xf32>
    %252 = vector.broadcast %244 : vector<32x1xf32> to vector<32x32xf32>
    %253 = arith.subf %240, %252 : vector<32x32xf32>
    %cst_43 = arith.constant 9.99999974E-6 : f32
    %254 = vector.broadcast %cst_43 : f32 to vector<32x1xf32>
    %255 = arith.addf %251, %254 : vector<32x1xf32>
    %256 = math.rsqrt %255 : vector<32x1xf32>
    %257 = vector.broadcast %256 : vector<32x1xf32> to vector<32x32xf32>
    %258 = arith.mulf %253, %257 : vector<32x32xf32>
    %259 = vector.broadcast %166 : vector<1x32xf32> to vector<32x32xf32>
    %260 = arith.mulf %258, %259 : vector<32x32xf32>
    %261 = vector.broadcast %167 : vector<1x32xf32> to vector<32x32xf32>
    %262 = arith.addf %260, %261 : vector<32x32xf32>
    %263 = arith.truncf %262 : vector<32x32xf32> to vector<32x32xbf16>
    %cst_44 = arith.constant dense<0.000000e+00> : vector<32x128xf32>
    %264 = tpu.matmul %263, %161, %cst_44 {dimension_numbers = #tpu.dot_dimension_numbers<[1], [0], [0], [1], [0, 0, 1, 1], [], []>} : vector<32x32xbf16>, vector<32x128xbf16>, vector<32x128xf32> -> vector<32x128xf32>
    %265 = vector.broadcast %165 : vector<1x128xf32> to vector<32x128xf32>
    %266 = arith.addf %264, %265 : vector<32x128xf32>
    %cst_45 = arith.constant 0.000000e+00 : f32
    %267 = vector.broadcast %cst_45 : f32 to vector<32x128xf32>
    %268 = arith.maximumf %266, %267 : vector<32x128xf32>
    %269 = arith.truncf %268 : vector<32x128xf32> to vector<32x128xbf16>
    %c1_46 = arith.constant 1 : index
    %c0_47 = arith.constant 0 : index
    %c0_48 = arith.constant 0 : index
    %270 = vector.load %arg2[%c1_46, %c0_47, %c0_48] : memref<2x128x32xbf16, #tpu.memory_space<vmem>>, vector<1x128x32xbf16>
    %271 = vector.shape_cast %270 : vector<1x128x32xbf16> to vector<128x32xbf16>
    %cst_49 = arith.constant dense<0.000000e+00> : vector<32x32xf32>
    %272 = tpu.matmul %269, %271, %cst_49 {dimension_numbers = #tpu.dot_dimension_numbers<[1], [0], [0], [1], [0, 0, 1, 1], [], []>} : vector<32x128xbf16>, vector<128x32xbf16>, vector<32x32xf32> -> vector<32x32xf32>
    %273 = vector.broadcast %170 : vector<1x32xf32> to vector<32x32xf32>
    %274 = arith.addf %272, %273 : vector<32x32xf32>
    %275 = arith.addf %262, %274 : vector<32x32xf32>
    %cst_50 = arith.constant dense<0.000000e+00> : vector<32xf32>
    %276 = vector.multi_reduction <add>, %275, %cst_50 [1] : vector<32x32xf32> to vector<32xf32>
    %277 = vector.shape_cast %276 : vector<32xf32> to vector<32x1xf32>
    %cst_51 = arith.constant 3.200000e+01 : f32
    %278 = vector.broadcast %cst_51 : f32 to vector<32x1xf32>
    %279 = arith.divf %277, %278 : vector<32x1xf32>
    %280 = vector.broadcast %279 : vector<32x1xf32> to vector<32x32xf32>
    %281 = arith.subf %275, %280 : vector<32x32xf32>
    %282 = arith.mulf %281, %281 : vector<32x32xf32>
    %cst_52 = arith.constant dense<0.000000e+00> : vector<32xf32>
    %283 = vector.multi_reduction <add>, %282, %cst_52 [1] : vector<32x32xf32> to vector<32xf32>
    %284 = vector.shape_cast %283 : vector<32xf32> to vector<32x1xf32>
    %cst_53 = arith.constant 3.200000e+01 : f32
    %285 = vector.broadcast %cst_53 : f32 to vector<32x1xf32>
    %286 = arith.divf %284, %285 : vector<32x1xf32>
    %287 = vector.broadcast %279 : vector<32x1xf32> to vector<32x32xf32>
    %288 = arith.subf %275, %287 : vector<32x32xf32>
    %cst_54 = arith.constant 9.99999974E-6 : f32
    %289 = vector.broadcast %cst_54 : f32 to vector<32x1xf32>
    %290 = arith.addf %286, %289 : vector<32x1xf32>
    %291 = math.rsqrt %290 : vector<32x1xf32>
    %292 = vector.broadcast %291 : vector<32x1xf32> to vector<32x32xf32>
    %293 = arith.mulf %288, %292 : vector<32x32xf32>
    %294 = vector.broadcast %168 : vector<1x32xf32> to vector<32x32xf32>
    %295 = arith.mulf %293, %294 : vector<32x32xf32>
    %296 = vector.broadcast %169 : vector<1x32xf32> to vector<32x32xf32>
    %297 = arith.addf %295, %296 : vector<32x32xf32>
    %cst_55 = arith.constant dense<0.000000e+00> : vector<2x32xf32>
    %298 = tpu.matmul %5, %297, %cst_55 {dimension_numbers = #tpu.dot_dimension_numbers<[1], [0], [0], [1], [0, 0, 1, 1], [], []>} : vector<2x32xf32>, vector<32x32xf32>, vector<2x32xf32> -> vector<2x32xf32>
    %c24 = arith.constant 24 : index
    %c0_56 = arith.constant 0 : index
    %299 = vector.load %arg3[%c24, %c0_56] : memref<192x128xf32, #tpu.memory_space<vmem>>, vector<32x128xf32>
    %c56 = arith.constant 56 : index
    %c0_57 = arith.constant 0 : index
    %300 = vector.load %arg3[%c56, %c0_57] : memref<192x128xf32, #tpu.memory_space<vmem>>, vector<128x64xf32>
    %c184 = arith.constant 184 : index
    %c0_58 = arith.constant 0 : index
    %301 = vector.load %arg3[%c184, %c0_58] : memref<192x128xf32, #tpu.memory_space<vmem>>, vector<4x128xf32>
    %cst_59 = arith.constant dense<0.000000e+00> : vector<2x128xf32>
    %302 = tpu.matmul %298, %299, %cst_59 {dimension_numbers = #tpu.dot_dimension_numbers<[1], [0], [0], [1], [0, 0, 1, 1], [], []>} : vector<2x32xf32>, vector<32x128xf32>, vector<2x128xf32> -> vector<2x128xf32>
    %303 = vector.extract_strided_slice %301 {offsets = [0, 0], sizes = [1, 128], strides = [1, 1]} : vector<4x128xf32> to vector<1x128xf32>
    %304 = vector.broadcast %303 : vector<1x128xf32> to vector<2x128xf32>
    %305 = arith.addf %302, %304 : vector<2x128xf32>
    %cst_60 = arith.constant 0.000000e+00 : f32
    %306 = vector.broadcast %cst_60 : f32 to vector<2x128xf32>
    %307 = arith.maximumf %305, %306 : vector<2x128xf32>
    %cst_61 = arith.constant dense<0.000000e+00> : vector<2x64xf32>
    %308 = tpu.matmul %307, %300, %cst_61 {dimension_numbers = #tpu.dot_dimension_numbers<[1], [0], [0], [1], [0, 0, 1, 1], [], []>} : vector<2x128xf32>, vector<128x64xf32>, vector<2x64xf32> -> vector<2x64xf32>
    %309 = vector.extract_strided_slice %301 {offsets = [1, 0], sizes = [1, 64], strides = [1, 1]} : vector<4x128xf32> to vector<1x64xf32>
    %310 = vector.broadcast %309 : vector<1x64xf32> to vector<2x64xf32>
    %311 = arith.addf %308, %310 : vector<2x64xf32>
    %cst_62 = arith.constant 0.000000e+00 : f32
    %312 = vector.broadcast %cst_62 : f32 to vector<2x64xf32>
    %313 = arith.maximumf %311, %312 : vector<2x64xf32>
    %314 = vector.extract_strided_slice %301 {offsets = [2, 0], sizes = [1, 64], strides = [1, 1]} : vector<4x128xf32> to vector<1x64xf32>
    %315 = vector.extract_strided_slice %301 {offsets = [3, 0], sizes = [1, 1], strides = [1, 1]} : vector<4x128xf32> to vector<1x1xf32>
    %316 = vector.broadcast %314 : vector<1x64xf32> to vector<2x64xf32>
    %317 = arith.mulf %313, %316 : vector<2x64xf32>
    %cst_63 = arith.constant dense<0.000000e+00> : vector<2xf32>
    %318 = vector.multi_reduction <add>, %317, %cst_63 [1] : vector<2x64xf32> to vector<2xf32>
    %319 = vector.shape_cast %318 : vector<2xf32> to vector<2x1xf32>
    %320 = vector.broadcast %315 : vector<1x1xf32> to vector<2x1xf32>
    %321 = arith.addf %319, %320 : vector<2x1xf32>
    %c0_64 = arith.constant 0 : index
    %c0_65 = arith.constant 0 : index
    %322 = vector.load %arg4[%c0_64, %c0_65] : memref<2x1xf32, #tpu.memory_space<vmem>>, vector<2x1xf32>
    tpu.vector_store %arg4[%c0_64, %c0_65], %321 {strides = array<i32>} : memref<2x1xf32, #tpu.memory_space<vmem>>, vector<2x1xf32>,
    return
  }
}

</mosaic_0001>

<bundles_post_ra>
// kernel: ft_transformer_forward.1
= control target key start
LH: loop header
LB: loop body
LE: loop exit
PB: predicated region body
PF: predicated region fallthrough
CT: control target
= control target key end

     0   :  { %9 = vsyncpa [#allocation3], 0  ;;  %s6142_s15 = smov [#allocation2]   ;;  %s7252_s0 = inlined_call_operand.vmem [shape: f32[2,8], index: 0, kind: input, shape index: {}]   ;;  %s7253_s1 = inlined_call_operand.vmem [shape: bf16[2,32,256], index: 1, kind: input, shape index: {}]   ;;  %s7254_s2 = inlined_call_operand.vmem [shape: bf16[2,128,32], index: 2, kind: input, shape index: {}]   ;;  %s7255_s3 = inlined_call_operand.hbm [shape: f32[192,128], index: 3, kind: input, shape index: {}]   ;;  %s7256_s4 = inlined_call_operand.vmem [shape: f32[2,1], index: 4, kind: output, shape index: {}]  }
   0x1   :  { %s21_s16 = sshll.u32 %s6142_s15, 4  ;;  %s6118_s19 = scalar_lea.hbm %s7255_s3, 3072  ;;  %s22_s16 = int_to_ptr.vmem [resolvable:$true] %s21_s16 }
   0x2   :  { %p6119_p0 = scmp.ne.s32.totalorder %s7255_s3, %s6118_s19  ;;  %p6122_p1 = scmp.lt.u32.totalorder %s6118_s19, %s7255_s3 }
   0x4   :  { %p6124_p2 = pnand %p6122_p1, %p6119_p0 }
   0x6   :  { %6127 = shalt.err (!%p6124_p2)
}
   0x7   :  { %s6128_s24 = scalar_lea.vmem %s22_s16, 3072  ;;  %p6133_p4 = scmp.lt.s32.totalorder %s22_s16, %s22_s16 }
   0x8   :  { %p6129_p3 = scmp.ne.s32.totalorder %s22_s16, %s6128_s24  ;;  %p6134_p5 = scmp.lt.s32.totalorder %s6128_s24, %s6128_s24 }
   0xa   :  { %p6135_p6 = por %p6134_p5, %p6133_p4 }
   0xc   :  { %p6136_p7 = pnand %p6135_p6, %p6129_p3 }
   0xe   :  { %6139 = shalt.err (!%p6136_p7)
}
   0xf   :  { %s6143_s25 = smov 128   ;;  %s6144_s26 = smov 8  }
  0x10   :  { %27 = dma.hbm_to_vmem [thread:$0]  %s7255_s3, 3072, %s22_s16, [#allocation3], %s6143_s25, %s6143_s25, %s6144_s26  }
  0x11   :  { %6140 = dma.done.wait [#allocation3], 3072  }
  0x12   :  { %6141 = vsyncadd [#allocation3], 4294964224  ;;  %v6145_v0 = vmov 0.0   ;;  %vm6146_vm0 = vmmov 0   ;;  %v6198_v1 = vld [vmem:[#allocation2] sm:$0xff]  ;;  %s6147_s29 = smov 48   ;;  %v114_v4 = vlaneseq }
  0x13   :  { %5120 = vmatprep.subr.mxu0 %v6145_v0  ;;  %5122 = vmatprep.mubr.msk.f32.mxu0 %vm6146_vm0, %v6145_v0  ;;  %v35_v2 = vld [vmem:[%s7252_s0] sm:$0x3]  ;;  %vm40_vm1 = vcmask 64512   ;;  %v5927_v8 = vld [vmem:[%s7253_s1 + $0x10] ss:$8 sps:$4 sm:$0xff]   ;;  %v6225_v14 = vld [vmem:[#allocation2 + $0x8] sm:$0xff] }
  0x14   :  { %37 = vrot.lane.b32.xlu0 %v6198_v1, %s6147_s29  ;;  %v6205_v5 = vshrl.u32 %v114_v4, 7  ;;  %v6210_v6 = vld [vmem:[%s7253_s1] ss:$8 sps:$4 sm:$0xff]   ;;  %s6148_s8 = smov 96   ;;  %vm173_vm2 = vcmask 261120   ;;  %v34_v31 = vld [vmem:[#allocation2 + $0x10] sm:$0xff]  ;;  %vm6336_vm3 = vmpackc.low %vm40_vm1, %vm40_vm1 }
  0x15   :  { %5125 = vmatprep.subr.bf16.mxu1 %v6210_v6  ;;  %s6149_s9 = smov 120   ;;  %s6150_s10 = smov 112   ;;  %vm991_vm4 = vcmask 130048   ;;  %vm1920_vm5 = vcmask 195584   ;;  %vm4748_vm6 = vcmask 517120   ;;  %vm4757_vm7 = vcmask 1024  }
  0x16   :  { %5126 = vmatpush3.bf16.msra.mxu1 %v6210_v6  ;;  %v6215_v7 = vsub.s32 0, %v6205_v5  ;;  %v6222_v12 = vsub.s32 1, %v6205_v5  ;;  %s6151_s11 = smov 104   ;;  %s6152_s12 = smov 64  }
  0x17   :  { %5127 = vmatprep.subr.bf16.mxu1 %v5927_v8  ;;  %s6153_s13 = smov 32   ;;  %s6154_s14 = smov 16  }
  0x18   :  { %v6250_v32 = vrot.slane %v34_v31, %v6215_v7  ;;  %s6155_s17 = smov 24  }
  0x1a   :  { %5128 = vmatpush3.bf16.msra.mxu1 %v5927_v8 }
  0x86   :  { %v38_v3 = vpop.permute.xlu0 %37 }
  0x87   :  { %5121 = vmatpush3.msra.mxu0 %v38_v3 }
  0x88   :  { %5123 = vmatmul.mubr.msk.f32.vlgmr.msra.gmra.mrb[0].mxu0 %vm40_vm1, %v35_v2 }
 0x15b   :  { %v110_v9 = vpop.f32.mrb[0].mxu0 }
 0x15c   :  { %v5124_v10 = vpop.f32.mrb[1].mxu0  ;;  %v117_v11 = vrot.slane %v110_v9, %v6215_v7  ;;  %v128_v13 = vrot.slane %v110_v9, %v6222_v12 }
 0x15e   :  { %123 = vbcast.lane.b32.xlu1 %v117_v11, 264  ;;  %119 = vbcast.lane.b32.xlu0 %v117_v11, 256 }
 0x162   :  { %130 = vbcast.lane.b32.xlu1 %v128_v13, 256  ;;  %134 = vbcast.lane.b32.xlu0 %v128_v13, 264 }
 0x166   :  { %141 = vrot.lane.b32.xlu1 %v6198_v1, %s6148_s8  ;;  %143 = vrot.lane.b32.xlu0 %v6225_v14, %s6148_s8 }
 0x1d0   :  { %v124_v15 = vpop.permute.xlu1 %123  ;;  %v120_v16 = vpop.permute.xlu0 %119 }
 0x1d1   :  { %v137_v19 = vmul.f32 %v124_v15, %v6225_v14  ;;  %v136_v20 = vmul.f32 %v120_v16, %v6198_v1 }
 0x1d4   :  { %v131_v17 = vpop.permute.xlu1 %130  ;;  %v135_v18 = vpop.permute.xlu0 %134 }
 0x1d5   :  { %v138_v21 = vmul.f32 %v131_v17, %v6198_v1  ;;  %v139_v22 = vmul.f32 %v135_v18, %v6225_v14 }
 0x1d8   :  { %v142_v23 = vpop.permute.xlu1 %141  ;;  %v144_v24 = vpop.permute.xlu0 %143 }
 0x1d9   :  { %v6235_v25 = vadd.f32 %v142_v23, %v138_v21  ;;  %v6237_v26 = vadd.f32 %v144_v24, %v139_v22  ;;  %v6239_v27 = vadd.f32 %v142_v23, %v136_v20  ;;  %v6241_v28 = vadd.f32 %v144_v24, %v137_v19 }
 0x1db   :  { %v156_v29 = vpack.c.bf16 %v6237_v26, %v6235_v25  ;;  %v155_v30 = vpack.c.bf16 %v6241_v28, %v6239_v27 }
 0x1dd   :  { %5129 = vmatprep.mubr.msk.bf16.mxu1 %vm173_vm2, %v155_v30 }
 0x1de   :  { %5130 = vmatmul.mubr.msk.bf16.vlgmr.msra.gmra.mrb[0].mxu1 %vm173_vm2, %v156_v29 }
 0x2b1   :  { %v5131_v33 = vpop.f32.mrb[0].mxu1 }
 0x2b2   :  { %v223_v34 = vadd.f32 %v5131_v33, %v6250_v32  ;;  %v214_v35 = vpop.f32.mrb[1].mxu1 }
 0x2b3   :  { %v215_v36 = vadd.f32 %v214_v35, %v6250_v32  ;;  %v5132_v37 = vpop.f32.mrb[2].mxu1 }
 0x2b4   :  { %v217_v38 = vpop.f32.mrb[3].mxu1  ;;  %5144 = vmatprep.mubr.msk.f32.mxu1 %vm40_vm1, %v223_v34  ;;  %v6263_v40 = vadd.f32 %v5132_v37, %v6250_v32 }
 0x2b5   :  { %v6256_v39 = vadd.f32 %v217_v38, %v6250_v32  ;;  %233 = vrot.lane.b32.xlu1 %v215_v36, %s6149_s9  ;;  %5137 = vmatprep.mubr.msk.f32.mxu0 %vm40_vm1, %v215_v36 }
 0x2b6   :  { %v5710_v42 = vpack.i.bf16 %v6263_v40, %v223_v34 }
 0x2b7   :  { %235 = vrot.lane.b32.xlu0 %v6256_v39, %s6149_s9  ;;  %v5705_v41 = vpack.i.bf16 %v6256_v39, %v215_v36 }
 0x2b9   :  { %237 = vrot.lane.b32.xlu1 %v223_v34, %s6149_s9 }
 0x2bb   :  { %239 = vrot.lane.b32.xlu0 %v6263_v40, %s6149_s9 }
 0x2bd   :  { %241 = vrot.lane.b32.xlu1 %v215_v36, %s6150_s10 }
 0x2bf   :  { %243 = vrot.lane.b32.xlu0 %v6256_v39, %s6150_s10 }
 0x2c1   :  { %245 = vrot.lane.b32.xlu1 %v223_v34, %s6150_s10 }
 0x2c3   :  { %247 = vrot.lane.b32.xlu0 %v6263_v40, %s6150_s10 }
 0x2c5   :  { %249 = vrot.lane.b32.xlu1 %v215_v36, %s6151_s11 }
 0x2c7   :  { %251 = vrot.lane.b32.xlu0 %v6256_v39, %s6151_s11 }
 0x2c9   :  { %253 = vrot.lane.b32.xlu1 %v223_v34, %s6151_s11 }
 0x2cb   :  { %255 = vrot.lane.b32.xlu0 %v6263_v40, %s6151_s11 }
 0x2cd   :  { %5706 = vrot.lane.b32.xlu1 %v5705_v41, %s6148_s8 }
 0x2cf   :  { %5711 = vrot.lane.b32.xlu0 %v5710_v42, %s6148_s8 }
 0x327   :  { %v234_v43 = vpop.permute.xlu1 %233 }
 0x329   :  { %v6284_v44 = vpop.permute.xlu0 %235 }
 0x32a   :  { %v5715_v45 = vpack.i.bf16 %v6284_v44, %v234_v43 }
 0x32b   :  { %v238_v46 = vpop.permute.xlu1 %237 }
 0x32c   :  { %5716 = vrot.lane.b32.xlu1 %v5715_v45, %s6148_s8 }
 0x32d   :  { %v6288_v47 = vpop.permute.xlu0 %239 }
 0x32e   :  { %v5720_v48 = vpack.i.bf16 %v6288_v47, %v238_v46 }
 0x32f   :  { %v6291_v49 = vpop.permute.xlu1 %241 }
 0x330   :  { %5721 = vrot.lane.b32.xlu0 %v5720_v48, %s6148_s8 }
 0x331   :  { %v6294_v50 = vpop.permute.xlu0 %243 }
 0x332   :  { %v6298_v51 = vpack.i.bf16 %v6294_v50, %v6291_v49 }
 0x333   :  { %v6300_v52 = vpop.permute.xlu1 %245 }
 0x334   :  { %5726 = vrot.lane.b32.xlu1 %v6298_v51, %s6148_s8 }
 0x335   :  { %v6304_v53 = vpop.permute.xlu0 %247 }
 0x336   :  { %v6308_v54 = vpack.i.bf16 %v6304_v53, %v6300_v52 }
 0x337   :  { %v6310_v55 = vpop.permute.xlu1 %249 }
 0x338   :  { %5731 = vrot.lane.b32.xlu0 %v6308_v54, %s6148_s8 }
 0x339   :  { %v6314_v56 = vpop.permute.xlu0 %251 }
 0x33a   :  { %v6318_v57 = vpack.i.bf16 %v6314_v56, %v6310_v55 }
 0x33b   :  { %v6320_v58 = vpop.permute.xlu1 %253 }
 0x33c   :  { %5736 = vrot.lane.b32.xlu1 %v6318_v57, %s6148_s8 }
 0x33d   :  { %v6324_v59 = vpop.permute.xlu0 %255 }
 0x33e   :  { %v6328_v60 = vpack.i.bf16 %v6324_v59, %v6320_v58 }
 0x33f   :  { %v5707_v61 = vpop.permute.xlu1 %5706 }
 0x340   :  { %v5709_v62 = vunpack.i.h.bf16 %v5707_v61  ;;  %v5708_v63 = vunpack.i.l.bf16 %v5707_v61  ;;  %969 = vrot.lane.b32.xlu1 %v6198_v1, %s6152_s12  ;;  %5741 = vrot.lane.b32.xlu0 %v6328_v60, %s6148_s8 }
 0x341   :  { %v5712_v2 = vpop.permute.xlu0 %5711 }
 0x342   :  { %v5494_v3 = vpack.c.bf16 %v5709_v62, %v5708_v63  ;;  %v5714_v4 = vunpack.i.h.bf16 %v5712_v2  ;;  %v5713_v8 = vunpack.i.l.bf16 %v5712_v2 }
 0x344   :  { %v5500_v10 = vpack.c.bf16 %v5714_v4, %v5713_v8  ;;  %5751 = vrot.lane.b32.xlu1 %v5710_v42, %s6152_s12  ;;  %971 = vrot.lane.b32.xlu0 %v6225_v14, %s6152_s12 }
 0x345   :  { %5496 = vmatprep.subr.msk.bf16.mxu0 %vm6336_vm3, %v5494_v3 }
 0x346   :  { %5499 = vmatpush3.bf16.xpose.msk.msra.mxu0 %vm6336_vm3, %v5494_v3  ;;  %5502 = vmatprep.subr.msk.bf16.mxu1 %vm6336_vm3, %v5500_v10 }
 0x347   :  { %5505 = vmatpush3.bf16.xpose.msk.msra.mxu1 %vm6336_vm3, %v5500_v10 }
 0x348   :  { %5761 = vrot.lane.b32.xlu1 %v5715_v45, %s6152_s12  ;;  %5746 = vrot.lane.b32.xlu0 %v5705_v41, %s6152_s12 }
 0x34c   :  { %5756 = vrot.lane.b32.xlu0 %v5720_v48, %s6152_s12 }
 0x34d   :  { %5138 = vmatmul.mubr.msk.f32.vlgmr.msra.gmra.mrb[2].mxu0 %vm40_vm1, %v6256_v39 }
 0x34e   :  { %5151 = vmatprep.mubr.msk.f32.mxu0 %vm40_vm1, %v234_v43  ;;  %5145 = vmatmul.mubr.msk.f32.vlgmr.msra.gmra.mrb[4].mxu1 %vm40_vm1, %v6263_v40 }
 0x34f   :  { %5158 = vmatprep.mubr.msk.f32.mxu1 %vm40_vm1, %v238_v46 }
 0x39e   :  { %v5717_v1 = vpop.permute.xlu1 %5716 }
 0x39f   :  { %v5719_v11 = vunpack.i.h.bf16 %v5717_v1  ;;  %v5718_v13 = vunpack.i.l.bf16 %v5717_v1 }
 0x3a1   :  { %v5506_v14 = vpack.c.bf16 %v5719_v11, %v5718_v13 }
 0x3a2   :  { %v5722_v15 = vpop.permute.xlu0 %5721 }
 0x3a3   :  { %v5724_v16 = vunpack.i.h.bf16 %v5722_v15  ;;  %v5723_v17 = vunpack.i.l.bf16 %v5722_v15  ;;  %5508 = vmatprep.subr.msk.bf16.mxu0 %vm6336_vm3, %v5506_v14 }
 0x3a4   :  { %5511 = vmatpush3.bf16.xpose.msk.msra.mxu0 %vm6336_vm3, %v5506_v14 }
 0x3a5   :  { %v5512_v18 = vpack.c.bf16 %v5724_v16, %v5723_v17 }
 0x3a6   :  { %v5727_v19 = vpop.permute.xlu1 %5726 }
 0x3a7   :  { %v5729_v20 = vunpack.i.h.bf16 %v5727_v19  ;;  %v5728_v21 = vunpack.i.l.bf16 %v5727_v19  ;;  %5514 = vmatprep.subr.msk.bf16.mxu1 %vm6336_vm3, %v5512_v18 }
 0x3a8   :  { %5517 = vmatpush3.bf16.xpose.msk.msra.mxu1 %vm6336_vm3, %v5512_v18 }
 0x3a9   :  { %v5518_v22 = vpack.c.bf16 %v5729_v20, %v5728_v21 }
 0x3aa   :  { %v5732_v23 = vpop.permute.xlu0 %5731 }
 0x3ab   :  { %v5734_v24 = vunpack.i.h.bf16 %v5732_v23  ;;  %v5733_v29 = vunpack.i.l.bf16 %v5732_v23  ;;  %5152 = vmatmul.mubr.msk.f32.vlgmr.msra.gmra.mrb[4].mxu0 %vm40_vm1, %v6284_v44  ;;  %5520 = vmatprep.subr.msk.bf16.mxu0 %vm6336_vm3, %v5518_v22 }
 0x3ac   :  { %5523 = vmatpush3.bf16.xpose.msk.msra.mxu0 %vm6336_vm3, %v5518_v22  ;;  %5165 = vmatprep.mubr.msk.f32.mxu0 %vm40_vm1, %v6291_v49 }
 0x3ad   :  { %v5524_v30 = vpack.c.bf16 %v5734_v24, %v5733_v29 }
 0x3ae   :  { %v5737_v31 = vpop.permute.xlu1 %5736 }
 0x3af   :  { %v5739_v33 = vunpack.i.h.bf16 %v5737_v31  ;;  %v5738_v34 = vunpack.i.l.bf16 %v5737_v31  ;;  %5159 = vmatmul.mubr.msk.f32.vlgmr.msra.gmra.mrb[6].mxu1 %vm40_vm1, %v6288_v47  ;;  %5526 = vmatprep.subr.msk.bf16.mxu1 %vm6336_vm3, %v5524_v30 }
 0x3b0   :  { %5529 = vmatpush3.bf16.xpose.msk.msra.mxu1 %vm6336_vm3, %v5524_v30  ;;  %5172 = vmatprep.mubr.msk.f32.mxu1 %vm40_vm1, %v6300_v52 }
 0x3b1   :  { %v5530_v35 = vpack.c.bf16 %v5739_v33, %v5738_v34 }
 0x3b2   :  { %v5742_v36 = vpop.permute.xlu0 %5741  ;;  %v6384_v37 = vpop.permute.xlu1 %969 }
 0x3b3   :  { %v5744_v38 = vunpack.i.h.bf16 %v5742_v36  ;;  %v5743_v39 = vunpack.i.l.bf16 %v5742_v36  ;;  %5166 = vmatmul.mubr.msk.f32.vlgmr.msra.gmra.mrb[6].mxu0 %vm40_vm1, %v6294_v50  ;;  %5532 = vmatprep.subr.msk.bf16.mxu0 %vm6336_vm3, %v5530_v35 }
 0x3b4   :  { %5535 = vmatpush3.bf16.xpose.msk.msra.mxu0 %vm6336_vm3, %v5530_v35  ;;  %5179 = vmatprep.mubr.msk.f32.mxu0 %vm40_vm1, %v6310_v55 }
 0x3b5   :  { %v5536_v40 = vpack.c.bf16 %v5744_v38, %v5743_v39 }
 0x3b6   :  { %v6394_v41 = vpop.permute.xlu0 %971  ;;  %v5752_v42 = vpop.permute.xlu1 %5751 }
 0x3b7   :  { %5173 = vmatmul.mubr.msk.f32.vlgmr.msra.gmra.mrb[8].mxu1 %vm40_vm1, %v6304_v53  ;;  %5538 = vmatprep.subr.msk.bf16.mxu1 %vm6336_vm3, %v5536_v40  ;;  %v5754_v43 = vunpack.i.h.bf16 %v5752_v42  ;;  %v5753_v44 = vunpack.i.l.bf16 %v5752_v42 }
 0x3b8   :  { %5541 = vmatpush3.bf16.xpose.msk.msra.mxu1 %vm6336_vm3, %v5536_v40  ;;  %5186 = vmatprep.mubr.msk.f32.mxu1 %vm40_vm1, %v6320_v58 }
 0x3b9   :  { %v6408_v55 = vpack.c.bf16 %v5754_v43, %v5753_v44 }
 0x3ba   :  { %v5747_v45 = vpop.permute.xlu0 %5746  ;;  %v5762_v46 = vpop.permute.xlu1 %5761 }
 0x3bb   :  { %v5749_v47 = vunpack.i.h.bf16 %v5747_v45  ;;  %v5748_v48 = vunpack.i.l.bf16 %v5747_v45  ;;  %v5764_v49 = vunpack.i.h.bf16 %v5762_v46  ;;  %v5763_v50 = vunpack.i.l.bf16 %v5762_v46  ;;  %5180 = vmatmul.mubr.msk.f32.vlgmr.msra.gmra.mrb[8].mxu0 %vm40_vm1, %v6314_v56 }
 0x3bd   :  { %v5542_v52 = vpack.c.bf16 %v5749_v47, %v5748_v48  ;;  %v5550_v53 = vpack.c.bf16 %v5764_v49, %v5763_v50 }
 0x3bf   :  { %5187 = vmatmul.mubr.msk.f32.vlgmr.msra.gmra.mrb[10].mxu1 %vm40_vm1, %v6324_v59  ;;  %5543 = vmatprep.subr.bf16.mxu0 %v5542_v52 }
 0x3c0   :  { %5551 = vmatprep.subr.bf16.mxu1 %v5550_v53  ;;  %5545 = vmatpush3.bf16.msra.mxu0 %v5542_v52 }
 0x3c1   :  { %5553 = vmatpush3.bf16.msra.mxu1 %v5550_v53  ;;  %5547 = vmatprep.subr.bf16.mxu0 %v6408_v55 }
 0x420   :  { %v5139_v58 = vpop.f32.mrb[2].mxu0 }
 0x421   :  { %v954_v61 = vmul.f32 0.35355338, %v5139_v58  ;;  %v335_v62 = vpop.f32.mrb[3].mxu0  ;;  %v5146_v63 = vpop.f32.mrb[4].mxu1 }
 0x422   :  { %v953_v2 = vmul.f32 0.35355338, %v335_v62  ;;  %v956_v3 = vmul.f32 0.35355338, %v5146_v63  ;;  %v422_v56 = vpop.f32.mrb[5].mxu1 }
 0x423   :  { %v955_v4 = vmul.f32 0.35355338, %v422_v56  ;;  %v6412_v8 = vadd.f32 %v6394_v41, %v954_v61 }
 0x424   :  { %v6415_v59 = vadd.f32 %v6394_v41, %v956_v3  ;;  %v6425_v13 = vadd.f32 %v6384_v37, %v953_v2 }
 0x425   :  { %v995_v10 = vsel %vm991_vm4, %v6412_v8, -inf  ;;  %v6420_v1 = vadd.f32 %v6384_v37, %v955_v4 }
 0x426   :  { %996 = vmax.xlane.f32.xlu0 %v995_v10  ;;  %v1001_v11 = vsel %vm991_vm4, %v6415_v59, -inf  ;;  %v992_v15 = vsel %vm991_vm4, %v6425_v13, -inf }
 0x427   :  { %1002 = vmax.xlane.f32.xlu1 %v1001_v11  ;;  %v998_v14 = vsel %vm991_vm4, %v6420_v1, -inf }
 0x42a   :  { %999 = vmax.xlane.f32.xlu0 %v998_v14 }
 0x42b   :  { %993 = vmax.xlane.f32.xlu1 %v992_v15 }
 0x47e   :  { %v5153_v16 = vpop.f32.mrb[4].mxu0 }
 0x47f   :  { %v509_v17 = vpop.f32.mrb[5].mxu0  ;;  %v958_v19 = vmul.f32 0.35355338, %v5153_v16 }
 0x480   :  { %v957_v22 = vmul.f32 0.35355338, %v509_v17 }
 0x481   :  { %v6440_v34 = vadd.f32 %v6394_v41, %v958_v19 }
 0x482   :  { %v5160_v18 = vpop.f32.mrb[6].mxu1  ;;  %v6445_v36 = vadd.f32 %v6384_v37, %v957_v22  ;;  %v6493_v22 = vpop.permute.xlu0 %5756 }
 0x483   :  { %v960_v20 = vmul.f32 0.35355338, %v5160_v18  ;;  %v596_v21 = vpop.f32.mrb[7].mxu1  ;;  %v1007_v43 = vsel %vm991_vm4, %v6440_v34, -inf }
 0x484   :  { %v959_v23 = vmul.f32 0.35355338, %v596_v21  ;;  %v1004_v46 = vsel %vm991_vm4, %v6445_v36, -inf }
 0x485   :  { %v6432_v24 = vadd.f32 %v6394_v41, %v960_v20 }
 0x486   :  { %v5167_v29 = vpop.f32.mrb[6].mxu0  ;;  %v6435_v30 = vadd.f32 %v6384_v37, %v959_v23 }
 0x487   :  { %v683_v31 = vpop.f32.mrb[7].mxu0  ;;  %v1013_v33 = vsel %vm991_vm4, %v6432_v24, -inf  ;;  %v962_v39 = vmul.f32 0.35355338, %v5167_v29 }
 0x488   :  { %1014 = vmax.xlane.f32.xlu1 %v1013_v33  ;;  %v1010_v35 = vsel %vm991_vm4, %v6435_v30, -inf  ;;  %v961_v44 = vmul.f32 0.35355338, %v683_v31 }
 0x489   :  { %1011 = vmax.xlane.f32.xlu0 %v1010_v35  ;;  %v6460_v53 = vadd.f32 %v6394_v41, %v962_v39 }
 0x48a   :  { %v5174_v38 = vpop.f32.mrb[8].mxu1  ;;  %v6465_v61 = vadd.f32 %v6384_v37, %v961_v44 }
 0x48b   :  { %v964_v40 = vmul.f32 0.35355338, %v5174_v38  ;;  %v770_v42 = vpop.f32.mrb[9].mxu1  ;;  %v1019_v56 = vsel %vm991_vm4, %v6460_v53, -inf }
 0x48c   :  { %v963_v45 = vmul.f32 0.35355338, %v770_v42  ;;  %1008 = vmax.xlane.f32.xlu1 %v1007_v43  ;;  %v1016_v11 = vsel %vm991_vm4, %v6465_v61, -inf }
 0x48d   :  { %1005 = vmax.xlane.f32.xlu0 %v1004_v46  ;;  %v6452_v47 = vadd.f32 %v6394_v41, %v964_v40 }
 0x48e   :  { %v5181_v48 = vpop.f32.mrb[8].mxu0  ;;  %v6455_v49 = vadd.f32 %v6384_v37, %v963_v45 }
 0x48f   :  { %v857_v50 = vpop.f32.mrb[9].mxu0  ;;  %v1025_v52 = vsel %vm991_vm4, %v6452_v47, -inf  ;;  %v966_v63 = vmul.f32 0.35355338, %v5181_v48 }
 0x490   :  { %1026 = vmax.xlane.f32.xlu1 %v1025_v52  ;;  %v1022_v58 = vsel %vm991_vm4, %v6455_v49, -inf  ;;  %v965_v4 = vmul.f32 0.35355338, %v857_v50 }
 0x491   :  { %1023 = vmax.xlane.f32.xlu0 %v1022_v58  ;;  %v6480_v17 = vadd.f32 %v6394_v41, %v966_v63 }
 0x492   :  { %v5188_v62 = vpop.f32.mrb[10].mxu1  ;;  %v6485_v19 = vadd.f32 %v6384_v37, %v965_v4 }
 0x493   :  { %v968_v2 = vmul.f32 0.35355338, %v5188_v62  ;;  %v944_v3 = vpop.f32.mrb[11].mxu1  ;;  %v1031_v20 = vsel %vm991_vm4, %v6480_v17, -inf }
 0x494   :  { %v967_v10 = vmul.f32 0.35355338, %v944_v3  ;;  %1020 = vmax.xlane.f32.xlu1 %v1019_v56  ;;  %v1028_v21 = vsel %vm991_vm4, %v6485_v19, -inf }
 0x495   :  { %1017 = vmax.xlane.f32.xlu0 %v1016_v11  ;;  %v6472_v14 = vadd.f32 %v6394_v41, %v968_v2 }
 0x496   :  { %v6475_v15 = vadd.f32 %v6384_v37, %v967_v10 }
 0x497   :  { %v1037_v16 = vsel %vm991_vm4, %v6472_v14, -inf }
 0x498   :  { %1038 = vmax.xlane.f32.xlu1 %v1037_v16  ;;  %v1034_v18 = vsel %vm991_vm4, %v6475_v15, -inf }
 0x499   :  { %1035 = vmax.xlane.f32.xlu0 %v1034_v18 }
 0x49c   :  { %1032 = vmax.xlane.f32.xlu1 %v1031_v20 }
 0x49d   :  { %1029 = vmax.xlane.f32.xlu0 %v1028_v21 }
 0x4ad   :  { %5766 = vrot.lane.b32.xlu1 %v6298_v51, %s6152_s12 }
 0x4b3   :  { %v997_v23 = vpop.xlane.xlu0 %996  ;;  %5771 = vrot.lane.b32.xlu0 %v6308_v54, %s6152_s12 }
 0x4b4   :  { %v1003_v29 = vpop.xlane.xlu1 %1002  ;;  %v1041_v39 = vsub.f32 %v6412_v8, %v997_v23 }
 0x4b5   :  { %v1043_v33 = vsub.f32 %v6415_v59, %v1003_v29 }
 0x4b6   :  { %v1058_v51 = vmul.f32 1.442695, %v1041_v39 }
 0x4b7   :  { %v1000_v31 = vpop.xlane.xlu0 %999  ;;  %v1062_v40 = vmul.f32 1.442695, %v1043_v33 }
 0x4b8   :  { %v1042_v35 = vsub.f32 %v6420_v1, %v1000_v31  ;;  %v994_v38 = vpop.xlane.xlu1 %993 }
 0x4b9   :  { %v1040_v43 = vsub.f32 %v6425_v13, %v994_v38  ;;  %5953 = vpow2.f32 %v1062_v40 }
 0x4ba   :  { %v1060_v42 = vmul.f32 1.442695, %v1042_v35 }
 0x4bb   :  { %v1056_v44 = vmul.f32 1.442695, %v1040_v43 }
 0x4bc   :  { %5955 = vpow2.f32 %v1060_v42 }
 0x4bd   :  { %5957 = vpow2.f32 %v1058_v51 }
 0x4be   :  { %5959 = vpow2.f32 %v1056_v44 }
 0x4c3   :  { %v6501_v54 = vpop.eup %5953 }
 0x4c4   :  { %v1097_v59 = vsel %vm991_vm4, %v6501_v54, 0.0 }
 0x4c6   :  { %v6503_v45 = vpop.eup %5955 }
 0x4c7   :  { %v6507_v1 = vpop.eup %5957  ;;  %v1094_v8 = vsel %vm991_vm4, %v6503_v45, 0.0 }
 0x4c8   :  { %v6511_v13 = vpop.eup %5959  ;;  %v1091_v46 = vsel %vm991_vm4, %v6507_v1, 0.0 }
 0x4c9   :  { %v1088_v48 = vsel %vm991_vm4, %v6511_v13, 0.0 }
 0x4d1   :  { %1098 = vadd.xlane.f32.xlu1 %v1097_v59 }
 0x4d2   :  { %1095 = vadd.xlane.f32.xlu0 %v1094_v8 }
 0x4d5   :  { %1092 = vadd.xlane.f32.xlu1 %v1091_v46 }
 0x4d6   :  { %1089 = vadd.xlane.f32.xlu0 %v1088_v48 }
 0x515   :  { %v1015_v50 = vpop.xlane.xlu1 %1014 }
 0x516   :  { %v1047_v52 = vsub.f32 %v6432_v24, %v1015_v50  ;;  %v1012_v58 = vpop.xlane.xlu0 %1011 }
 0x517   :  { %v1046_v62 = vsub.f32 %v6435_v30, %v1012_v58 }
 0x518   :  { %v1070_v63 = vmul.f32 1.442695, %v1047_v52 }
 0x519   :  { %v1068_v2 = vmul.f32 1.442695, %v1046_v62  ;;  %v1009_v3 = vpop.xlane.xlu1 %1008 }
 0x51a   :  { %5961 = vpow2.f32 %v1070_v63  ;;  %v1045_v56 = vsub.f32 %v6440_v34, %v1009_v3  ;;  %v1006_v4 = vpop.xlane.xlu0 %1005 }
 0x51b   :  { %5963 = vpow2.f32 %v1068_v2  ;;  %v1044_v10 = vsub.f32 %v6445_v36, %v1006_v4 }
 0x51c   :  { %v1066_v11 = vmul.f32 1.442695, %v1045_v56 }
 0x51d   :  { %v1064_v16 = vmul.f32 1.442695, %v1044_v10  ;;  %v1027_v18 = vpop.xlane.xlu1 %1026 }
 0x51e   :  { %5965 = vpow2.f32 %v1066_v11  ;;  %v1051_v20 = vsub.f32 %v6452_v47, %v1027_v18  ;;  %v1024_v24 = vpop.xlane.xlu0 %1023 }
 0x51f   :  { %5967 = vpow2.f32 %v1064_v16  ;;  %v1050_v30 = vsub.f32 %v6455_v49, %v1024_v24 }
 0x520   :  { %v1078_v21 = vmul.f32 1.442695, %v1051_v20 }
 0x521   :  { %v1076_v23 = vmul.f32 1.442695, %v1050_v30  ;;  %v1021_v29 = vpop.xlane.xlu1 %1020 }
 0x522   :  { %5969 = vpow2.f32 %v1078_v21  ;;  %v1049_v34 = vsub.f32 %v6460_v53, %v1021_v29  ;;  %v1018_v31 = vpop.xlane.xlu0 %1017 }
 0x523   :  { %5971 = vpow2.f32 %v1076_v23  ;;  %v1048_v36 = vsub.f32 %v6465_v61, %v1018_v31 }
 0x524   :  { %v6525_v33 = vpop.eup %5961  ;;  %v1074_v35 = vmul.f32 1.442695, %v1049_v34 }
 0x525   :  { %v6527_v38 = vpop.eup %5963  ;;  %v1072_v47 = vmul.f32 1.442695, %v1048_v36  ;;  %v1039_v39 = vpop.xlane.xlu1 %1038  ;;  %v1109_v49 = vsel %vm991_vm4, %v6525_v33, 0.0 }
 0x526   :  { %5973 = vpow2.f32 %v1074_v35  ;;  %v1055_v40 = vsub.f32 %v6472_v14, %v1039_v39  ;;  %v1036_v42 = vpop.xlane.xlu0 %1035  ;;  %1110 = vadd.xlane.f32.xlu1 %v1109_v49  ;;  %v1106_v53 = vsel %vm991_vm4, %v6527_v38, 0.0 }
 0x527   :  { %5975 = vpow2.f32 %v1072_v47  ;;  %v1054_v61 = vsub.f32 %v6475_v15, %v1036_v42  ;;  %1107 = vadd.xlane.f32.xlu0 %v1106_v53 }
 0x528   :  { %v6535_v43 = vpop.eup %5965  ;;  %v1086_v51 = vmul.f32 1.442695, %v1055_v40 }
 0x529   :  { %v6537_v44 = vpop.eup %5967  ;;  %v1084_v59 = vmul.f32 1.442695, %v1054_v61  ;;  %v1033_v8 = vpop.xlane.xlu1 %1032  ;;  %v1103_v46 = vsel %vm991_vm4, %v6535_v43, 0.0  ;;  %v5759_v61 = vunpack.i.h.bf16 %v6493_v22 }
 0x52a   :  { %5977 = vpow2.f32 %v1086_v51  ;;  %v1053_v14 = vsub.f32 %v6480_v17, %v1033_v8  ;;  %1104 = vadd.xlane.f32.xlu1 %v1103_v46  ;;  %v1030_v48 = vpop.xlane.xlu0 %1029  ;;  %v1100_v50 = vsel %vm991_vm4, %v6537_v44, 0.0  ;;  %v5758_v51 = vunpack.i.l.bf16 %v6493_v22 }
 0x52b   :  { %5979 = vpow2.f32 %v1084_v59  ;;  %v1052_v15 = vsub.f32 %v6485_v19, %v1030_v48  ;;  %1101 = vadd.xlane.f32.xlu0 %v1100_v50 }
 0x52c   :  { %v6545_v52 = vpop.eup %5969  ;;  %v1082_v58 = vmul.f32 1.442695, %v1053_v14  ;;  %v5554_v48 = vpack.c.bf16 %v5759_v61, %v5758_v51 }
 0x52d   :  { %v6547_v62 = vpop.eup %5971  ;;  %v1080_v63 = vmul.f32 1.442695, %v1052_v15  ;;  %v5767_v2 = vpop.permute.xlu1 %5766  ;;  %v1121_v3 = vsel %vm991_vm4, %v6545_v52, 0.0 }
 0x52e   :  { %5981 = vpow2.f32 %v1082_v58  ;;  %v5769_v17 = vunpack.i.h.bf16 %v5767_v2  ;;  %v5768_v56 = vunpack.i.l.bf16 %v5767_v2  ;;  %1122 = vadd.xlane.f32.xlu1 %v1121_v3  ;;  %v1118_v4 = vsel %vm991_vm4, %v6547_v62, 0.0  ;;  %v5772_v36 = vpop.permute.xlu0 %5771 }
 0x52f   :  { %5983 = vpow2.f32 %v1080_v63  ;;  %1119 = vadd.xlane.f32.xlu0 %v1118_v4  ;;  %v5774_v46 = vunpack.i.h.bf16 %v5772_v36  ;;  %v5773_v14 = vunpack.i.l.bf16 %v5772_v36 }
 0x530   :  { %v6553_v19 = vpop.eup %5973  ;;  %v6555_v10 = vpack.c.bf16 %v5769_v17, %v5768_v56 }
 0x531   :  { %v6557_v11 = vpop.eup %5975  ;;  %v1115_v16 = vsel %vm991_vm4, %v6553_v19, 0.0 }
 0x532   :  { %1116 = vadd.xlane.f32.xlu1 %v1115_v16  ;;  %5559 = vmatprep.subr.bf16.mxu1 %v6555_v10  ;;  %v1112_v18 = vsel %vm991_vm4, %v6557_v11, 0.0 }
 0x533   :  { %1113 = vadd.xlane.f32.xlu0 %v1112_v18 }
 0x534   :  { %v6564_v20 = vpop.eup %5977 }
 0x535   :  { %v6566_v24 = vpop.eup %5979  ;;  %v1133_v30 = vsel %vm991_vm4, %v6564_v20, 0.0 }
 0x536   :  { %1134 = vadd.xlane.f32.xlu1 %v1133_v30  ;;  %v1130_v21 = vsel %vm991_vm4, %v6566_v24, 0.0 }
 0x537   :  { %1131 = vadd.xlane.f32.xlu0 %v1130_v21 }
 0x538   :  { %v6572_v23 = vpop.eup %5981 }
 0x539   :  { %v6574_v29 = vpop.eup %5983  ;;  %v1127_v34 = vsel %vm991_vm4, %v6572_v23, 0.0 }
 0x53a   :  { %1128 = vadd.xlane.f32.xlu1 %v1127_v34  ;;  %v1124_v31 = vsel %vm991_vm4, %v6574_v29, 0.0 }
 0x53b   :  { %1125 = vadd.xlane.f32.xlu0 %v1124_v31 }
 0x54b   :  { %5776 = vrot.lane.b32.xlu1 %v6318_v57, %s6152_s12 }
 0x54f   :  { %1927 = vrot.lane.b32.xlu1 %v6210_v6, %s6153_s13 }
 0x551   :  { %5781 = vrot.lane.b32.xlu0 %v6328_v60, %s6152_s12 }
 0x55e   :  { %v1099_v35 = vpop.xlane.xlu1 %1098 }
 0x55f   :  { %v1096_v47 = vpop.xlane.xlu0 %1095 }
 0x560   :  { %5985 = vrcp.f32 %v1096_v47 }
 0x562   :  { %v1093_v39 = vpop.xlane.xlu1 %1092 }
 0x563   :  { %5987 = vrcp.f32 %v1093_v39  ;;  %v1090_v49 = vpop.xlane.xlu0 %1089 }
 0x564   :  { %5989 = vrcp.f32 %v1090_v49 }
 0x565   :  { %5991 = vrcp.f32 %v1099_v35 }
 0x56a   :  { %v5986_v40 = vpop.eup %5985 }
 0x56b   :  { %v1154_v8 = vmul.f32 %v5986_v40, %v6503_v45 }
 0x56d   :  { %v5988_v42 = vpop.eup %5987 }
 0x56e   :  { %v5990_v53 = vpop.eup %5989  ;;  %v1153_v60 = vmul.f32 %v5988_v42, %v6507_v1  ;;  %v5562_v1 = vpack.c.bf16 %v5774_v46, %v5773_v14 }
 0x56f   :  { %v1152_v57 = vmul.f32 %v5990_v53, %v6511_v13  ;;  %v5992_v59 = vpop.eup %5991 }
 0x570   :  { %v1155_v22 = vmul.f32 %v5992_v59, %v6501_v54 }
 0x571   :  { %5193 = vmatprep.mubr.msk.f32.mxu0 %vm991_vm4, %v1152_v57 }
 0x572   :  { %5194 = vmatmul.mubr.msk.f32.vlgmr.msra.gmra.mrb[10].mxu0 %vm991_vm4, %v1153_v60 }
 0x573   :  { %5549 = vmatpush3.bf16.msra.mxu0 %v6408_v55  ;;  %5200 = vmatprep.mubr.msk.f32.mxu0 %vm991_vm4, %v1154_v8 }
 0x574   :  { %5555 = vmatprep.subr.bf16.mxu0 %v5554_v48 }
 0x576   :  { %5201 = vmatmul.mubr.msk.f32.vlgmr.msra.gmra.mrb[12].mxu0 %vm991_vm4, %v1155_v22 }
 0x577   :  { %5557 = vmatpush3.bf16.msra.mxu0 %v5554_v48 }
 0x578   :  { %5563 = vmatprep.subr.bf16.mxu0 %v5562_v1 }
 0x5b3   :  { %v1111_v13 = vpop.xlane.xlu1 %1110 }
 0x5b4   :  { %5993 = vrcp.f32 %v1111_v13  ;;  %v1108_v45 = vpop.xlane.xlu0 %1107 }
 0x5b5   :  { %5995 = vrcp.f32 %v1108_v45 }
 0x5b7   :  { %v1105_v50 = vpop.xlane.xlu1 %1104 }
 0x5b8   :  { %5997 = vrcp.f32 %v1105_v50  ;;  %v1102_v15 = vpop.xlane.xlu0 %1101 }
 0x5b9   :  { %5999 = vrcp.f32 %v1102_v15 }
 0x5bb   :  { %v1123_v58 = vpop.xlane.xlu1 %1122 }
 0x5bc   :  { %6001 = vrcp.f32 %v1123_v58  ;;  %v1120_v55 = vpop.xlane.xlu0 %1119 }
 0x5bd   :  { %6003 = vrcp.f32 %v1120_v55 }
 0x5be   :  { %v5994_v63 = vpop.eup %5993 }
 0x5bf   :  { %v5996_v2 = vpop.eup %5995  ;;  %v1117_v54 = vpop.xlane.xlu1 %1116  ;;  %v1159_v56 = vmul.f32 %v5994_v63, %v6525_v33 }
 0x5c0   :  { %6005 = vrcp.f32 %v1117_v54  ;;  %v1114_v3 = vpop.xlane.xlu0 %1113  ;;  %v1158_v17 = vmul.f32 %v5996_v2, %v6527_v38 }
 0x5c1   :  { %6007 = vrcp.f32 %v1114_v3  ;;  %v6113_v3 = vld [vmem:[%s7253_s1 + $0x10] ss:$8 sps:$4 sm:$0xff]  }
 0x5c2   :  { %v5998_v4 = vpop.eup %5997  ;;  %5214 = vmatprep.mubr.msk.f32.mxu0 %vm991_vm4, %v1158_v17 }
 0x5c3   :  { %v6000_v16 = vpop.eup %5999  ;;  %v1135_v18 = vpop.xlane.xlu1 %1134  ;;  %5215 = vmatmul.mubr.msk.f32.vlgmr.msra.gmra.mrb[14].mxu0 %vm991_vm4, %v1159_v56  ;;  %v1157_v34 = vmul.f32 %v5998_v4, %v6535_v43 }
 0x5c4   :  { %5565 = vmatpush3.bf16.msra.mxu0 %v5562_v1  ;;  %v1132_v30 = vpop.xlane.xlu0 %1131  ;;  %v1156_v21 = vmul.f32 %v6000_v16, %v6537_v44 }
 0x5c5   :  { %6009 = vrcp.f32 %v1132_v30 }
 0x5c6   :  { %v6002_v31 = vpop.eup %6001  ;;  %6011 = vrcp.f32 %v1135_v18  ;;  %5207 = vmatprep.mubr.msk.f32.mxu1 %vm991_vm4, %v1156_v21 }
 0x5c7   :  { %v6004_v38 = vpop.eup %6003  ;;  %v1129_v33 = vpop.xlane.xlu1 %1128  ;;  %5208 = vmatmul.mubr.msk.f32.vlgmr.msra.gmra.mrb[12].mxu1 %vm991_vm4, %v1157_v34  ;;  %v1163_v44 = vmul.f32 %v6002_v31, %v6545_v52 }
 0x5c8   :  { %6013 = vrcp.f32 %v1129_v33  ;;  %5561 = vmatpush3.bf16.msra.mxu1 %v6555_v10  ;;  %v1126_v36 = vpop.xlane.xlu0 %1125  ;;  %v1162_v35 = vmul.f32 %v6004_v38, %v6547_v62 }
 0x5c9   :  { %6015 = vrcp.f32 %v1126_v36 }
 0x5ca   :  { %v6006_v47 = vpop.eup %6005  ;;  %5228 = vmatprep.mubr.msk.f32.mxu0 %vm991_vm4, %v1162_v35 }
 0x5cb   :  { %v6008_v43 = vpop.eup %6007  ;;  %v5777_v39 = vpop.permute.xlu1 %5776  ;;  %5229 = vmatmul.mubr.msk.f32.vlgmr.msra.gmra.mrb[16].mxu0 %vm991_vm4, %v1163_v44  ;;  %v1161_v52 = vmul.f32 %v6006_v47, %v6553_v19 }
 0x5cc   :  { %v5779_v49 = vunpack.i.h.bf16 %v5777_v39  ;;  %v5778_v40 = vunpack.i.l.bf16 %v5777_v39  ;;  %v5782_v10 = vpop.permute.xlu0 %5781  ;;  %v1160_v42 = vmul.f32 %v6008_v43, %v6557_v11 }
 0x5cd   :  { %v5784_v62 = vunpack.i.h.bf16 %v5782_v10  ;;  %v5783_v53 = vunpack.i.l.bf16 %v5782_v10 }
 0x5ce   :  { %5221 = vmatprep.mubr.msk.f32.mxu1 %vm991_vm4, %v1160_v42  ;;  %v5566_v61 = vpack.c.bf16 %v5779_v49, %v5778_v40 }
 0x5cf   :  { %v6010_v51 = vpop.eup %6009  ;;  %5222 = vmatmul.mubr.msk.f32.vlgmr.msra.gmra.mrb[14].mxu1 %vm991_vm4, %v1161_v52  ;;  %v5570_v57 = vpack.c.bf16 %v5784_v62, %v5783_v53 }
 0x5d0   :  { %v6012_v60 = vpop.eup %6011  ;;  %5567 = vmatprep.subr.bf16.mxu1 %v5566_v61  ;;  %v1166_v6 = vmul.f32 %v6010_v51, %v6566_v24  ;;  %v1928_v24 = vpop.permute.xlu1 %1927 }
 0x5d1   :  { %5569 = vmatpush3.bf16.msra.mxu1 %v5566_v61  ;;  %5571 = vmatprep.subr.bf16.mxu0 %v5570_v57  ;;  %v1167_v19 = vmul.f32 %v6012_v60, %v6564_v20 }
 0x5d2   :  { %v6014_v59 = vpop.eup %6013  ;;  %5573 = vmatpush3.bf16.msra.mxu0 %v5570_v57  ;;  %5242 = vmatprep.mubr.msk.f32.mxu0 %vm991_vm4, %v1166_v6 }
 0x5d3   :  { %v6016_v11 = vpop.eup %6015  ;;  %v1165_v46 = vmul.f32 %v6014_v59, %v6572_v23  ;;  %5245 = vmatprep.subr.bf16.mxu1 %v1928_v24 }
 0x5d4   :  { %v1164_v8 = vmul.f32 %v6016_v11, %v6574_v29 }
 0x5d5   :  { %5243 = vmatmul.mubr.msk.f32.vlgmr.msra.gmra.mrb[18].mxu0 %vm991_vm4, %v1167_v19 }
 0x5d6   :  { %5235 = vmatprep.mubr.msk.f32.mxu1 %vm991_vm4, %v1164_v8 }
 0x5d7   :  { %5236 = vmatmul.mubr.msk.f32.vlgmr.msra.gmra.mrb[16].mxu1 %vm991_vm4, %v1165_v46 }
 0x5d8   :  { %5246 = vmatpush3.bf16.msra.mxu1 %v1928_v24 }
 0x645   :  { %v5195_v14 = vpop.f32.mrb[10].mxu0 }
 0x646   :  { %v1246_v48 = vpop.f32.mrb[11].mxu0 }
 0x649   :  { %v5202_v22 = vpop.f32.mrb[12].mxu0 }
 0x64a   :  { %v1333_v1 = vpop.f32.mrb[13].mxu0 }
 0x696   :  { %v5216_v13 = vpop.f32.mrb[14].mxu0 }
 0x697   :  { %v1507_v45 = vpop.f32.mrb[15].mxu0 }
 0x698   :  { %v5785_v20 = vpack.i.bf16 %v5216_v13, %v1507_v45 }
 0x69a   :  { %5786 = vrot.lane.b32.xlu1 %v5785_v20, %s6144_s26  ;;  %v5209_v29 = vpop.f32.mrb[12].mxu1 }
 0x69b   :  { %v1420_v50 = vpop.f32.mrb[13].mxu1 }
 0x69c   :  { %v5790_v15 = vpack.i.bf16 %v5209_v29, %v1420_v50 }
 0x69e   :  { %5791 = vrot.lane.b32.xlu0 %v5790_v15, %s6144_s26  ;;  %v5230_v23 = vpop.f32.mrb[16].mxu0 }
 0x69f   :  { %v1681_v58 = vpop.f32.mrb[17].mxu0 }
 0x6a0   :  { %v5795_v55 = vpack.i.bf16 %v5230_v23, %v1681_v58 }
 0x6a2   :  { %v5223_v63 = vpop.f32.mrb[14].mxu1  ;;  %5796 = vrot.lane.b32.xlu1 %v5795_v55, %s6154_s14 }
 0x6a3   :  { %v1594_v2 = vpop.f32.mrb[15].mxu1 }
 0x6a4   :  { %v5800_v54 = vpack.i.bf16 %v5223_v63, %v1594_v2 }
 0x6a6   :  { %5801 = vrot.lane.b32.xlu0 %v5800_v54, %s6154_s14  ;;  %1929 = vrot.lane.b32.xlu1 %v6113_v3, %s6153_s13 }
 0x6a8   :  { %v5244_v17 = vpop.f32.mrb[18].mxu0 }
 0x6a9   :  { %v1855_v56 = vpop.f32.mrb[19].mxu0 }
 0x6aa   :  { %v5810_v4 = vpack.i.bf16 %v5244_v17, %v1855_v56  ;;  %v5237_v16 = vpop.f32.mrb[16].mxu1  ;;  %1934 = vrot.lane.b32.xlu1 %v6250_v32, %s6153_s13 }
 0x6ab   :  { %v1768_v18 = vpop.f32.mrb[17].mxu1 }
 0x6ac   :  { %v5805_v30 = vpack.i.bf16 %v5237_v16, %v1768_v18 }
 0x6ae   :  { %5806 = vrot.lane.b32.xlu0 %v5805_v30, %s6155_s17 }
 0x6b2   :  { %5811 = vrot.lane.b32.xlu0 %v5810_v4, %s6155_s17 }
 0x70c   :  { %v5787_v21 = vpop.permute.xlu1 %5786 }
 0x70d   :  { %v5789_v43 = vunpack.i.h.bf16 %v5787_v21  ;;  %v5788_v32 = vunpack.i.l.bf16 %v5787_v21 }
 0x70f   :  { %v1915_v59 = vsel %vm40_vm1, %v5202_v22, %v5789_v43  ;;  %v1914_v11 = vsel %vm40_vm1, %v1333_v1, %v5788_v32 }
 0x710   :  { %v5792_v31 = vpop.permute.xlu0 %5791 }
 0x711   :  { %v5794_v36 = vunpack.i.h.bf16 %v5792_v31  ;;  %v5793_v35 = vunpack.i.l.bf16 %v5792_v31 }
 0x713   :  { %v1913_v49 = vsel %vm40_vm1, %v5195_v14, %v5794_v36  ;;  %v1912_v40 = vsel %vm40_vm1, %v1246_v48, %v5793_v35 }
 0x714   :  { %v5797_v34 = vpop.permute.xlu1 %5796 }
 0x715   :  { %v5799_v62 = vunpack.i.h.bf16 %v5797_v34  ;;  %v5798_v53 = vunpack.i.l.bf16 %v5797_v34 }
 0x717   :  { %v1919_v46 = vsel %vm991_vm4, %v1915_v59, %v5799_v62  ;;  %v1918_v24 = vsel %vm991_vm4, %v1914_v11, %v5798_v53  ;;  %v5929_v62 = vld [vmem:[%s7253_s1 + $0x4] ss:$8 sps:$4 sm:$0xff]   ;;  %v5930_v53 = vld [vmem:[%s7253_s1 + $0x14] ss:$8 sps:$4 sm:$0xff]  }
 0x718   :  { %v1930_v38 = vpop.permute.xlu1 %1929  ;;  %v5802_v33 = vpop.permute.xlu0 %5801  ;;  %5253 = vmatprep.subr.bf16.mxu0 %v5929_v62 }
 0x719   :  { %5247 = vmatprep.subr.bf16.mxu1 %v1930_v38  ;;  %v5804_v44 = vunpack.i.h.bf16 %v5802_v33  ;;  %v5803_v47 = vunpack.i.l.bf16 %v5802_v33  ;;  %5254 = vmatpush3.bf16.msra.mxu0 %v5929_v62 }
 0x71a   :  { %5248 = vmatpush3.bf16.msra.mxu1 %v1930_v38  ;;  %5255 = vmatprep.subr.bf16.mxu0 %v5930_v53 }
 0x71b   :  { %v1916_v52 = vsel %vm991_vm4, %v1912_v40, %v5803_v47  ;;  %v1917_v61 = vsel %vm991_vm4, %v1913_v49, %v5804_v44  ;;  %v2051_v40 = vsub.s32 2, %v6205_v5 }
 0x71c   :  { %v1935_v45 = vpop.permute.xlu1 %1934 }
 0x71d   :  { %5256 = vmatpush3.bf16.msra.mxu0 %v5930_v53 }
 0x720   :  { %v5807_v39 = vpop.permute.xlu0 %5806 }
 0x721   :  { %v5809_v10 = vunpack.i.h.bf16 %v5807_v39  ;;  %v5808_v42 = vunpack.i.l.bf16 %v5807_v39 }
 0x723   :  { %v1921_v51 = vsel %vm1920_vm5, %v1916_v52, %v5808_v42  ;;  %v1922_v57 = vsel %vm1920_vm5, %v1917_v61, %v5809_v10  ;;  %v6677_v10 = vld [vmem:[#allocation2 + $0x10] sm:$0xff]  ;;  %v5931_v52 = vld [vmem:[%s7254_s2] sm:$0xff]   ;;  %v5932_v61 = vld [vmem:[%s7254_s2 + $0x8] sm:$0xff]  }
 0x724   :  { %v5812_v60 = vpop.permute.xlu0 %5811  ;;  %v1925_v6 = vpack.c.bf16 %v1922_v57, %v1921_v51  ;;  %v6682_v42 = vrot.slane %v6677_v10, %v2051_v40  ;;  %5261 = vmatprep.subr.bf16.mxu1 %v5931_v52  ;;  %v5933_v51 = vld [vmem:[%s7254_s2 + $0x10] sm:$0xff]   ;;  %v5934_v57 = vld [vmem:[%s7254_s2 + $0x18] sm:$0xff]  }
 0x725   :  { %v5814_v19 = vunpack.i.h.bf16 %v5812_v60  ;;  %v5813_v8 = vunpack.i.l.bf16 %v5812_v60  ;;  %v5935_v60 = vld [vmem:[%s7254_s2 + $0x20] sm:$0xff]  }
 0x726   :  { %5249 = vmatprep.mubr.msk.bf16.mxu1 %vm173_vm2, %v1925_v6  ;;  %v5936_v6 = vld [vmem:[%s7254_s2 + $0x28] sm:$0xff]  }
 0x727   :  { %v1924_v14 = vsel %vm1920_vm5, %v1919_v46, %v5814_v19  ;;  %v1923_v48 = vsel %vm1920_vm5, %v1918_v24, %v5813_v8 }
 0x728   :  { %v1926_v13 = vpack.c.bf16 %v1924_v14, %v1923_v48 }
 0x72a   :  { %5250 = vmatmul.mubr.msk.bf16.vlgmr.msra.gmra.mrb[20].mxu1 %vm173_vm2, %v1926_v13 }
 0x72b   :  { %5262 = vmatpush3.bf16.msra.mxu1 %v5931_v52  ;;  %v2158_v52 = vsub.s32 3, %v6205_v5 }
 0x72c   :  { %5263 = vmatprep.subr.bf16.mxu1 %v5932_v61 }
 0x72f   :  { %5264 = vmatpush3.bf16.msra.mxu1 %v5932_v61  ;;  %v2159_v61 = vrot.slane %v6677_v10, %v2158_v52 }
 0x730   :  { %5265 = vmatprep.subr.bf16.mxu1 %v5933_v51 }
 0x733   :  { %5266 = vmatpush3.bf16.msra.mxu1 %v5933_v51 }
 0x734   :  { %5267 = vmatprep.subr.bf16.mxu1 %v5934_v57 }
 0x737   :  { %5268 = vmatpush3.bf16.msra.mxu1 %v5934_v57 }
 0x738   :  { %5269 = vmatprep.subr.bf16.mxu1 %v5935_v60 }
 0x73b   :  { %5270 = vmatpush3.bf16.msra.mxu1 %v5935_v60 }
 0x73c   :  { %5271 = vmatprep.subr.bf16.mxu1 %v5936_v6 }
 0x73f   :  { %5272 = vmatpush3.bf16.msra.mxu1 %v5936_v6 }
 0x7fd   :  { %v5251_v20 = vpop.f32.mrb[20].mxu1 }
 0x7fe   :  { %v1977_v22 = vpop.f32.mrb[21].mxu1  ;;  %v1986_v29 = vadd.f32 %v5251_v20, %v1935_v45 }
 0x7ff   :  { %v1978_v1 = vadd.f32 %v1977_v22, %v1935_v45  ;;  %v5252_v50 = vpop.f32.mrb[22].mxu1 }
 0x800   :  { %v1980_v15 = vpop.f32.mrb[23].mxu1  ;;  %v1989_v55 = vadd.f32 %v5252_v50, %v1935_v45  ;;  %v1994_v54 = vadd.f32 %v1986_v29, %v6235_v25 }
 0x801   :  { %v1981_v23 = vadd.f32 %v1980_v15, %v1935_v45  ;;  %v1992_v58 = vadd.f32 %v1978_v1, %v6239_v27 }
 0x802   :  { %v2002_v17 = vsel %vm173_vm2, %v1994_v54, 0.0  ;;  %v1995_v56 = vadd.f32 %v1989_v55, %v6237_v26 }
 0x803   :  { %v1996_v63 = vsel %vm173_vm2, %v1992_v58, 0.0  ;;  %v1993_v2 = vadd.f32 %v1981_v23, %v6241_v28 }
 0x804   :  { %1997 = vadd.xlane.f32.xlu0 %v1996_v63  ;;  %v2005_v4 = vsel %vm173_vm2, %v1995_v56, 0.0 }
 0x805   :  { %v1999_v3 = vsel %vm173_vm2, %v1993_v2, 0.0 }
 0x806   :  { %2000 = vadd.xlane.f32.xlu1 %v1999_v3 }
 0x808   :  { %2003 = vadd.xlane.f32.xlu0 %v2002_v17 }
 0x80c   :  { %2006 = vadd.xlane.f32.xlu0 %v2005_v4 }
 0x891   :  { %v1998_v27 = vpop.xlane.xlu0 %1997 }
 0x892   :  { %v2009_v18 = vmul.f32 0.03125, %v1998_v27 }
 0x893   :  { %v2001_v16 = vpop.xlane.xlu1 %2000 }
 0x894   :  { %v2010_v30 = vmul.f32 0.03125, %v2001_v16  ;;  %v6658_v34 = vsub.f32 %v1992_v58, %v2009_v18 }
 0x895   :  { %v2004_v21 = vpop.xlane.xlu0 %2003 }
 0x896   :  { %v6656_v28 = vsub.f32 %v1993_v2, %v2010_v30  ;;  %v2011_v25 = vmul.f32 0.03125, %v2004_v21  ;;  %v2017_v43 = vmul.f32 %v6658_v34, %v6658_v34 }
 0x898   :  { %v6660_v31 = vsub.f32 %v1994_v54, %v2011_v25  ;;  %v2018_v38 = vmul.f32 %v6656_v28, %v6656_v28  ;;  %v2021_v39 = vsel %vm173_vm2, %v2017_v43, 0.0  ;;  %v5938_v25 = vld [vmem:[%s7254_s2 + $0x38] sm:$0xff]  }
 0x899   :  { %v2007_v26 = vpop.xlane.xlu0 %2006 }
 0x89a   :  { %v2012_v33 = vmul.f32 0.03125, %v2007_v26  ;;  %v2024_v36 = vsel %vm173_vm2, %v2018_v38, 0.0  ;;  %v2019_v35 = vmul.f32 %v6660_v31, %v6660_v31 }
 0x89b   :  { %2025 = vadd.xlane.f32.xlu0 %v2024_v36 }
 0x89c   :  { %v6667_v44 = vsub.f32 %v1995_v56, %v2012_v33  ;;  %v2027_v47 = vsel %vm173_vm2, %v2019_v35, 0.0 }
 0x89d   :  { %2028 = vadd.xlane.f32.xlu1 %v2027_v47 }
 0x89e   :  { %v2020_v32 = vmul.f32 %v6667_v44, %v6667_v44 }
 0x8a0   :  { %v2030_v49 = vsel %vm173_vm2, %v2020_v32, 0.0 }
 0x8a1   :  { %2022 = vadd.xlane.f32.xlu1 %v2021_v39  ;;  %2031 = vadd.xlane.f32.xlu0 %v2030_v49 }
 0x8b2   :  { %2058 = vrot.lane.b32.xlu1 %v6682_v42, %s6148_s8 }
 0x928   :  { %v2026_v59 = vpop.xlane.xlu0 %2025 }
 0x929   :  { %v2034_v11 = vmul.f32 0.03125, %v2026_v59 }
 0x92a   :  { %v2029_v19 = vpop.xlane.xlu1 %2028 }
 0x92b   :  { %v2038_v8 = vadd.f32 1e-05, %v2034_v11  ;;  %v2035_v46 = vmul.f32 0.03125, %v2029_v19 }
 0x92d   :  { %6017 = vrsqrt.f32 %v2038_v8  ;;  %v2039_v24 = vadd.f32 1e-05, %v2035_v46 }
 0x92e   :  { %v2023_v14 = vpop.xlane.xlu1 %2022  ;;  %v2032_v48 = vpop.xlane.xlu0 %2031 }
 0x92f   :  { %6019 = vrsqrt.f32 %v2039_v24  ;;  %v2033_v13 = vmul.f32 0.03125, %v2023_v14  ;;  %v2036_v45 = vmul.f32 0.03125, %v2032_v48 }
 0x931   :  { %v2037_v20 = vadd.f32 1e-05, %v2033_v13  ;;  %v2040_v22 = vadd.f32 1e-05, %v2036_v45 }
 0x932   :  { %v2059_v54 = vpop.permute.xlu1 %2058 }
 0x933   :  { %6021 = vrsqrt.f32 %v2037_v20 }
 0x934   :  { %6023 = vrsqrt.f32 %v2040_v22 }
 0x937   :  { %v6018_v29 = vpop.eup %6017 }
 0x938   :  { %v2046_v50 = vmul.f32 %v6018_v29, %v6656_v28  ;;  %v5937_v28 = vld [vmem:[%s7254_s2 + $0x30] sm:$0xff]  }
 0x939   :  { %v6020_v1 = vpop.eup %6019  ;;  %5273 = vmatprep.subr.bf16.mxu1 %v5937_v28 }
 0x93a   :  { %v2047_v15 = vmul.f32 %v6020_v1, %v6660_v31  ;;  %v2054_v63 = vmul.f32 %v6682_v42, %v2046_v50  ;;  %5274 = vmatpush3.bf16.msra.mxu1 %v5937_v28 }
 0x93b   :  { %5275 = vmatprep.subr.bf16.mxu1 %v5938_v25 }
 0x93c   :  { %v2055_v2 = vmul.f32 %v6682_v42, %v2047_v15  ;;  %v2062_v27 = vadd.f32 %v2059_v54, %v2054_v63 }
 0x93d   :  { %v6022_v23 = vpop.eup %6021 }
 0x93e   :  { %v6024_v58 = vpop.eup %6023  ;;  %v2045_v55 = vmul.f32 %v6022_v23, %v6658_v34  ;;  %v2063_v16 = vadd.f32 %v2059_v54, %v2055_v2  ;;  %5276 = vmatpush3.bf16.msra.mxu1 %v5938_v25  ;;  %v2070_v34 = vrot.slane %v6677_v10, %v6222_v12  ;;  %v6747_v25 = vld [vmem:[%s7253_s1 + $0x20] ss:$8 sps:$4 sm:$0xff]  }
 0x93f   :  { %v2048_v3 = vmul.f32 %v6024_v58, %v6667_v44  ;;  %5281 = vmatprep.subr.bf16.mxu0 %v6747_v25 }
 0x940   :  { %v2053_v17 = vmul.f32 %v6682_v42, %v2045_v55 }
 0x941   :  { %v2056_v56 = vmul.f32 %v6682_v42, %v2048_v3 }
 0x942   :  { %v2061_v4 = vadd.f32 %v2059_v54, %v2053_v17 }
 0x943   :  { %v2064_v18 = vadd.f32 %v2059_v54, %v2056_v56 }
 0x944   :  { %v2065_v30 = vpack.c.bf16 %v2062_v27, %v2061_v4 }
 0x945   :  { %v2066_v21 = vpack.c.bf16 %v2064_v18, %v2063_v16 }
 0x946   :  { %5257 = vmatprep.mubr.msk.bf16.mxu0 %vm173_vm2, %v2065_v30 }
 0x947   :  { %5258 = vmatmul.mubr.msk.bf16.vlgmr.msra.gmra.mrb[20].mxu0 %vm173_vm2, %v2066_v21 }
 0x948   :  { %5282 = vmatpush3.bf16.msra.mxu0 %v6747_v25 }
 0xa1a   :  { %v5259_v31 = vpop.f32.mrb[20].mxu0 }
 0xa1b   :  { %v2128_v38 = vadd.f32 %v5259_v31, %v2070_v34  ;;  %v2119_v26 = vpop.f32.mrb[21].mxu0 }
 0xa1c   :  { %v2120_v33 = vadd.f32 %v2119_v26, %v2070_v34  ;;  %v5260_v36 = vpop.f32.mrb[22].mxu0 }
 0xa1d   :  { %v2131_v35 = vadd.f32 %v5260_v36, %v2070_v34  ;;  %v2122_v44 = vpop.f32.mrb[23].mxu0  ;;  %v2136_v43 = vmax.f32 %v2128_v38, 0.0 }
 0xa1e   :  { %v2123_v47 = vadd.f32 %v2122_v44, %v2070_v34  ;;  %v2134_v39 = vmax.f32 %v2120_v33, 0.0  ;;  %v5941_v34 = vld [vmem:[%s7253_s1 + $0x30] ss:$8 sps:$4 sm:$0xff]  }
 0xa1f   :  { %v2137_v32 = vmax.f32 %v2131_v35, 0.0  ;;  %5283 = vmatprep.subr.bf16.mxu0 %v5941_v34 }
 0xa20   :  { %v2135_v49 = vmax.f32 %v2123_v47, 0.0  ;;  %5284 = vmatpush3.bf16.msra.mxu0 %v5941_v34 }
 0xa21   :  { %v2139_v62 = vpack.c.bf16 %v2137_v32, %v2136_v43 }
 0xa22   :  { %v2138_v53 = vpack.c.bf16 %v2135_v49, %v2134_v39 }
 0xa24   :  { %5277 = vmatprep.mubr.bf16.mxu1 %v2138_v53 }
 0xa25   :  { %5278 = vmatmul.mubr.bf16.vlgmr.msra.gmra.mrb[24].mxu1 %v2139_v62 }
 0xaf8   :  { %v5279_v51 = vpop.f32.mrb[24].mxu1 }
 0xaf9   :  { %v2251_v57 = vadd.f32 %v5279_v51, %v2159_v61  ;;  %v2242_v60 = vpop.f32.mrb[25].mxu1 }
 0xafa   :  { %v2243_v6 = vadd.f32 %v2242_v60, %v2159_v61  ;;  %v5280_v59 = vpop.f32.mrb[26].mxu1 }
 0xafb   :  { %v2245_v11 = vpop.f32.mrb[27].mxu1  ;;  %v2259_v19 = vadd.f32 %v2251_v57, %v2063_v16  ;;  %v2254_v14 = vadd.f32 %v5280_v59, %v2159_v61 }
 0xafc   :  { %v2246_v8 = vadd.f32 %v2245_v11, %v2159_v61  ;;  %v2257_v24 = vadd.f32 %v2243_v6, %v2061_v4 }
 0xafd   :  { %v2267_v46 = vsel %vm173_vm2, %v2259_v19, 0.0  ;;  %v2260_v20 = vadd.f32 %v2254_v14, %v2064_v18 }
 0xafe   :  { %2268 = vadd.xlane.f32.xlu0 %v2267_v46  ;;  %v2261_v48 = vsel %vm173_vm2, %v2257_v24, 0.0  ;;  %v2258_v13 = vadd.f32 %v2246_v8, %v2062_v27 }
 0xaff   :  { %v2270_v22 = vsel %vm173_vm2, %v2260_v20, 0.0 }
 0xb00   :  { %v2264_v45 = vsel %vm173_vm2, %v2258_v13, 0.0 }
 0xb02   :  { %2262 = vadd.xlane.f32.xlu0 %v2261_v48 }
 0xb06   :  { %2265 = vadd.xlane.f32.xlu0 %v2264_v45 }
 0xb0a   :  { %2271 = vadd.xlane.f32.xlu0 %v2270_v22 }
 0xb8b   :  { %v2269_v29 = vpop.xlane.xlu0 %2268 }
 0xb8c   :  { %v2275_v1 = vmul.f32 0.03125, %v2269_v29  ;;  %v2336_v29 = vsub.s32 4, %v6205_v5 }
 0xb8e   :  { %v2279_v50 = vsub.f32 %v2259_v19, %v2275_v1  ;;  %v6770_v1 = vrot.slane %v6677_v10, %v2336_v29 }
 0xb8f   :  { %v2263_v15 = vpop.xlane.xlu0 %2262 }
 0xb90   :  { %v2273_v23 = vmul.f32 0.03125, %v2263_v15  ;;  %v2283_v58 = vmul.f32 %v2279_v50, %v2279_v50 }
 0xb92   :  { %v2277_v55 = vsub.f32 %v2257_v24, %v2273_v23  ;;  %v2291_v63 = vsel %vm173_vm2, %v2283_v58, 0.0 }
 0xb93   :  { %2292 = vadd.xlane.f32.xlu0 %v2291_v63  ;;  %v2266_v2 = vpop.xlane.xlu0 %2265 }
 0xb94   :  { %v2281_v54 = vmul.f32 %v2277_v55, %v2277_v55  ;;  %v2274_v3 = vmul.f32 0.03125, %v2266_v2 }
 0xb96   :  { %v2285_v17 = vsel %vm173_vm2, %v2281_v54, 0.0  ;;  %v2278_v27 = vsub.f32 %v2258_v13, %v2274_v3 }
 0xb97   :  { %2286 = vadd.xlane.f32.xlu1 %v2285_v17  ;;  %v2272_v56 = vpop.xlane.xlu0 %2271 }
 0xb98   :  { %v2276_v4 = vmul.f32 0.03125, %v2272_v56  ;;  %v2282_v21 = vmul.f32 %v2278_v27, %v2278_v27 }
 0xb9a   :  { %v2280_v16 = vsub.f32 %v2260_v20, %v2276_v4  ;;  %v2288_v28 = vsel %vm173_vm2, %v2282_v21, 0.0 }
 0xb9c   :  { %v2284_v18 = vmul.f32 %v2280_v16, %v2280_v16 }
 0xb9e   :  { %v2294_v30 = vsel %vm173_vm2, %v2284_v18, 0.0 }
 0xb9f   :  { %2295 = vadd.xlane.f32.xlu0 %v2294_v30 }
 0xba3   :  { %2289 = vadd.xlane.f32.xlu0 %v2288_v28 }
 0xbb9   :  { %2313 = vrot.lane.b32.xlu0 %v6682_v42, %s6152_s12 }
 0xbbd   :  { %2320 = vrot.lane.b32.xlu0 %v6682_v42, %s6153_s13 }
 0xc20   :  { %v2293_v26 = vpop.xlane.xlu0 %2292 }
 0xc21   :  { %v2299_v42 = vmul.f32 0.03125, %v2293_v26 }
 0xc23   :  { %v2303_v47 = vadd.f32 1e-05, %v2299_v42 }
 0xc24   :  { %v2287_v31 = vpop.xlane.xlu1 %2286 }
 0xc25   :  { %v2297_v38 = vmul.f32 0.03125, %v2287_v31 }
 0xc27   :  { %v2301_v33 = vadd.f32 1e-05, %v2297_v38 }
 0xc29   :  { %6025 = vrsqrt.f32 %v2301_v33 }
 0xc2c   :  { %v2296_v36 = vpop.xlane.xlu0 %2295 }
 0xc2d   :  { %v2300_v35 = vmul.f32 0.03125, %v2296_v36 }
 0xc2f   :  { %v2304_v44 = vadd.f32 1e-05, %v2300_v35 }
 0xc30   :  { %v2290_v43 = vpop.xlane.xlu0 %2289 }
 0xc31   :  { %6027 = vrsqrt.f32 %v2304_v44  ;;  %v2298_v32 = vmul.f32 0.03125, %v2290_v43 }
 0xc32   :  { %6029 = vrsqrt.f32 %v2303_v47 }
 0xc33   :  { %v2302_v39 = vadd.f32 1e-05, %v2298_v32  ;;  %v6026_v49 = vpop.eup %6025 }
 0xc34   :  { %v2314_v53 = vpop.permute.xlu0 %2313  ;;  %v2309_v61 = vmul.f32 %v6026_v49, %v2277_v55 }
 0xc35   :  { %6031 = vrsqrt.f32 %v2302_v39 }
 0xc36   :  { %v2316_v11 = vmul.f32 %v2314_v53, %v2309_v61 }
 0xc38   :  { %v2321_v8 = vpop.permute.xlu0 %2320 }
 0xc39   :  { %v6756_v48 = vadd.f32 %v2321_v8, %v2316_v11 }
 0xc3b   :  { %v6028_v62 = vpop.eup %6027 }
 0xc3c   :  { %v2312_v51 = vmul.f32 %v6028_v62, %v2280_v16  ;;  %v6030_v57 = vpop.eup %6029 }
 0xc3d   :  { %v2311_v19 = vmul.f32 %v6030_v57, %v2279_v50 }
 0xc3e   :  { %v2319_v6 = vmul.f32 %v2314_v53, %v2312_v51 }
 0xc3f   :  { %v6032_v60 = vpop.eup %6031  ;;  %v2318_v24 = vmul.f32 %v2314_v53, %v2311_v19 }
 0xc40   :  { %v2310_v59 = vmul.f32 %v6032_v60, %v2278_v27  ;;  %v6754_v14 = vadd.f32 %v2321_v8, %v2319_v6 }
 0xc41   :  { %v6760_v45 = vadd.f32 %v2321_v8, %v2318_v24 }
 0xc42   :  { %v2317_v46 = vmul.f32 %v2314_v53, %v2310_v59 }
 0xc43   :  { %v2333_v22 = vpack.c.bf16 %v6754_v14, %v6760_v45 }
 0xc44   :  { %v6758_v13 = vadd.f32 %v2321_v8, %v2317_v46 }
 0xc46   :  { %v2332_v20 = vpack.c.bf16 %v6758_v13, %v6756_v48 }
 0xc48   :  { %5285 = vmatprep.mubr.msk.bf16.mxu0 %vm173_vm2, %v2332_v20 }
 0xc49   :  { %5286 = vmatmul.mubr.msk.bf16.vlgmr.msra.gmra.mrb[24].mxu0 %vm173_vm2, %v2333_v22 }
 0xd1c   :  { %v5287_v50 = vpop.f32.mrb[24].mxu0 }
 0xd1d   :  { %v6773_v15 = vadd.f32 %v5287_v50, %v6770_v1  ;;  %v2390_v23 = vpop.f32.mrb[25].mxu0 }
 0xd1e   :  { %v2391_v58 = vadd.f32 %v2390_v23, %v6770_v1  ;;  %v5288_v55 = vpop.f32.mrb[26].mxu0 }
 0xd1f   :  { %2413 = vrot.lane.b32.xlu0 %v6773_v15, %s6149_s9  ;;  %v2393_v63 = vpop.f32.mrb[27].mxu0  ;;  %v2402_v10 = vadd.f32 %v5288_v55, %v6770_v1 }
 0xd20   :  { %v2394_v2 = vadd.f32 %v2393_v63, %v6770_v1  ;;  %2409 = vrot.lane.b32.xlu1 %v2391_v58, %s6149_s9  ;;  %5293 = vmatprep.mubr.msk.f32.mxu0 %vm40_vm1, %v2391_v58 }
 0xd21   :  { %v5820_v54 = vpack.i.bf16 %v2402_v10, %v6773_v15 }
 0xd22   :  { %v5815_v3 = vpack.i.bf16 %v2394_v2, %v2391_v58 }
 0xd23   :  { %2411 = vrot.lane.b32.xlu0 %v2394_v2, %s6149_s9 }
 0xd24   :  { %2419 = vrot.lane.b32.xlu1 %v2394_v2, %s6150_s10 }
 0xd27   :  { %2415 = vrot.lane.b32.xlu0 %v2402_v10, %s6149_s9 }
 0xd28   :  { %2423 = vrot.lane.b32.xlu1 %v2402_v10, %s6150_s10 }
 0xd2b   :  { %2417 = vrot.lane.b32.xlu0 %v2391_v58, %s6150_s10 }
 0xd2c   :  { %2427 = vrot.lane.b32.xlu1 %v2394_v2, %s6151_s11 }
 0xd2f   :  { %2421 = vrot.lane.b32.xlu0 %v6773_v15, %s6150_s10 }
 0xd30   :  { %2431 = vrot.lane.b32.xlu1 %v2402_v10, %s6151_s11 }
 0xd33   :  { %2425 = vrot.lane.b32.xlu0 %v2391_v58, %s6151_s11 }
 0xd34   :  { %5821 = vrot.lane.b32.xlu1 %v5820_v54, %s6148_s8 }
 0xd37   :  { %2429 = vrot.lane.b32.xlu0 %v6773_v15, %s6151_s11 }
 0xd3b   :  { %5816 = vrot.lane.b32.xlu0 %v5815_v3, %s6148_s8 }
 0xd91   :  { %v2414_v17 = vpop.permute.xlu0 %2413 }
 0xd92   :  { %5314 = vmatprep.mubr.msk.f32.mxu1 %vm40_vm1, %v2414_v17  ;;  %v2410_v56 = vpop.permute.xlu1 %2409 }
 0xd95   :  { %v2412_v4 = vpop.permute.xlu0 %2411 }
 0xd96   :  { %v5825_v27 = vpack.i.bf16 %v2412_v4, %v2410_v56  ;;  %v6798_v16 = vpop.permute.xlu1 %2419 }
 0xd98   :  { %5826 = vrot.lane.b32.xlu0 %v5825_v27, %s6148_s8 }
 0xd99   :  { %v6801_v18 = vpop.permute.xlu0 %2415 }
 0xd9a   :  { %v5830_v30 = vpack.i.bf16 %v6801_v18, %v2414_v17  ;;  %v6804_v21 = vpop.permute.xlu1 %2423 }
 0xd9c   :  { %5831 = vrot.lane.b32.xlu1 %v5830_v30, %s6148_s8 }
 0xd9d   :  { %v2418_v28 = vpop.permute.xlu0 %2417 }
 0xd9e   :  { %v6808_v34 = vpack.i.bf16 %v6798_v16, %v2418_v28  ;;  %v6810_v31 = vpop.permute.xlu1 %2427 }
 0xda0   :  { %5836 = vrot.lane.b32.xlu0 %v6808_v34, %s6148_s8 }
 0xda1   :  { %v2422_v38 = vpop.permute.xlu0 %2421 }
 0xda2   :  { %v6815_v26 = vpack.i.bf16 %v6804_v21, %v2422_v38  ;;  %v6819_v33 = vpop.permute.xlu1 %2431 }
 0xda4   :  { %5841 = vrot.lane.b32.xlu1 %v6815_v26, %s6148_s8 }
 0xda5   :  { %v6821_v42 = vpop.permute.xlu0 %2425 }
 0xda6   :  { %v6825_v36 = vpack.i.bf16 %v6810_v31, %v6821_v42  ;;  %v5822_v47 = vpop.permute.xlu1 %5821 }
 0xda7   :  { %v5824_v32 = vunpack.i.h.bf16 %v5822_v47  ;;  %v5823_v39 = vunpack.i.l.bf16 %v5822_v47 }
 0xda8   :  { %5846 = vrot.lane.b32.xlu0 %v6825_v36, %s6148_s8 }
 0xda9   :  { %v6829_v35 = vpop.permute.xlu0 %2429  ;;  %v5580_v61 = vpack.c.bf16 %v5824_v32, %v5823_v39 }
 0xdaa   :  { %v6833_v44 = vpack.i.bf16 %v6819_v33, %v6829_v35 }
 0xdac   :  { %5861 = vrot.lane.b32.xlu0 %v5820_v54, %s6152_s12  ;;  %5851 = vrot.lane.b32.xlu1 %v6833_v44, %s6148_s8 }
 0xdad   :  { %v5817_v43 = vpop.permute.xlu0 %5816 }
 0xdae   :  { %v5819_v49 = vunpack.i.h.bf16 %v5817_v43  ;;  %v5818_v62 = vunpack.i.l.bf16 %v5817_v43 }
 0xdb0   :  { %v5574_v53 = vpack.c.bf16 %v5819_v49, %v5818_v62  ;;  %5856 = vrot.lane.b32.xlu1 %v5815_v3, %s6152_s12 }
 0xdb2   :  { %5576 = vmatprep.subr.msk.bf16.mxu0 %vm6336_vm3, %v5574_v53 }
 0xdb3   :  { %5579 = vmatpush3.bf16.xpose.msk.msra.mxu0 %vm6336_vm3, %v5574_v53 }
 0xdb4   :  { %5866 = vrot.lane.b32.xlu1 %v5830_v30, %s6152_s12  ;;  %5582 = vmatprep.subr.msk.bf16.mxu0 %vm6336_vm3, %v5580_v61 }
 0xdb8   :  { %5871 = vrot.lane.b32.xlu1 %v5825_v27, %s6152_s12 }
 0xdba   :  { %5294 = vmatmul.mubr.msk.f32.vlgmr.msra.gmra.mrb[28].mxu0 %vm40_vm1, %v2394_v2 }
 0xdbb   :  { %5585 = vmatpush3.bf16.xpose.msk.msra.mxu0 %vm6336_vm3, %v5580_v61  ;;  %5300 = vmatprep.mubr.msk.f32.mxu0 %vm40_vm1, %v6773_v15 }
 0xdc2   :  { %5301 = vmatmul.mubr.msk.f32.vlgmr.msra.gmra.mrb[30].mxu0 %vm40_vm1, %v2402_v10 }
 0xdc3   :  { %5307 = vmatprep.mubr.msk.f32.mxu0 %vm40_vm1, %v2410_v56 }
 0xe0a   :  { %v5827_v51 = vpop.permute.xlu0 %5826 }
 0xe0b   :  { %v5829_v57 = vunpack.i.h.bf16 %v5827_v51  ;;  %v5828_v60 = vunpack.i.l.bf16 %v5827_v51 }
 0xe0d   :  { %v5586_v6 = vpack.c.bf16 %v5829_v57, %v5828_v60 }
 0xe0e   :  { %v5832_v59 = vpop.permute.xlu1 %5831 }
 0xe0f   :  { %v5834_v11 = vunpack.i.h.bf16 %v5832_v59  ;;  %v5833_v19 = vunpack.i.l.bf16 %v5832_v59  ;;  %5588 = vmatprep.subr.msk.bf16.mxu0 %vm6336_vm3, %v5586_v6 }
 0xe10   :  { %5591 = vmatpush3.bf16.xpose.msk.msra.mxu0 %vm6336_vm3, %v5586_v6 }
 0xe11   :  { %v5592_v8 = vpack.c.bf16 %v5834_v11, %v5833_v19 }
 0xe12   :  { %v5837_v46 = vpop.permute.xlu0 %5836 }
 0xe13   :  { %v5839_v24 = vunpack.i.h.bf16 %v5837_v46  ;;  %v5838_v20 = vunpack.i.l.bf16 %v5837_v46  ;;  %5594 = vmatprep.subr.msk.bf16.mxu1 %vm6336_vm3, %v5592_v8 }
 0xe14   :  { %5597 = vmatpush3.bf16.xpose.msk.msra.mxu1 %vm6336_vm3, %v5592_v8 }
 0xe15   :  { %v5598_v22 = vpack.c.bf16 %v5839_v24, %v5838_v20 }
 0xe16   :  { %v5842_v29 = vpop.permute.xlu1 %5841 }
 0xe17   :  { %v5844_v50 = vunpack.i.h.bf16 %v5842_v29  ;;  %v5843_v15 = vunpack.i.l.bf16 %v5842_v29  ;;  %5308 = vmatmul.mubr.msk.f32.vlgmr.msra.gmra.mrb[32].mxu0 %vm40_vm1, %v2412_v4  ;;  %5600 = vmatprep.subr.msk.bf16.mxu0 %vm6336_vm3, %v5598_v22 }
 0xe18   :  { %5603 = vmatpush3.bf16.xpose.msk.msra.mxu0 %vm6336_vm3, %v5598_v22  ;;  %5321 = vmatprep.mubr.msk.f32.mxu0 %vm40_vm1, %v2418_v28 }
 0xe19   :  { %v5604_v23 = vpack.c.bf16 %v5844_v50, %v5843_v15 }
 0xe1a   :  { %v5847_v58 = vpop.permute.xlu0 %5846 }
 0xe1b   :  { %v5849_v55 = vunpack.i.h.bf16 %v5847_v58  ;;  %v5848_v63 = vunpack.i.l.bf16 %v5847_v58  ;;  %5315 = vmatmul.mubr.msk.f32.vlgmr.msra.gmra.mrb[18].mxu1 %vm40_vm1, %v6801_v18  ;;  %5606 = vmatprep.subr.msk.bf16.mxu1 %vm6336_vm3, %v5604_v23 }
 0xe1c   :  { %5609 = vmatpush3.bf16.xpose.msk.msra.mxu1 %vm6336_vm3, %v5604_v23  ;;  %5328 = vmatprep.mubr.msk.f32.mxu1 %vm40_vm1, %v2422_v38 }
 0xe1d   :  { %v5610_v2 = vpack.c.bf16 %v5849_v55, %v5848_v63 }
 0xe1e   :  { %v5852_v10 = vpop.permute.xlu1 %5851  ;;  %v5862_v17 = vpop.permute.xlu0 %5861 }
 0xe1f   :  { %v5854_v54 = vunpack.i.h.bf16 %v5852_v10  ;;  %v5853_v3 = vunpack.i.l.bf16 %v5852_v10  ;;  %5322 = vmatmul.mubr.msk.f32.vlgmr.msra.gmra.mrb[34].mxu0 %vm40_vm1, %v6798_v16  ;;  %5612 = vmatprep.subr.msk.bf16.mxu0 %vm6336_vm3, %v5610_v2  ;;  %v5864_v27 = vunpack.i.h.bf16 %v5862_v17  ;;  %v5863_v18 = vunpack.i.l.bf16 %v5862_v17 }
 0xe20   :  { %5615 = vmatpush3.bf16.xpose.msk.msra.mxu0 %vm6336_vm3, %v5610_v2  ;;  %5335 = vmatprep.mubr.msk.f32.mxu0 %vm40_vm1, %v6821_v42 }
 0xe21   :  { %v5616_v56 = vpack.c.bf16 %v5854_v54, %v5853_v3  ;;  %v6893_v42 = vpack.c.bf16 %v5864_v27, %v5863_v18 }
 0xe22   :  { %v5857_v4 = vpop.permute.xlu1 %5856 }
 0xe23   :  { %v5859_v30 = vunpack.i.h.bf16 %v5857_v4  ;;  %v5858_v28 = vunpack.i.l.bf16 %v5857_v4  ;;  %5329 = vmatmul.mubr.msk.f32.vlgmr.msra.gmra.mrb[28].mxu1 %vm40_vm1, %v6804_v21  ;;  %5618 = vmatprep.subr.msk.bf16.mxu1 %vm6336_vm3, %v5616_v56 }
 0xe24   :  { %5621 = vmatpush3.bf16.xpose.msk.msra.mxu1 %vm6336_vm3, %v5616_v56  ;;  %5342 = vmatprep.mubr.msk.f32.mxu1 %vm40_vm1, %v6829_v35 }
 0xe25   :  { %v5622_v16 = vpack.c.bf16 %v5859_v30, %v5858_v28 }
 0xe26   :  { %v6891_v38 = vpop.permute.xlu1 %5866 }
 0xe27   :  { %5336 = vmatmul.mubr.msk.f32.vlgmr.msra.gmra.mrb[36].mxu0 %vm40_vm1, %v6810_v31  ;;  %5623 = vmatprep.subr.bf16.mxu0 %v5622_v16 }
 0xe28   :  { %5625 = vmatpush3.bf16.msra.mxu0 %v5622_v16 }
 0xe29   :  { %5627 = vmatprep.subr.bf16.mxu0 %v6893_v42 }
 0xe2a   :  { %v5872_v21 = vpop.permute.xlu1 %5871 }
 0xe2b   :  { %v5874_v47 = vunpack.i.h.bf16 %v5872_v21  ;;  %v5873_v43 = vunpack.i.l.bf16 %v5872_v21  ;;  %5343 = vmatmul.mubr.msk.f32.vlgmr.msra.gmra.mrb[30].mxu1 %vm40_vm1, %v6819_v33 }
 0xe2d   :  { %v5630_v9 = vpack.c.bf16 %v5874_v47, %v5873_v43 }
 0xe2f   :  { %5631 = vmatprep.subr.bf16.mxu1 %v5630_v9 }
 0xe30   :  { %5633 = vmatpush3.bf16.msra.mxu1 %v5630_v9 }
 0xe8d   :  { %v5295_v35 = vpop.f32.mrb[28].mxu0 }
 0xe8e   :  { %v3130_v32 = vmul.f32 0.35355338, %v5295_v35  ;;  %v2511_v39 = vpop.f32.mrb[29].mxu0 }
 0xe8f   :  { %v3129_v49 = vmul.f32 0.35355338, %v2511_v39 }
 0xe90   :  { %v6901_v62 = vadd.f32 %v3130_v32, %v6394_v41 }
 0xe91   :  { %v6904_v31 = vadd.f32 %v3129_v49, %v6384_v37 }
 0xe92   :  { %v3164_v53 = vsel %vm991_vm4, %v6901_v62, -inf }
 0xe93   :  { %3165 = vmax.xlane.f32.xlu1 %v3164_v53  ;;  %v3161_v33 = vsel %vm991_vm4, %v6904_v31, -inf }
 0xe94   :  { %3162 = vmax.xlane.f32.xlu0 %v3161_v33 }
 0xe95   :  { %v5302_v61 = vpop.f32.mrb[30].mxu0 }
 0xe96   :  { %v3132_v51 = vmul.f32 0.35355338, %v5302_v61  ;;  %v2598_v57 = vpop.f32.mrb[31].mxu0 }
 0xe97   :  { %v3131_v60 = vmul.f32 0.35355338, %v2598_v57 }
 0xe98   :  { %v6911_v6 = vadd.f32 %v3132_v51, %v6394_v41 }
 0xe99   :  { %v6914_v59 = vadd.f32 %v3131_v60, %v6384_v37 }
 0xe9a   :  { %v3170_v11 = vsel %vm991_vm4, %v6911_v6, -inf }
 0xe9b   :  { %3171 = vmax.xlane.f32.xlu0 %v3170_v11  ;;  %v3167_v19 = vsel %vm991_vm4, %v6914_v59, -inf }
 0xe9f   :  { %3168 = vmax.xlane.f32.xlu0 %v3167_v19 }
 0xeea   :  { %v5309_v8 = vpop.f32.mrb[32].mxu0 }
 0xeeb   :  { %v2685_v46 = vpop.f32.mrb[33].mxu0  ;;  %v3134_v20 = vmul.f32 0.35355338, %v5309_v8 }
 0xeec   :  { %v3133_v50 = vmul.f32 0.35355338, %v2685_v46 }
 0xeed   :  { %v6927_v63 = vadd.f32 %v3134_v20, %v6394_v41 }
 0xeee   :  { %v5316_v24 = vpop.f32.mrb[18].mxu1  ;;  %v6932_v54 = vadd.f32 %v3133_v50, %v6384_v37 }
 0xeef   :  { %v3136_v22 = vmul.f32 0.35355338, %v5316_v24  ;;  %v2772_v29 = vpop.f32.mrb[19].mxu1  ;;  %v3176_v18 = vsel %vm991_vm4, %v6927_v63, -inf }
 0xef0   :  { %v3135_v15 = vmul.f32 0.35355338, %v2772_v29  ;;  %v3173_v16 = vsel %vm991_vm4, %v6932_v54, -inf }
 0xef1   :  { %v6921_v23 = vadd.f32 %v3136_v22, %v6394_v41 }
 0xef2   :  { %v6924_v58 = vadd.f32 %v3135_v15, %v6384_v37  ;;  %v5323_v55 = vpop.f32.mrb[34].mxu0 }
 0xef3   :  { %v2859_v2 = vpop.f32.mrb[35].mxu0  ;;  %v3182_v10 = vsel %vm991_vm4, %v6921_v23, -inf  ;;  %v3138_v56 = vmul.f32 0.35355338, %v5323_v55 }
 0xef4   :  { %3183 = vmax.xlane.f32.xlu0 %v3182_v10  ;;  %v3179_v3 = vsel %vm991_vm4, %v6924_v58, -inf  ;;  %v3137_v30 = vmul.f32 0.35355338, %v2859_v2 }
 0xef5   :  { %3180 = vmax.xlane.f32.xlu1 %v3179_v3  ;;  %v6947_v9 = vadd.f32 %v3138_v56, %v6394_v41 }
 0xef6   :  { %v5330_v17 = vpop.f32.mrb[28].mxu1  ;;  %v6952_v39 = vadd.f32 %v3137_v30, %v6384_v37 }
 0xef7   :  { %v3140_v4 = vmul.f32 0.35355338, %v5330_v17  ;;  %v2946_v27 = vpop.f32.mrb[29].mxu1  ;;  %v3188_v57 = vsel %vm991_vm4, %v6947_v9, -inf }
 0xef8   :  { %v3139_v28 = vmul.f32 0.35355338, %v2946_v27  ;;  %3177 = vmax.xlane.f32.xlu0 %v3176_v18  ;;  %v3185_v19 = vsel %vm991_vm4, %v6952_v39, -inf }
 0xef9   :  { %v6941_v21 = vadd.f32 %v3140_v4, %v6394_v41  ;;  %3174 = vmax.xlane.f32.xlu1 %v3173_v16 }
 0xefa   :  { %v6944_v47 = vadd.f32 %v3139_v28, %v6384_v37  ;;  %v5337_v43 = vpop.f32.mrb[36].mxu0 }
 0xefb   :  { %v3033_v35 = vpop.f32.mrb[37].mxu0  ;;  %v3194_v32 = vsel %vm991_vm4, %v6941_v21, -inf  ;;  %v3142_v33 = vmul.f32 0.35355338, %v5337_v43 }
 0xefc   :  { %3195 = vmax.xlane.f32.xlu0 %v3194_v32  ;;  %v3191_v49 = vsel %vm991_vm4, %v6944_v47, -inf  ;;  %v3141_v60 = vmul.f32 0.35355338, %v3033_v35 }
 0xefd   :  { %3192 = vmax.xlane.f32.xlu1 %v3191_v49  ;;  %v6967_v24 = vadd.f32 %v3142_v33, %v6394_v41 }
 0xefe   :  { %v5344_v53 = vpop.f32.mrb[30].mxu1  ;;  %v6972_v22 = vadd.f32 %v3141_v60, %v6384_v37 }
 0xeff   :  { %v3144_v61 = vmul.f32 0.35355338, %v5344_v53  ;;  %v3120_v51 = vpop.f32.mrb[31].mxu1  ;;  %v3200_v50 = vsel %vm991_vm4, %v6967_v24, -inf }
 0xf00   :  { %v3143_v11 = vmul.f32 0.35355338, %v3120_v51  ;;  %3189 = vmax.xlane.f32.xlu0 %v3188_v57  ;;  %v3197_v15 = vsel %vm991_vm4, %v6972_v22, -inf }
 0xf01   :  { %v6961_v8 = vadd.f32 %v3144_v61, %v6394_v41  ;;  %3186 = vmax.xlane.f32.xlu1 %v3185_v19 }
 0xf02   :  { %v6964_v46 = vadd.f32 %v3143_v11, %v6384_v37 }
 0xf03   :  { %v3206_v20 = vsel %vm991_vm4, %v6961_v8, -inf }
 0xf04   :  { %3207 = vmax.xlane.f32.xlu0 %v3206_v20  ;;  %v3203_v29 = vsel %vm991_vm4, %v6964_v46, -inf }
 0xf05   :  { %3204 = vmax.xlane.f32.xlu1 %v3203_v29 }
 0xf08   :  { %3201 = vmax.xlane.f32.xlu0 %v3200_v50 }
 0xf09   :  { %3198 = vmax.xlane.f32.xlu1 %v3197_v15 }
 0xf1a   :  { %5881 = vrot.lane.b32.xlu1 %v6815_v26, %s6152_s12 }
 0xf1e   :  { %5876 = vrot.lane.b32.xlu0 %v6808_v34, %s6152_s12 }
 0xf20   :  { %v3166_v37 = vpop.xlane.xlu1 %3165 }
 0xf21   :  { %v3163_v41 = vpop.xlane.xlu0 %3162  ;;  %v3210_v55 = vsub.f32 %v6901_v62, %v3166_v37 }
 0xf22   :  { %v3209_v2 = vsub.f32 %v6904_v31, %v3163_v41 }
 0xf23   :  { %v3227_v3 = vmul.f32 1.442695, %v3210_v55 }
 0xf24   :  { %v3225_v56 = vmul.f32 1.442695, %v3209_v2 }
 0xf25   :  { %6033 = vpow2.f32 %v3227_v3 }
 0xf26   :  { %6035 = vpow2.f32 %v3225_v56 }
 0xf28   :  { %v3172_v10 = vpop.xlane.xlu0 %3171 }
 0xf29   :  { %v3212_v17 = vsub.f32 %v6911_v6, %v3172_v10 }
 0xf2b   :  { %v3231_v18 = vmul.f32 1.442695, %v3212_v17 }
 0xf2c   :  { %v3169_v4 = vpop.xlane.xlu0 %3168 }
 0xf2d   :  { %v3211_v27 = vsub.f32 %v6914_v59, %v3169_v4  ;;  %6037 = vpow2.f32 %v3231_v18 }
 0xf2f   :  { %v3229_v26 = vmul.f32 1.442695, %v3211_v27  ;;  %v6988_v34 = vpop.eup %6033 }
 0xf30   :  { %v6990_v30 = vpop.eup %6035  ;;  %v3260_v62 = vsel %vm991_vm4, %v6988_v34, 0.0 }
 0xf31   :  { %6039 = vpow2.f32 %v3229_v26  ;;  %v3257_v6 = vsel %vm991_vm4, %v6990_v30, 0.0 }
 0xf37   :  { %v6994_v31 = vpop.eup %6037 }
 0xf38   :  { %v3266_v28 = vsel %vm991_vm4, %v6994_v31, 0.0 }
 0xf3b   :  { %v6998_v59 = vpop.eup %6039 }
 0xf3c   :  { %v3263_v16 = vsel %vm991_vm4, %v6998_v59, 0.0 }
 0xf3d   :  { %3261 = vadd.xlane.f32.xlu0 %v3260_v62 }
 0xf3e   :  { %3258 = vadd.xlane.f32.xlu1 %v3257_v6 }
 0xf41   :  { %3267 = vadd.xlane.f32.xlu0 %v3266_v28 }
 0xf42   :  { %3264 = vadd.xlane.f32.xlu1 %v3263_v16 }
 0xf81   :  { %v3184_v43 = vpop.xlane.xlu0 %3183 }
 0xf82   :  { %v3216_v35 = vsub.f32 %v6921_v23, %v3184_v43  ;;  %v3181_v32 = vpop.xlane.xlu1 %3180 }
 0xf83   :  { %v3215_v49 = vsub.f32 %v6924_v58, %v3181_v32 }
 0xf84   :  { %v3239_v53 = vmul.f32 1.442695, %v3216_v35 }
 0xf85   :  { %v3237_v33 = vmul.f32 1.442695, %v3215_v49  ;;  %v3178_v61 = vpop.xlane.xlu0 %3177 }
 0xf86   :  { %6041 = vpow2.f32 %v3239_v53  ;;  %v3214_v51 = vsub.f32 %v6927_v63, %v3178_v61  ;;  %v3175_v57 = vpop.xlane.xlu1 %3174 }
 0xf87   :  { %6043 = vpow2.f32 %v3237_v33  ;;  %v3213_v60 = vsub.f32 %v6932_v54, %v3175_v57 }
 0xf88   :  { %v3235_v11 = vmul.f32 1.442695, %v3214_v51 }
 0xf89   :  { %v3233_v19 = vmul.f32 1.442695, %v3213_v60  ;;  %v3196_v20 = vpop.xlane.xlu0 %3195 }
 0xf8a   :  { %6045 = vpow2.f32 %v3235_v11  ;;  %v3220_v29 = vsub.f32 %v6941_v21, %v3196_v20  ;;  %v3193_v23 = vpop.xlane.xlu1 %3192 }
 0xf8b   :  { %6047 = vpow2.f32 %v3233_v19  ;;  %v3219_v58 = vsub.f32 %v6944_v47, %v3193_v23 }
 0xf8c   :  { %v3247_v50 = vmul.f32 1.442695, %v3220_v29 }
 0xf8d   :  { %v3245_v15 = vmul.f32 1.442695, %v3219_v58  ;;  %v3190_v37 = vpop.xlane.xlu0 %3189 }
 0xf8e   :  { %6049 = vpow2.f32 %v3247_v50  ;;  %v3218_v63 = vsub.f32 %v6947_v9, %v3190_v37  ;;  %v3187_v41 = vpop.xlane.xlu1 %3186 }
 0xf8f   :  { %6051 = vpow2.f32 %v3245_v15  ;;  %v3217_v54 = vsub.f32 %v6952_v39, %v3187_v41 }
 0xf90   :  { %v7012_v55 = vpop.eup %6041  ;;  %v3243_v2 = vmul.f32 1.442695, %v3218_v63 }
 0xf91   :  { %v7014_v10 = vpop.eup %6043  ;;  %v3241_v21 = vmul.f32 1.442695, %v3217_v54  ;;  %v3208_v3 = vpop.xlane.xlu0 %3207  ;;  %v3278_v47 = vsel %vm991_vm4, %v7012_v55, 0.0 }
 0xf92   :  { %6053 = vpow2.f32 %v3243_v2  ;;  %v3224_v17 = vsub.f32 %v6961_v8, %v3208_v3  ;;  %v3205_v56 = vpop.xlane.xlu1 %3204  ;;  %3279 = vadd.xlane.f32.xlu0 %v3278_v47  ;;  %v3275_v9 = vsel %vm991_vm4, %v7014_v10, 0.0 }
 0xf93   :  { %6055 = vpow2.f32 %v3241_v21  ;;  %v3223_v39 = vsub.f32 %v6964_v46, %v3205_v56  ;;  %3276 = vadd.xlane.f32.xlu1 %v3275_v9  ;;  %v5869_v56 = vunpack.i.h.bf16 %v6891_v38 }
 0xf94   :  { %v7022_v4 = vpop.eup %6045  ;;  %v3255_v27 = vmul.f32 1.442695, %v3224_v17 }
 0xf95   :  { %v7024_v18 = vpop.eup %6047  ;;  %v3253_v26 = vmul.f32 1.442695, %v3223_v39  ;;  %v3202_v62 = vpop.xlane.xlu0 %3201  ;;  %v3272_v6 = vsel %vm991_vm4, %v7022_v4, 0.0 }
 0xf96   :  { %6057 = vpow2.f32 %v3255_v27  ;;  %v3222_v8 = vsub.f32 %v6967_v24, %v3202_v62  ;;  %3273 = vadd.xlane.f32.xlu0 %v3272_v6  ;;  %v3199_v28 = vpop.xlane.xlu1 %3198  ;;  %v3269_v16 = vsel %vm991_vm4, %v7024_v18, 0.0 }
 0xf97   :  { %6059 = vpow2.f32 %v3253_v26  ;;  %v3221_v46 = vsub.f32 %v6972_v22, %v3199_v28  ;;  %3270 = vadd.xlane.f32.xlu1 %v3269_v16 }
 0xf98   :  { %v7032_v43 = vpop.eup %6049  ;;  %v3251_v35 = vmul.f32 1.442695, %v3222_v8 }
 0xf99   :  { %v7034_v32 = vpop.eup %6051  ;;  %v3249_v49 = vmul.f32 1.442695, %v3221_v46  ;;  %v5877_v53 = vpop.permute.xlu0 %5876  ;;  %v3290_v33 = vsel %vm991_vm4, %v7032_v43, 0.0 }
 0xf9a   :  { %6061 = vpow2.f32 %v3251_v35  ;;  %v5879_v24 = vunpack.i.h.bf16 %v5877_v53  ;;  %v5878_v61 = vunpack.i.l.bf16 %v5877_v53  ;;  %3291 = vadd.xlane.f32.xlu0 %v3290_v33  ;;  %v3287_v51 = vsel %vm991_vm4, %v7034_v32, 0.0  ;;  %v5882_v41 = vpop.permute.xlu1 %5881 }
 0xf9b   :  { %6063 = vpow2.f32 %v3249_v49  ;;  %3288 = vadd.xlane.f32.xlu1 %v3287_v51  ;;  %v5884_v26 = vunpack.i.h.bf16 %v5882_v41  ;;  %v5883_v62 = vunpack.i.l.bf16 %v5882_v41 }
 0xf9c   :  { %v7040_v22 = vpop.eup %6053  ;;  %v7042_v57 = vpack.c.bf16 %v5879_v24, %v5878_v61 }
 0xf9d   :  { %v7044_v60 = vpop.eup %6055  ;;  %v3284_v11 = vsel %vm991_vm4, %v7040_v22, 0.0 }
 0xf9e   :  { %3285 = vadd.xlane.f32.xlu0 %v3284_v11  ;;  %5639 = vmatprep.subr.bf16.mxu1 %v7042_v57  ;;  %v3281_v19 = vsel %vm991_vm4, %v7044_v60, 0.0 }
 0xf9f   :  { %3282 = vadd.xlane.f32.xlu1 %v3281_v19 }
 0xfa0   :  { %v7051_v20 = vpop.eup %6057 }
 0xfa1   :  { %v7053_v29 = vpop.eup %6059  ;;  %v3302_v23 = vsel %vm991_vm4, %v7051_v20, 0.0 }
 0xfa2   :  { %3303 = vadd.xlane.f32.xlu0 %v3302_v23  ;;  %v3299_v58 = vsel %vm991_vm4, %v7053_v29, 0.0 }
 0xfa3   :  { %3300 = vadd.xlane.f32.xlu1 %v3299_v58 }
 0xfa4   :  { %v7059_v50 = vpop.eup %6061 }
 0xfa5   :  { %v7061_v15 = vpop.eup %6063  ;;  %v3296_v37 = vsel %vm991_vm4, %v7059_v50, 0.0 }
 0xfa6   :  { %3297 = vadd.xlane.f32.xlu0 %v3296_v37  ;;  %v3293_v63 = vsel %vm991_vm4, %v7061_v15, 0.0 }
 0xfa7   :  { %3294 = vadd.xlane.f32.xlu1 %v3293_v63 }
 0xfb8   :  { %5891 = vrot.lane.b32.xlu1 %v6833_v44, %s6152_s12  ;;  %v5868_v44 = vunpack.i.l.bf16 %v6891_v38  ;;  %v5642_v38 = vpack.c.bf16 %v5884_v26, %v5883_v62 }
 0xfba   :  { %v5634_v27 = vpack.c.bf16 %v5869_v56, %v5868_v44 }
 0xfbc   :  { %5886 = vrot.lane.b32.xlu0 %v6825_v36, %s6152_s12 }
 0xfc0   :  { %4095 = vrot.lane.b32.xlu0 %v6747_v25, %s6153_s13 }
 0xfca   :  { %v3262_v54 = vpop.xlane.xlu0 %3261 }
 0xfcb   :  { %6065 = vrcp.f32 %v3262_v54  ;;  %v3259_v2 = vpop.xlane.xlu1 %3258 }
 0xfcc   :  { %6067 = vrcp.f32 %v3259_v2 }
 0xfce   :  { %v3268_v21 = vpop.xlane.xlu0 %3267 }
 0xfcf   :  { %6069 = vrcp.f32 %v3268_v21  ;;  %v3265_v3 = vpop.xlane.xlu1 %3264 }
 0xfd0   :  { %6071 = vrcp.f32 %v3265_v3 }
 0xfd5   :  { %v6066_v47 = vpop.eup %6065 }
 0xfd6   :  { %v6068_v17 = vpop.eup %6067  ;;  %v3322_v9 = vmul.f32 %v6066_v47, %v6988_v34 }
 0xfd7   :  { %v3321_v36 = vmul.f32 %v6068_v17, %v6990_v30 }
 0xfd9   :  { %v6070_v25 = vpop.eup %6069  ;;  %5349 = vmatprep.mubr.msk.f32.mxu0 %vm991_vm4, %v3321_v36 }
 0xfda   :  { %v6072_v39 = vpop.eup %6071  ;;  %5350 = vmatmul.mubr.msk.f32.vlgmr.msra.gmra.mrb[38].mxu0 %vm991_vm4, %v3322_v9  ;;  %v3324_v8 = vmul.f32 %v6070_v25, %v6994_v31 }
 0xfdb   :  { %5629 = vmatpush3.bf16.msra.mxu0 %v6893_v42  ;;  %v3323_v6 = vmul.f32 %v6072_v39, %v6998_v59 }
 0xfdc   :  { %5635 = vmatprep.subr.bf16.mxu0 %v5634_v27 }
 0xfdd   :  { %5356 = vmatprep.mubr.msk.f32.mxu0 %vm991_vm4, %v3323_v6 }
 0xfde   :  { %5357 = vmatmul.mubr.msk.f32.vlgmr.msra.gmra.mrb[40].mxu0 %vm991_vm4, %v3324_v8 }
 0xfdf   :  { %5637 = vmatpush3.bf16.msra.mxu0 %v5634_v27 }
 0xfe0   :  { %5643 = vmatprep.subr.bf16.mxu0 %v5642_v38 }
0x101f   :  { %v3280_v34 = vpop.xlane.xlu0 %3279 }
0x1020   :  { %6073 = vrcp.f32 %v3280_v34  ;;  %v3277_v30 = vpop.xlane.xlu1 %3276 }
0x1021   :  { %6075 = vrcp.f32 %v3277_v30 }
0x1023   :  { %v3274_v28 = vpop.xlane.xlu0 %3273 }
0x1024   :  { %6077 = vrcp.f32 %v3274_v28  ;;  %v3271_v16 = vpop.xlane.xlu1 %3270 }
0x1025   :  { %6079 = vrcp.f32 %v3271_v16 }
0x1027   :  { %v3292_v42 = vpop.xlane.xlu0 %3291 }
0x1028   :  { %6081 = vrcp.f32 %v3292_v42  ;;  %v3289_v59 = vpop.xlane.xlu1 %3288 }
0x1029   :  { %6083 = vrcp.f32 %v3289_v59 }
0x102a   :  { %v6074_v31 = vpop.eup %6073 }
0x102b   :  { %v6076_v46 = vpop.eup %6075  ;;  %v3286_v35 = vpop.xlane.xlu0 %3285  ;;  %v3328_v33 = vmul.f32 %v6074_v31, %v7012_v55 }
0x102c   :  { %6085 = vrcp.f32 %v3286_v35  ;;  %v3283_v49 = vpop.xlane.xlu1 %3282  ;;  %v3327_v53 = vmul.f32 %v6076_v46, %v7014_v10  ;;  %v6115_v35 = vld [vmem:[%s7253_s1 + $0x30] ss:$8 sps:$4 sm:$0xff]  }
0x102d   :  { %6087 = vrcp.f32 %v3283_v49 }
0x102e   :  { %v6078_v24 = vpop.eup %6077  ;;  %5370 = vmatprep.mubr.msk.f32.mxu0 %vm991_vm4, %v3327_v53 }
0x102f   :  { %v6080_v61 = vpop.eup %6079  ;;  %v3304_v51 = vpop.xlane.xlu0 %3303  ;;  %5371 = vmatmul.mubr.msk.f32.vlgmr.msra.gmra.mrb[42].mxu0 %vm991_vm4, %v3328_v33  ;;  %v3326_v23 = vmul.f32 %v6078_v24, %v7022_v4 }
0x1030   :  { %5645 = vmatpush3.bf16.msra.mxu0 %v5642_v38  ;;  %v3301_v11 = vpop.xlane.xlu1 %3300  ;;  %v3325_v19 = vmul.f32 %v6080_v61, %v7024_v18 }
0x1031   :  { %6089 = vrcp.f32 %v3301_v11 }
0x1032   :  { %v6082_v58 = vpop.eup %6081  ;;  %6091 = vrcp.f32 %v3304_v51  ;;  %5363 = vmatprep.mubr.msk.f32.mxu1 %vm991_vm4, %v3325_v19 }
0x1033   :  { %v6084_v55 = vpop.eup %6083  ;;  %v3298_v10 = vpop.xlane.xlu0 %3297  ;;  %5364 = vmatmul.mubr.msk.f32.vlgmr.msra.gmra.mrb[32].mxu1 %vm991_vm4, %v3326_v23  ;;  %v3332_v41 = vmul.f32 %v6082_v58, %v7032_v43 }
0x1034   :  { %6093 = vrcp.f32 %v3298_v10  ;;  %5641 = vmatpush3.bf16.msra.mxu1 %v7042_v57  ;;  %v3295_v37 = vpop.xlane.xlu1 %3294  ;;  %v3331_v63 = vmul.f32 %v6084_v55, %v7034_v32 }
0x1035   :  { %6095 = vrcp.f32 %v3295_v37 }
0x1036   :  { %v6086_v18 = vpop.eup %6085  ;;  %5384 = vmatprep.mubr.msk.f32.mxu0 %vm991_vm4, %v3331_v63 }
0x1037   :  { %v6088_v4 = vpop.eup %6087  ;;  %v5887_v54 = vpop.permute.xlu0 %5886  ;;  %5385 = vmatmul.mubr.msk.f32.vlgmr.msra.gmra.mrb[44].mxu0 %vm991_vm4, %v3332_v41  ;;  %v3330_v57 = vmul.f32 %v6086_v18, %v7040_v22 }
0x1038   :  { %v5889_v2 = vunpack.i.h.bf16 %v5887_v54  ;;  %v5888_v21 = vunpack.i.l.bf16 %v5887_v54  ;;  %v5892_v3 = vpop.permute.xlu1 %5891  ;;  %v3329_v47 = vmul.f32 %v6088_v4, %v7044_v60 }
0x1039   :  { %v5894_v17 = vunpack.i.h.bf16 %v5892_v3  ;;  %v5893_v56 = vunpack.i.l.bf16 %v5892_v3 }
0x103a   :  { %v5646_v32 = vpack.c.bf16 %v5889_v2, %v5888_v21  ;;  %5377 = vmatprep.mubr.msk.f32.mxu1 %vm991_vm4, %v3329_v47 }
0x103b   :  { %v6090_v43 = vpop.eup %6089  ;;  %v5650_v44 = vpack.c.bf16 %v5894_v17, %v5893_v56  ;;  %5378 = vmatmul.mubr.msk.f32.vlgmr.msra.gmra.mrb[34].mxu1 %vm991_vm4, %v3330_v57 }
0x103c   :  { %v6092_v36 = vpop.eup %6091  ;;  %5647 = vmatprep.subr.bf16.mxu1 %v5646_v32  ;;  %v3335_v9 = vmul.f32 %v6090_v43, %v7053_v29  ;;  %v4096_v29 = vpop.permute.xlu0 %4095 }
0x103d   :  { %5649 = vmatpush3.bf16.msra.mxu1 %v5646_v32  ;;  %5651 = vmatprep.subr.bf16.mxu0 %v5650_v44  ;;  %v3336_v60 = vmul.f32 %v6092_v36, %v7051_v20 }
0x103e   :  { %v6094_v25 = vpop.eup %6093  ;;  %5653 = vmatpush3.bf16.msra.mxu0 %v5650_v44  ;;  %5398 = vmatprep.mubr.msk.f32.mxu0 %vm991_vm4, %v3335_v9 }
0x103f   :  { %v6096_v22 = vpop.eup %6095  ;;  %v3334_v27 = vmul.f32 %v6094_v25, %v7059_v50  ;;  %5401 = vmatprep.subr.bf16.mxu1 %v4096_v29 }
0x1040   :  { %v3333_v39 = vmul.f32 %v6096_v22, %v7061_v15 }
0x1041   :  { %5399 = vmatmul.mubr.msk.f32.vlgmr.msra.gmra.mrb[46].mxu0 %vm991_vm4, %v3336_v60 }
0x1042   :  { %5391 = vmatprep.mubr.msk.f32.mxu1 %vm991_vm4, %v3333_v39 }
0x1043   :  { %5392 = vmatmul.mubr.msk.f32.vlgmr.msra.gmra.mrb[36].mxu1 %vm991_vm4, %v3334_v27 }
0x1044   :  { %5402 = vmatpush3.bf16.msra.mxu1 %v4096_v29 }
0x10ad   :  { %v5351_v26 = vpop.f32.mrb[38].mxu0 }
0x10ae   :  { %v3415_v62 = vpop.f32.mrb[39].mxu0 }
0x10b1   :  { %v5358_v6 = vpop.f32.mrb[40].mxu0 }
0x10b2   :  { %v3502_v8 = vpop.f32.mrb[41].mxu0 }
0x1102   :  { %v5372_v38 = vpop.f32.mrb[42].mxu0 }
0x1103   :  { %v3676_v34 = vpop.f32.mrb[43].mxu0 }
0x1104   :  { %v5895_v20 = vpack.i.bf16 %v5372_v38, %v3676_v34 }
0x1106   :  { %5896 = vrot.lane.b32.xlu0 %v5895_v20, %s6144_s26  ;;  %v5365_v15 = vpop.f32.mrb[32].mxu1 }
0x1107   :  { %v3589_v50 = vpop.f32.mrb[33].mxu1 }
0x1108   :  { %v5900_v30 = vpack.i.bf16 %v5365_v15, %v3589_v50 }
0x110a   :  { %5901 = vrot.lane.b32.xlu1 %v5900_v30, %s6144_s26  ;;  %v5386_v28 = vpop.f32.mrb[44].mxu0 }
0x110b   :  { %v3850_v16 = vpop.f32.mrb[45].mxu0 }
0x110c   :  { %v5905_v42 = vpack.i.bf16 %v5386_v28, %v3850_v16 }
0x110e   :  { %v5379_v59 = vpop.f32.mrb[34].mxu1  ;;  %5906 = vrot.lane.b32.xlu0 %v5905_v42, %s6154_s14 }
0x110f   :  { %v3763_v31 = vpop.f32.mrb[35].mxu1 }
0x1110   :  { %v5910_v46 = vpack.i.bf16 %v5379_v59, %v3763_v31 }
0x1112   :  { %5911 = vrot.lane.b32.xlu1 %v5910_v46, %s6154_s14  ;;  %4097 = vrot.lane.b32.xlu0 %v6115_v35, %s6153_s13 }
0x1114   :  { %v5400_v49 = vpop.f32.mrb[46].mxu0 }
0x1115   :  { %v4024_v53 = vpop.f32.mrb[47].mxu0 }
0x1116   :  { %v5920_v33 = vpack.i.bf16 %v5400_v49, %v4024_v53  ;;  %v5393_v24 = vpop.f32.mrb[36].mxu1  ;;  %4102 = vrot.lane.b32.xlu0 %v6770_v1, %s6153_s13 }
0x1117   :  { %v3937_v61 = vpop.f32.mrb[37].mxu1 }
0x1118   :  { %v5915_v51 = vpack.i.bf16 %v5393_v24, %v3937_v61 }
0x111a   :  { %5916 = vrot.lane.b32.xlu1 %v5915_v51, %s6155_s17 }
0x111e   :  { %5921 = vrot.lane.b32.xlu1 %v5920_v33, %s6155_s17 }
0x1178   :  { %v5897_v11 = vpop.permute.xlu0 %5896 }
0x1179   :  { %v5899_v18 = vunpack.i.h.bf16 %v5897_v11  ;;  %v5898_v4 = vunpack.i.l.bf16 %v5897_v11 }
0x117b   :  { %v4084_v9 = vsel %vm40_vm1, %v5358_v6, %v5899_v18  ;;  %v4083_v25 = vsel %vm40_vm1, %v3502_v8, %v5898_v4 }
0x117c   :  { %v5902_v23 = vpop.permute.xlu1 %5901 }
0x117d   :  { %v5904_v10 = vunpack.i.h.bf16 %v5902_v23  ;;  %v5903_v37 = vunpack.i.l.bf16 %v5902_v23 }
0x117f   :  { %v4082_v54 = vsel %vm40_vm1, %v5351_v26, %v5904_v10  ;;  %v4081_v2 = vsel %vm40_vm1, %v3415_v62, %v5903_v37 }
0x1180   :  { %v5907_v19 = vpop.permute.xlu0 %5906 }
0x1181   :  { %v5909_v47 = vunpack.i.h.bf16 %v5907_v19  ;;  %v5908_v57 = vunpack.i.l.bf16 %v5907_v19 }
0x1183   :  { %v4088_v39 = vsel %vm991_vm4, %v4084_v9, %v5909_v47  ;;  %v4087_v27 = vsel %vm991_vm4, %v4083_v25, %v5908_v57  ;;  %v5944_v47 = vld [vmem:[%s7253_s1 + $0x34] ss:$8 sps:$4 sm:$0xff]   ;;  %v5945_v57 = vld [vmem:[%s7254_s2 + $0x40] sm:$0xff]  }
0x1184   :  { %v4098_v58 = vpop.permute.xlu0 %4097  ;;  %v5912_v55 = vpop.permute.xlu1 %5911 }
0x1185   :  { %5403 = vmatprep.subr.bf16.mxu1 %v4098_v58  ;;  %v5914_v63 = vunpack.i.h.bf16 %v5912_v55  ;;  %v5913_v41 = vunpack.i.l.bf16 %v5912_v55 }
0x1186   :  { %5404 = vmatpush3.bf16.msra.mxu1 %v4098_v58 }
0x1187   :  { %v4085_v17 = vsel %vm991_vm4, %v4081_v2, %v5913_v41  ;;  %v4086_v56 = vsel %vm991_vm4, %v4082_v54, %v5914_v63  ;;  %v4218_v54 = vsub.s32 6, %v6205_v5  ;;  %v7160_v2 = vld [vmem:[#allocation2 + $0x10] sm:$0xff]  ;;  %5417 = vmatprep.subr.bf16.mxu1 %v5945_v57 }
0x1188   :  { %v4103_v38 = vpop.permute.xlu0 %4102 }
0x118c   :  { %v5917_v1 = vpop.permute.xlu1 %5916 }
0x118d   :  { %v5919_v21 = vunpack.i.h.bf16 %v5917_v1  ;;  %v5918_v3 = vunpack.i.l.bf16 %v5917_v1 }
0x118f   :  { %v4089_v32 = vsel %vm1920_vm5, %v4085_v17, %v5918_v3  ;;  %v4090_v43 = vsel %vm1920_vm5, %v4086_v56, %v5919_v21  ;;  %v7163_v21 = vrot.slane %v7160_v2, %v4218_v54  ;;  %v5943_v3 = vld [vmem:[%s7253_s1 + $0x24] ss:$8 sps:$4 sm:$0xff]   ;;  %v5947_v56 = vld [vmem:[%s7254_s2 + $0x50] sm:$0xff]  }
0x1190   :  { %v4093_v44 = vpack.c.bf16 %v4090_v43, %v4089_v32  ;;  %v5922_v36 = vpop.permute.xlu1 %5921  ;;  %5409 = vmatprep.subr.bf16.mxu0 %v5943_v3  ;;  %v5946_v17 = vld [vmem:[%s7254_s2 + $0x48] sm:$0xff]   ;;  %v5948_v32 = vld [vmem:[%s7254_s2 + $0x58] sm:$0xff]   ;;  %v5949_v43 = vld [vmem:[%s7254_s2 + $0x60] sm:$0xff]  }
0x1191   :  { %v5924_v22 = vunpack.i.h.bf16 %v5922_v36  ;;  %v5923_v60 = vunpack.i.l.bf16 %v5922_v36  ;;  %5410 = vmatpush3.bf16.msra.mxu0 %v5943_v3 }
0x1192   :  { %5405 = vmatprep.mubr.msk.bf16.mxu1 %vm173_vm2, %v4093_v44  ;;  %5411 = vmatprep.subr.bf16.mxu0 %v5944_v47  ;;  %v5950_v44 = vld [vmem:[%s7254_s2 + $0x68] sm:$0xff]  }
0x1193   :  { %v4092_v29 = vsel %vm1920_vm5, %v4088_v39, %v5924_v22  ;;  %v4091_v26 = vsel %vm1920_vm5, %v4087_v27, %v5923_v60 }
0x1194   :  { %v4094_v62 = vpack.c.bf16 %v4092_v29, %v4091_v26 }
0x1195   :  { %5412 = vmatpush3.bf16.msra.mxu0 %v5944_v47  ;;  %v4326_v47 = vsub.s32 7, %v6205_v5 }
0x1196   :  { %5406 = vmatmul.mubr.msk.bf16.vlgmr.msra.gmra.mrb[40].mxu1 %vm173_vm2, %v4094_v62 }
0x1197   :  { %5418 = vmatpush3.bf16.msra.mxu1 %v5945_v57  ;;  %v4327_v57 = vrot.slane %v7160_v2, %v4326_v47 }
0x1198   :  { %5419 = vmatprep.subr.bf16.mxu1 %v5946_v17 }
0x119b   :  { %5420 = vmatpush3.bf16.msra.mxu1 %v5946_v17 }
0x119c   :  { %5421 = vmatprep.subr.bf16.mxu1 %v5947_v56 }
0x119f   :  { %5422 = vmatpush3.bf16.msra.mxu1 %v5947_v56 }
0x11a0   :  { %5423 = vmatprep.subr.bf16.mxu1 %v5948_v32 }
0x11a3   :  { %5424 = vmatpush3.bf16.msra.mxu1 %v5948_v32 }
0x11a4   :  { %5425 = vmatprep.subr.bf16.mxu1 %v5949_v43 }
0x11a7   :  { %5426 = vmatpush3.bf16.msra.mxu1 %v5949_v43 }
0x11a8   :  { %5427 = vmatprep.subr.bf16.mxu1 %v5950_v44 }
0x11ab   :  { %5428 = vmatpush3.bf16.msra.mxu1 %v5950_v44 }
0x1269   :  { %v5407_v34 = vpop.f32.mrb[40].mxu1 }
0x126a   :  { %v4145_v6 = vpop.f32.mrb[41].mxu1  ;;  %v4154_v30 = vadd.f32 %v5407_v34, %v4103_v38 }
0x126b   :  { %v4146_v20 = vadd.f32 %v4145_v6, %v4103_v38  ;;  %v5408_v8 = vpop.f32.mrb[42].mxu1 }
0x126c   :  { %v4157_v15 = vadd.f32 %v5408_v8, %v4103_v38  ;;  %v4148_v50 = vpop.f32.mrb[43].mxu1  ;;  %v4162_v46 = vadd.f32 %v4154_v30, %v6760_v45 }
0x126d   :  { %v4160_v28 = vadd.f32 %v4146_v20, %v6756_v48  ;;  %v4149_v16 = vadd.f32 %v4148_v50, %v4103_v38 }
0x126e   :  { %v4163_v42 = vadd.f32 %v4157_v15, %v6754_v14  ;;  %v4170_v53 = vsel %vm173_vm2, %v4162_v46, 0.0 }
0x126f   :  { %v4161_v59 = vadd.f32 %v4149_v16, %v6758_v13  ;;  %v4164_v31 = vsel %vm173_vm2, %v4160_v28, 0.0 }
0x1270   :  { %4165 = vadd.xlane.f32.xlu1 %v4164_v31  ;;  %v4173_v49 = vsel %vm173_vm2, %v4163_v42, 0.0 }
0x1271   :  { %v4167_v35 = vsel %vm173_vm2, %v4161_v59, 0.0 }
0x1272   :  { %4168 = vadd.xlane.f32.xlu0 %v4167_v35 }
0x1274   :  { %4174 = vadd.xlane.f32.xlu1 %v4173_v49 }
0x1276   :  { %4171 = vadd.xlane.f32.xlu0 %v4170_v53 }
0x12fd   :  { %v4166_v48 = vpop.xlane.xlu1 %4165 }
0x12fe   :  { %v4176_v33 = vmul.f32 0.03125, %v4166_v48 }
0x12ff   :  { %v4169_v24 = vpop.xlane.xlu0 %4168 }
0x1300   :  { %v7143_v14 = vsub.f32 %v4160_v28, %v4176_v33  ;;  %v4177_v13 = vmul.f32 0.03125, %v4169_v24 }
0x1301   :  { %v4175_v61 = vpop.xlane.xlu1 %4174 }
0x1302   :  { %v7145_v51 = vsub.f32 %v4161_v59, %v4177_v13  ;;  %v4179_v11 = vmul.f32 0.03125, %v4175_v61  ;;  %v4184_v45 = vmul.f32 %v7143_v14, %v7143_v14  ;;  %v5951_v13 = vld [vmem:[%s7254_s2 + $0x70] sm:$0xff]   ;;  %v5952_v61 = vld [vmem:[%s7254_s2 + $0x78] sm:$0xff]  }
0x1303   :  { %v4172_v19 = vpop.xlane.xlu0 %4171  ;;  %5429 = vmatprep.subr.bf16.mxu1 %v5951_v13 }
0x1304   :  { %v7149_v23 = vsub.f32 %v4163_v42, %v4179_v11  ;;  %v4178_v58 = vmul.f32 0.03125, %v4172_v19  ;;  %v4188_v55 = vsel %vm173_vm2, %v4184_v45, 0.0  ;;  %v4185_v10 = vmul.f32 %v7145_v51, %v7145_v51  ;;  %5430 = vmatpush3.bf16.msra.mxu1 %v5951_v13 }
0x1305   :  { %4189 = vadd.xlane.f32.xlu0 %v4188_v55  ;;  %5431 = vmatprep.subr.bf16.mxu1 %v5952_v61  ;;  %v6156_v13 = vmov 0.0|0.0  }
0x1306   :  { %v4182_v37 = vsub.f32 %v4162_v46, %v4178_v58  ;;  %v4191_v63 = vsel %vm173_vm2, %v4185_v10, 0.0  ;;  %v4187_v41 = vmul.f32 %v7149_v23, %v7149_v23  ;;  %5660 = vmatprep.subr.bf16.mxu0 %v6156_v13 }
0x1307   :  { %4192 = vadd.xlane.f32.xlu1 %v4191_v63 }
0x1308   :  { %v4186_v18 = vmul.f32 %v4182_v37, %v4182_v37  ;;  %v4197_v1 = vsel %vm173_vm2, %v4187_v41, 0.0  ;;  %5432 = vmatpush3.bf16.msra.mxu1 %v5952_v61  ;;  %v4569_v61 = vld [vmem:[#allocation2 + $0x18] sm:$0xff] }
0x1309   :  { %5654 = vmatprep.subr.bf16.mxu1 %v6156_v13 }
0x130a   :  { %v4194_v4 = vsel %vm173_vm2, %v4186_v18, 0.0 }
0x130b   :  { %4195 = vadd.xlane.f32.xlu0 %v4194_v4  ;;  %4198 = vadd.xlane.f32.xlu1 %v4197_v1 }
0x1321   :  { %4225 = vrot.lane.b32.xlu0 %v7163_v21, %s6148_s8 }
0x1392   :  { %v4190_v36 = vpop.xlane.xlu0 %4189 }
0x1393   :  { %v4200_v9 = vmul.f32 0.03125, %v4190_v36 }
0x1394   :  { %v4193_v25 = vpop.xlane.xlu1 %4192 }
0x1395   :  { %v4204_v22 = vadd.f32 1e-05, %v4200_v9  ;;  %v4201_v60 = vmul.f32 0.03125, %v4193_v25 }
0x1397   :  { %6097 = vrsqrt.f32 %v4204_v22  ;;  %v4205_v39 = vadd.f32 1e-05, %v4201_v60 }
0x1398   :  { %v4196_v27 = vpop.xlane.xlu0 %4195  ;;  %v4199_v29 = vpop.xlane.xlu1 %4198 }
0x1399   :  { %6099 = vrsqrt.f32 %v4205_v39  ;;  %v4202_v26 = vmul.f32 0.03125, %v4196_v27  ;;  %v4203_v62 = vmul.f32 0.03125, %v4199_v29 }
0x139b   :  { %v4206_v38 = vadd.f32 1e-05, %v4202_v26  ;;  %v4207_v34 = vadd.f32 1e-05, %v4203_v62 }
0x139c   :  { %v4226_v30 = vpop.permute.xlu0 %4225 }
0x139d   :  { %6101 = vrsqrt.f32 %v4206_v38 }
0x139e   :  { %6103 = vrsqrt.f32 %v4207_v34 }
0x13a1   :  { %v6098_v6 = vpop.eup %6097 }
0x13a2   :  { %v4212_v20 = vmul.f32 %v6098_v6, %v7143_v14 }
0x13a3   :  { %v6100_v8 = vpop.eup %6099 }
0x13a4   :  { %v4220_v15 = vmul.f32 %v7163_v21, %v4212_v20  ;;  %v4213_v50 = vmul.f32 %v6100_v8, %v7145_v51  ;;  %v4236_v51 = vsub.s32 5, %v6205_v5 }
0x13a6   :  { %v4221_v28 = vmul.f32 %v7163_v21, %v4213_v50  ;;  %v4228_v31 = vadd.f32 %v4226_v30, %v4220_v15  ;;  %v4237_v11 = vrot.slane %v7160_v2, %v4236_v51  ;;  %v4570_v51 = vld [vmem:[#allocation2 + $0x20] sm:$0xff] }
0x13a7   :  { %v6102_v16 = vpop.eup %6101 }
0x13a8   :  { %v6104_v42 = vpop.eup %6103  ;;  %v4214_v59 = vmul.f32 %v6102_v16, %v4182_v37  ;;  %v4229_v46 = vadd.f32 %v4226_v30, %v4221_v28 }
0x13a9   :  { %v4215_v35 = vmul.f32 %v6104_v42, %v7149_v23 }
0x13aa   :  { %v4222_v49 = vmul.f32 %v7163_v21, %v4214_v59  ;;  %v4232_v53 = vpack.c.bf16 %v4229_v46, %v4228_v31 }
0x13ab   :  { %v4223_v48 = vmul.f32 %v7163_v21, %v4215_v35 }
0x13ac   :  { %v4230_v33 = vadd.f32 %v4226_v30, %v4222_v49  ;;  %5413 = vmatprep.mubr.msk.bf16.mxu0 %vm173_vm2, %v4232_v53 }
0x13ad   :  { %v4231_v24 = vadd.f32 %v4226_v30, %v4223_v48 }
0x13af   :  { %v4233_v14 = vpack.c.bf16 %v4231_v24, %v4230_v33 }
0x13b1   :  { %5414 = vmatmul.mubr.msk.bf16.vlgmr.msra.gmra.mrb[48].mxu0 %vm173_vm2, %v4233_v14  ;;  %v6117_v14 = vld [vmem:[#allocation2] sm:$0xff] }
0x13b2   :  { %5456 = vmatprep.mubr.msk.f32.mxu0 %vm6146_vm0, %v6145_v0 }
0x1484   :  { %v5415_v45 = vpop.f32.mrb[48].mxu0 }
0x1485   :  { %v4295_v19 = vadd.f32 %v5415_v45, %v4237_v11  ;;  %v4286_v23 = vpop.f32.mrb[49].mxu0  ;;  %v5661_v45 = vpack.c.bf16 %v4570_v51, %v4569_v61  ;;  %v4585_v51 = vld [vmem:[#allocation2 + $0x98] sm:$0xff] }
0x1486   :  { %v4287_v58 = vadd.f32 %v4286_v23, %v4237_v11  ;;  %v5416_v55 = vpop.f32.mrb[50].mxu0 }
0x1487   :  { %v4298_v10 = vadd.f32 %v5416_v55, %v4237_v11  ;;  %v4289_v37 = vpop.f32.mrb[51].mxu0  ;;  %v4303_v41 = vmax.f32 %v4295_v19, 0.0  ;;  %v4572_v19 = vld [vmem:[#allocation2 + $0x30] sm:$0xff]  ;;  %5662 = vmatpush3.bf16.msra.mxu0 %v5661_v45 }
0x1488   :  { %v4290_v63 = vadd.f32 %v4289_v37, %v4237_v11  ;;  %v4301_v4 = vmax.f32 %v4287_v58, 0.0  ;;  %v4571_v11 = vld [vmem:[#allocation2 + $0x28] sm:$0xff]  ;;  %5663 = vmatprep.subr.bf16.mxu0 %v6156_v13 }
0x1489   :  { %v4304_v18 = vmax.f32 %v4298_v10, 0.0  ;;  %v5664_v23 = vpack.c.bf16 %v4572_v19, %v4571_v11  ;;  %v4586_v11 = vld [vmem:[#allocation2 + $0xa0] sm:$0xff]  ;;  %v4587_v19 = vld [vmem:[#allocation2 + $0xa8] sm:$0xff] }
0x148a   :  { %v4302_v1 = vmax.f32 %v4290_v63, 0.0  ;;  %v5685_v45 = vpack.c.bf16 %v4586_v11, %v4585_v51 }
0x148b   :  { %v4306_v54 = vpack.c.bf16 %v4304_v18, %v4303_v41  ;;  %5665 = vmatpush3.bf16.msra.mxu0 %v5664_v23  ;;  %v4588_v23 = vld [vmem:[#allocation2 + $0xb0] sm:$0xff] }
0x148c   :  { %v4305_v3 = vpack.c.bf16 %v4302_v1, %v4301_v4  ;;  %5666 = vmatprep.subr.bf16.mxu0 %v6156_v13 }
0x148e   :  { %5433 = vmatprep.mubr.bf16.mxu1 %v4305_v3 }
0x148f   :  { %5434 = vmatmul.mubr.bf16.vlgmr.msra.gmra.mrb[44].mxu1 %v4306_v54 }
0x1490   :  { %5445 = vmatprep.mubr.msk.f32.mxu1 %vm6146_vm0, %v6145_v0 }
0x1562   :  { %v5435_v17 = vpop.f32.mrb[44].mxu1 }
0x1563   :  { %v4419_v56 = vadd.f32 %v5435_v17, %v4327_v57  ;;  %v4410_v32 = vpop.f32.mrb[45].mxu1 }
0x1564   :  { %v4411_v43 = vadd.f32 %v4410_v32, %v4327_v57  ;;  %v5436_v44 = vpop.f32.mrb[46].mxu1 }
0x1565   :  { %v4427_v36 = vadd.f32 %v4419_v56, %v4230_v33  ;;  %v4413_v9 = vpop.f32.mrb[47].mxu1  ;;  %v4422_v39 = vadd.f32 %v5436_v44, %v4327_v57 }
0x1566   :  { %v4425_v25 = vadd.f32 %v4411_v43, %v4228_v31  ;;  %v4414_v22 = vadd.f32 %v4413_v9, %v4327_v57 }
0x1567   :  { %v4435_v60 = vsel %vm173_vm2, %v4427_v36, 0.0  ;;  %v4428_v26 = vadd.f32 %v4422_v39, %v4231_v24 }
0x1568   :  { %4436 = vadd.xlane.f32.xlu1 %v4435_v60  ;;  %v4426_v27 = vadd.f32 %v4414_v22, %v4229_v46  ;;  %v4429_v29 = vsel %vm173_vm2, %v4425_v25, 0.0 }
0x1569   :  { %v4438_v62 = vsel %vm173_vm2, %v4428_v26, 0.0 }
0x156a   :  { %v4432_v2 = vsel %vm173_vm2, %v4426_v27, 0.0 }
0x156c   :  { %4430 = vadd.xlane.f32.xlu1 %v4429_v29 }
0x1570   :  { %4433 = vadd.xlane.f32.xlu1 %v4432_v2 }
0x1574   :  { %4439 = vadd.xlane.f32.xlu1 %v4438_v62 }
0x15f5   :  { %v4437_v38 = vpop.xlane.xlu1 %4436 }
0x15f6   :  { %v4443_v34 = vmul.f32 0.03125, %v4437_v38 }
0x15f8   :  { %v4447_v8 = vsub.f32 %v4427_v36, %v4443_v34 }
0x15f9   :  { %v4431_v6 = vpop.xlane.xlu1 %4430 }
0x15fa   :  { %v4441_v20 = vmul.f32 0.03125, %v4431_v6  ;;  %v4451_v59 = vmul.f32 %v4447_v8, %v4447_v8 }
0x15fc   :  { %v4445_v15 = vsub.f32 %v4425_v25, %v4441_v20  ;;  %v4459_v53 = vsel %vm173_vm2, %v4451_v59, 0.0  ;;  %v4573_v20 = vld [vmem:[#allocation2 + $0x38] sm:$0xff] }
0x15fd   :  { %v4434_v50 = vpop.xlane.xlu1 %4433  ;;  %v4577_v59 = vld [vmem:[#allocation2 + $0x58] sm:$0xff] }
0x15fe   :  { %v4442_v30 = vmul.f32 0.03125, %v4434_v50  ;;  %v4449_v28 = vmul.f32 %v4445_v15, %v4445_v15  ;;  %v4575_v50 = vld [vmem:[#allocation2 + $0x48] sm:$0xff] }
0x1600   :  { %v4446_v16 = vsub.f32 %v4426_v27, %v4442_v30  ;;  %v4453_v42 = vsel %vm173_vm2, %v4449_v28, 0.0  ;;  %v4576_v30 = vld [vmem:[#allocation2 + $0x50] sm:$0xff] }
0x1601   :  { %4454 = vadd.xlane.f32.xlu1 %v4453_v42  ;;  %v4440_v31 = vpop.xlane.xlu1 %4439  ;;  %v5670_v42 = vpack.c.bf16 %v4576_v30, %v4575_v50 }
0x1602   :  { %v4444_v46 = vmul.f32 0.03125, %v4440_v31  ;;  %v4450_v35 = vmul.f32 %v4446_v16, %v4446_v16  ;;  %v4578_v31 = vld [vmem:[#allocation2 + $0x60] sm:$0xff] }
0x1604   :  { %v4448_v49 = vsub.f32 %v4428_v26, %v4444_v46  ;;  %v4456_v48 = vsel %vm173_vm2, %v4450_v35, 0.0  ;;  %v5673_v46 = vpack.c.bf16 %v4578_v31, %v4577_v59  ;;  %v4579_v35 = vld [vmem:[#allocation2 + $0x68] sm:$0xff] }
0x1605   :  { %4460 = vadd.xlane.f32.xlu1 %v4459_v53  ;;  %4457 = vadd.xlane.f32.xlu0 %v4456_v48  ;;  %v4581_v48 = vld [vmem:[#allocation2 + $0x78] sm:$0xff] }
0x1606   :  { %v4452_v33 = vmul.f32 %v4448_v49, %v4448_v49 }
0x1608   :  { %v4462_v24 = vsel %vm173_vm2, %v4452_v33, 0.0  ;;  %v4582_v33 = vld [vmem:[#allocation2 + $0x80] sm:$0xff] }
0x1609   :  { %4463 = vadd.xlane.f32.xlu1 %v4462_v24  ;;  %v5679_v24 = vpack.c.bf16 %v4582_v33, %v4581_v48 }
0x161a   :  { %4481 = vrot.lane.b32.xlu1 %v7163_v21, %s6152_s12 }
0x161e   :  { %4488 = vrot.lane.b32.xlu1 %v7163_v21, %s6153_s13 }
0x1622   :  { %4495 = vrot.lane.b32.xlu1 %v6117_v14, %s6153_s13  ;;  %v4584_v14 = vld [vmem:[#allocation2 + $0x90] sm:$0xff] }
0x168e   :  { %v4455_v21 = vpop.xlane.xlu1 %4454 }
0x168f   :  { %v4465_v58 = vmul.f32 0.03125, %v4455_v21  ;;  %v5688_v21 = vpack.c.bf16 %v4588_v23, %v4587_v19 }
0x1691   :  { %v4469_v55 = vadd.f32 1e-05, %v4465_v58  ;;  %v4589_v58 = vld [vmem:[#allocation2 + $0xb8] sm:$0xf] }
0x1692   :  { %v4458_v10 = vpop.xlane.xlu0 %4457  ;;  %v4461_v37 = vpop.xlane.xlu1 %4460 }
0x1693   :  { %6105 = vrsqrt.f32 %v4469_v55  ;;  %v4466_v63 = vmul.f32 0.03125, %v4458_v10  ;;  %v4467_v41 = vmul.f32 0.03125, %v4461_v37  ;;  %v4593_v55 = vrot.slane %v4589_v58, %v6215_v7 }
0x1694   :  { %v4755_v7 = vrot.slane %v4589_v58, %v2158_v52 }
0x1695   :  { %v4470_v18 = vadd.f32 1e-05, %v4466_v63  ;;  %v4471_v4 = vadd.f32 1e-05, %v4467_v41 }
0x1696   :  { %v4464_v1 = vpop.xlane.xlu1 %4463 }
0x1697   :  { %6107 = vrsqrt.f32 %v4470_v18  ;;  %v4468_v54 = vmul.f32 0.03125, %v4464_v1  ;;  %v4671_v18 = vrot.slane %v4589_v58, %v6222_v12 }
0x1698   :  { %6109 = vrsqrt.f32 %v4471_v4 }
0x1699   :  { %v4472_v3 = vadd.f32 1e-05, %v4468_v54  ;;  %v4746_v54 = vrot.slane %v4589_v58, %v2051_v40 }
0x169a   :  { %v4482_v57 = vpop.permute.xlu1 %4481 }
0x169b   :  { %6111 = vrsqrt.f32 %v4472_v3 }
0x169d   :  { %v6106_v47 = vpop.eup %6105 }
0x169e   :  { %v4477_v17 = vmul.f32 %v6106_v47, %v4445_v15  ;;  %v4489_v9 = vpop.permute.xlu1 %4488 }
0x16a0   :  { %v4484_v44 = vmul.f32 %v4482_v57, %v4477_v17 }
0x16a1   :  { %v6108_v56 = vpop.eup %6107 }
0x16a2   :  { %v6110_v32 = vpop.eup %6109  ;;  %v4478_v43 = vmul.f32 %v6108_v56, %v4446_v16  ;;  %v4491_v27 = vadd.f32 %v4489_v9, %v4484_v44  ;;  %v4496_v6 = vpop.permute.xlu1 %4495 }
0x16a3   :  { %v4479_v36 = vmul.f32 %v6110_v32, %v4447_v8  ;;  %v4574_v8 = vld [vmem:[#allocation2 + $0x40] sm:$0xff] }
0x16a4   :  { %v4485_v25 = vmul.f32 %v4482_v57, %v4478_v43  ;;  %v5667_v15 = vpack.c.bf16 %v4574_v8, %v4573_v20 }
0x16a5   :  { %v6112_v22 = vpop.eup %6111  ;;  %v4486_v39 = vmul.f32 %v4482_v57, %v4479_v36 }
0x16a6   :  { %v4480_v60 = vmul.f32 %v6112_v22, %v4448_v49  ;;  %v4492_v29 = vadd.f32 %v4489_v9, %v4485_v25  ;;  %v4580_v49 = vld [vmem:[#allocation2 + $0x70] sm:$0xff] }
0x16a7   :  { %v4493_v62 = vadd.f32 %v4489_v9, %v4486_v39  ;;  %v5676_v53 = vpack.c.bf16 %v4580_v49, %v4579_v35 }
0x16a8   :  { %v4487_v26 = vmul.f32 %v4482_v57, %v4480_v60  ;;  %v5655_v2 = vpack.c.bf16 %v4492_v29, %v4491_v27 }
0x16aa   :  { %v4494_v38 = vadd.f32 %v4489_v9, %v4487_v26  ;;  %5656 = vmatpush3.bf16.msra.mxu1 %v5655_v2 }
0x16ab   :  { %5657 = vmatprep.subr.bf16.mxu1 %v6156_v13 }
0x16ac   :  { %v5658_v34 = vpack.c.bf16 %v4494_v38, %v4493_v62 }
0x16ae   :  { %5659 = vmatpush3.bf16.msra.mxu1 %v5658_v34 }
0x16b1   :  { %5446 = vmatmul.mubr.msk.f32.vlgmr.msra.gmra.mrb[38].mxu1 %vm173_vm2, %v4496_v6 }
0x1784   :  { %v4565_v28 = vpop.f32.mrb[38].mxu1 }
0x1785   :  { %v5447_v16 = vpop.f32.mrb[39].mxu1  ;;  %5457 = vmatmul.mubr.msk.f32.vlgmr.msra.gmra.mrb[52].mxu0 %vm173_vm2, %v4565_v28 }
0x1786   :  { %5668 = vmatpush3.bf16.msra.mxu0 %v5667_v15  ;;  %5491 = vmatprep.mubr.msk.f32.mxu0 %vm6146_vm0, %v6145_v0  ;;  %v4583_v0 = vld [vmem:[#allocation2 + $0x88] sm:$0xff] }
0x1787   :  { %5669 = vmatprep.subr.bf16.mxu0 %v6156_v13  ;;  %v5682_v61 = vpack.c.bf16 %v4584_v14, %v4583_v0 }
0x178a   :  { %5671 = vmatpush3.bf16.msra.mxu0 %v5670_v42 }
0x178b   :  { %5672 = vmatprep.subr.bf16.mxu0 %v6156_v13 }
0x178e   :  { %5674 = vmatpush3.bf16.msra.mxu0 %v5673_v46 }
0x178f   :  { %5675 = vmatprep.subr.bf16.mxu0 %v6156_v13 }
0x1792   :  { %5677 = vmatpush3.bf16.msra.mxu0 %v5676_v53 }
0x1793   :  { %5678 = vmatprep.subr.bf16.mxu0 %v6156_v13 }
0x1796   :  { %5680 = vmatpush3.bf16.msra.mxu0 %v5679_v24 }
0x1797   :  { %5681 = vmatprep.subr.bf16.mxu0 %v6156_v13 }
0x179a   :  { %5683 = vmatpush3.bf16.msra.mxu0 %v5682_v61 }
0x179b   :  { %5684 = vmatprep.subr.bf16.mxu0 %v6156_v13 }
0x179e   :  { %5686 = vmatpush3.bf16.msra.mxu0 %v5685_v45 }
0x179f   :  { %5687 = vmatprep.subr.bf16.mxu0 %v6156_v13 }
0x17a2   :  { %5689 = vmatpush3.bf16.msra.mxu0 %v5688_v21 }
0x1858   :  { %v4663_v10 = vpop.f32.mrb[52].mxu0 }
0x1859   :  { %v4664_v37 = vadd.f32 %v4663_v10, %v4593_v55  ;;  %v5458_v63 = vpop.f32.mrb[53].mxu0 }
0x185b   :  { %v4667_v41 = vmax.f32 %v4664_v37, 0.0 }
0x185d   :  { %5492 = vmatmul.mubr.f32.vlgmr.msra.gmra.mrb[54].mxu0 %v4667_v41 }
0x1930   :  { %v4738_v4 = vpop.f32.mrb[54].mxu0 }
0x1931   :  { %v4739_v1 = vadd.f32 %v4738_v4, %v4671_v18  ;;  %v5493_v13 = vpop.f32.mrb[55].mxu0 }
0x1933   :  { %v4742_v3 = vmax.f32 %v4739_v1, 0.0 }
0x1935   :  { %v4747_v47 = vmul.f32 %v4746_v54, %v4742_v3 }
0x1937   :  { %v4749_v57 = vsel %vm4748_vm6, %v4747_v47, 0.0 }
0x1938   :  { %4750 = vadd.xlane.f32.xlu0 %v4749_v57 }
0x19c5   :  { %v4751_v17 = vpop.xlane.xlu0 %4750 }
0x19c6   :  { %v4756_v56 = vadd.f32 %v4755_v7, %v4751_v17 }
0x19c8   :  { %4758 = vst.msk [vmem:[%s7256_s4] sm:$0x3] %vm4757_vm7, %v4756_v56 }
0x19c9   :  { %4763 = vsyncpa [#allocation3], 1 }

</bundles_post_ra>
